<compile_context>
chip_gen: v5e
topology: v5e:2x2
jax: 0.10.0
libtpu: 0.0.40
codegen_flags: <defaults>
</compile_context>

<pallas_src>
import functools
from math import log

import jax
import jax.numpy as jnp
from jax.experimental import pallas as pl
from jax.experimental.pallas import tpu as pltpu

HIDDEN = 512      # fc output dim (hardcoded in the PyTorch module)
ATTN_DIM = 256    # gated-attention hidden dim
NUM_CLASSES = 2


def _tpu_kind():
    try:
        return jax.devices()[0].device_kind.lower()
    except Exception:
        return ""


def _kernel_defaults():
    """Generation-aware defaults: (use_bf16_gate, tile_n_cap, vmem_limit)."""
    kind = _tpu_kind()
    is_v7 = "v7" in kind
    has_bf16_vpu = is_v7 or ("v6" in kind)        # v5e has no bf16 VPU/EUP
    tile_cap = 1024 if is_v7 else 2048            # v7x: 64 MiB VMEM; v5e/v6e: 128 MiB
    vmem_limit = (40 if is_v7 else 64) * 1024 * 1024
    return has_bf16_vpu, tile_cap, vmem_limit


def _choose_tile_n(n, cap):
    """Largest multiple of 128 dividing n (capped); fall back to one tile."""
    t = min(cap, n)
    t -= t % 128
    while t >= 128:
        if n % t == 0:
            return t
        t -= 128
    return n


# ----------------------------------------------------------------------------
# Pallas kernel: fc -> gated attention -> online-softmax pooled bag -> logits
# ----------------------------------------------------------------------------
def clam_sb_kernel(x_ref, wfc_ref, bfc_ref, wag_ref, bag_bias_ref,
                   ww_ref, bw_ref, wc_ref, bc_ref,
                   logits_ref, scores_ref, h_ref,
                   m_acc, l_acc, bag_acc, *, gate_dtype):
    n_idx = pl.program_id(1)

    @pl.when(n_idx == 0)
    def _init():
        m_acc[...] = jnp.full_like(m_acc, -jnp.inf)
        l_acc[...] = jnp.zeros_like(l_acc)
        bag_acc[...] = jnp.zeros_like(bag_acc)

    # fc: Linear(D, 512) + ReLU (+ Dropout(p=0.0) == identity). x arrives bf16.
    x = x_ref[0]                                                      # (tn, D) bf16
    h = jnp.dot(x, wfc_ref[...], preferred_element_type=jnp.float32) \
        + bfc_ref[...]
    h = jnp.maximum(h, 0.0)                                           # (tn, H) f32
    h_bf = h.astype(jnp.bfloat16)
    h_ref[0] = h_bf                                                   # bf16 writeback

    # Gated attention: fused [tanh | sigmoid] branches, one MXU pass.
    # gate_dtype is bf16 on v6e/v7x (bf16 EUP/VPU), f32 on v5e.
    ag = jnp.dot(h_bf, wag_ref[...], preferred_element_type=gate_dtype)
    ag = ag + bag_bias_ref[...].astype(gate_dtype)                    # (tn, 2A)
    a = jnp.tanh(ag[:, :ATTN_DIM])
    g = jax.nn.sigmoid(ag[:, ATTN_DIM:])
    gate = (a * g).astype(jnp.float32)                                # (tn, A) f32

    # Score head: degenerate (A, 1) matmul done as VPU multiply + lane reduce.
    s_col = jnp.sum(gate * ww_ref[...], axis=-1, keepdims=True) + bw_ref[...]  # (tn,1)
    # One transpose to a lane-dense row, reused by the scores store, the
    # running-max update, and the MXU pooling matvec below.
    s_row = s_col.T                                                   # (1, tn)
    scores_ref[0] = s_row

    # Online softmax; attention pooling as a (1,tn)@(tn,H) MXU matvec.
    m_prev = m_acc[...]                                               # (1, 1)
    m_new = jnp.maximum(m_prev, jnp.max(s_row, axis=-1, keepdims=True))
    corr = jnp.exp(m_prev - m_new)                                    # (1, 1)
    p_row = jnp.exp(s_row - m_new)                                    # (1, tn)
    l_acc[...] = corr * l_acc[...] + jnp.sum(p_row, axis=-1, keepdims=True)
    bag_acc[...] = corr * bag_acc[...] + jnp.dot(
        p_row.astype(jnp.bfloat16), h_bf, preferred_element_type=jnp.float32)
    m_acc[...] = m_new

    @pl.when(n_idx == pl.num_programs(1) - 1)
    def _finalize():
        # Exact divide: runs once per bag, approx reciprocal buys nothing here.
        bag = bag_acc[...] / l_acc[...]                               # (1, H)
        logits_ref[0] = (jnp.dot(bag, wc_ref[...],
                                 preferred_element_type=jnp.float32)
                         + bc_ref[...])                               # (1, C)


def clam_sb_pallas(x, params, tile_n=None, use_bf16_gate=None):
    B, N, D = x.shape
    H, A, C = HIDDEN, ATTN_DIM, NUM_CLASSES

    default_bf16_gate, tile_cap, vmem_limit = _kernel_defaults()
    if use_bf16_gate is None:
        use_bf16_gate = default_bf16_gate
    if tile_n is None:
        tile_n = _choose_tile_n(N, tile_cap)
    assert N % tile_n == 0, "instance axis must be divisible by the N tile"
    num_n = N // tile_n

    # bf16 activations / weights for the MXU (f32 accumulation in-kernel);
    # biases and the tiny score / classifier heads stay f32.
    x_bf = x.astype(jnp.bfloat16)
    w_fc = params["w_fc"].astype(jnp.bfloat16)
    w_ag = jnp.concatenate([params["w_a"], params["w_g"]],
                           axis=1).astype(jnp.bfloat16)               # (H, 2A)
    b_ag = jnp.concatenate([params["b_a"], params["b_g"]], axis=1)    # (1, 2A)
    w_w = params["w_w"].reshape(1, A)                                 # row vector
    b_w = params["b_w"]                                               # (1, 1)
    w_c = params["w_c"]
    b_c = params["b_c"]
    b_fc = params["b_fc"]

    grid_spec = pltpu.PrefetchScalarGridSpec(
        num_scalar_prefetch=0,
        grid=(B, num_n),
        in_specs=[
            pl.BlockSpec((1, tile_n, D), lambda b, n: (b, n, 0)),   # x tile (bf16)
            pl.BlockSpec((D, H), lambda b, n: (0, 0)),              # W_fc (bf16)
            pl.BlockSpec((1, H), lambda b, n: (0, 0)),              # b_fc
            pl.BlockSpec((H, 2 * A), lambda b, n: (0, 0)),          # W_a|W_g fused (bf16)
            pl.BlockSpec((1, 2 * A), lambda b, n: (0, 0)),          # b_a|b_g fused
            pl.BlockSpec((1, A), lambda b, n: (0, 0)),              # w_w row
            pl.BlockSpec((1, 1), lambda b, n: (0, 0)),              # b_w
            pl.BlockSpec((H, C), lambda b, n: (0, 0)),              # W_c
            pl.BlockSpec((1, C), lambda b, n: (0, 0)),              # b_c
        ],
        out_specs=[
            pl.BlockSpec((1, 1, C), lambda b, n: (b, 0, 0)),        # logits (resident over n)
            pl.BlockSpec((1, 1, tile_n), lambda b, n: (b, 0, n)),   # raw attention scores
            pl.BlockSpec((1, tile_n, H), lambda b, n: (b, n, 0)),   # h (bf16, for clustering)
        ],
        scratch_shapes=[
            pltpu.VMEM((1, 1), jnp.float32),    # running max
            pltpu.VMEM((1, 1), jnp.float32),    # running sum of exp
            pltpu.VMEM((1, H), jnp.float32),    # running attn-weighted h
        ],
    )

    gate_dtype = jnp.bfloat16 if use_bf16_gate else jnp.float32
    kernel = functools.partial(clam_sb_kernel, gate_dtype=gate_dtype)

    # Advisory cost hint so XLA schedules the surrounding softmax/top_k/
    # clustering glue around (not after) the custom call.
    flops = 2 * B * N * (D * H + H * 2 * A + A + H) + 2 * B * H * C
    transcendentals = B * N * (2 * A + 2)
    bytes_accessed = (B * N * D * 2 + B * N * H * 2 + B * N * 4 + B * C * 4
                      + (D * H + H * 2 * A) * 2
                      + (H + 2 * A + A + 1 + H * C + C) * 4)
    cost = pl.CostEstimate(flops=flops, transcendentals=transcendentals,
                           bytes_accessed=bytes_accessed)

    logits, scores, h = pl.pallas_call(
        kernel,
        out_shape=(
            jax.ShapeDtypeStruct((B, 1, C), jnp.float32),
            jax.ShapeDtypeStruct((B, 1, N), jnp.float32),
            jax.ShapeDtypeStruct((B, N, H), jnp.bfloat16),
        ),
        grid_spec=grid_spec,
        compiler_params=pltpu.CompilerParams(
            dimension_semantics=("parallel", "arbitrary"),
            vmem_limit_bytes=vmem_limit,
        ),
        cost_estimate=cost,
    )(x_bf, w_fc, b_fc, w_ag, b_ag, w_w, b_w, w_c, b_c)

    # Cheap normalization of the raw scores to softmax attention weights
    # (only needed by the clustering glue; bag pooling already used the
    # online-softmax weights inside the kernel).
    attn = jax.nn.softmax(scores[:, 0, :], axis=-1)                   # (B, N)
    return logits[:, 0, :], attn, h


# ----------------------------------------------------------------------------
# SmoothTop1SVM loss + instance clustering (plain JAX glue; data-dependent
# branching in the PyTorch code is replaced by equivalent masked reductions).
# ----------------------------------------------------------------------------
def smooth_top1_svm_loss(logits, targets, tau=1.0, alpha=1.0,
                         num_classes=NUM_CLASSES, thresh=1000.0):
    logits = logits.astype(jnp.float32)
    top2 = jax.lax.top_k(logits, 2)[0]
    hard = (top2[:, 0] - top2[:, 1]) >= tau * log(thresh)
    smooth = jnp.logical_not(hard)

    labels = jnp.arange(num_classes)
    delta = (targets[:, None] != labels[None, :]).astype(jnp.float32)
    gathered = jnp.take_along_axis(logits, targets[:, None], axis=1)   # (M, 1)

    x_aug = logits + alpha * delta
    smooth_per = tau * jax.nn.logsumexp((x_aug - gathered) / tau, axis=1)
    hard_per = jnp.max(x_aug, axis=1) - gathered[:, 0]

    n_s = jnp.sum(smooth)
    n_h = jnp.sum(hard)
    loss = jnp.where(
        n_s > 0,
        jnp.sum(smooth_per * smooth.astype(jnp.float32)) / jnp.maximum(n_s, 1),
        0.0)
    loss = loss + jnp.where(
        n_h > 0,
        jnp.sum(hard_per * hard.astype(jnp.float32)) / jnp.maximum(n_h, 1),
        0.0)
    return loss


def cluster_for_true_class(attn_w_b, h_b, w_inst, b_inst, num_samples):
    top_p_ids = jax.lax.top_k(attn_w_b, num_samples)[1]
    top_n_ids = jax.lax.top_k(-attn_w_b, num_samples)[1]
    top_p = h_b[top_p_ids]
    top_n = h_b[top_n_ids]
    all_instances = jnp.concatenate([top_p, top_n], axis=0).astype(jnp.float32)
    all_targets = jnp.concatenate(
        [jnp.ones(num_samples, jnp.int32), jnp.zeros(num_samples, jnp.int32)], axis=0)
    logits = all_instances @ w_inst + b_inst
    return smooth_top1_svm_loss(logits, all_targets)


# ----------------------------------------------------------------------------
# CLAM_SB forward
# ----------------------------------------------------------------------------
def clam_sb_forward(params, x, labels, clustering=False, num_samples=8,
                    tile_n=None):
    logits, attn_w, h = clam_sb_pallas(x, params, tile_n=tile_n)

    cluster_loss = jnp.float32(0.0)
    if clustering:
        B = labels.shape[0]
        total = jnp.float32(0.0)
        for b in range(B):
            label = labels[b]
            w_i = params["w_inst"][label]        # (512, 2)
            b_i = params["b_inst"][label]        # (2,)
            total = total + cluster_for_true_class(attn_w[b], h[b], w_i, b_i,
                                                   num_samples)
        cluster_loss = total / B

    Y_hat = jnp.argmax(logits, axis=-1, keepdims=True)
    Y_prob = jax.nn.softmax(logits, axis=-1)
    return {"logits": logits, "Y_prob": Y_prob, "Y_hat": Y_hat,
            "cluster_loss": cluster_loss}


# ----------------------------------------------------------------------------
# Pure-JAX f32 reference (for a generous-tolerance parity check)
# ----------------------------------------------------------------------------
def clam_sb_reference(x, params):
    h = jnp.maximum(jnp.einsum("bnd,dh->bnh", x, params["w_fc"]) + params["b_fc"], 0.0)
    a = jnp.tanh(jnp.einsum("bnh,ha->bna", h, params["w_a"]) + params["b_a"])
    g = jax.nn.sigmoid(jnp.einsum("bnh,ha->bna", h, params["w_g"]) + params["b_g"])
    s = jnp.einsum("bna,ao->bno", a * g, params["w_w"]) + params["b_w"]
    attn = jax.nn.softmax(s[..., 0], axis=-1)
    bag = jnp.einsum("bn,bnh->bh", attn, h)
    logits = bag @ params["w_c"] + params["b_c"]
    return logits, attn, h


# ----------------------------------------------------------------------------
# Deterministic parameter init (PyTorch Linear-style uniform bounds)
# ----------------------------------------------------------------------------
def _linear(key, fin, fout):
    bound = 1.0 / (fin ** 0.5)
    kw, kb = jax.random.split(key)
    w = jax.random.uniform(kw, (fin, fout), jnp.float32, -bound, bound)
    b = jax.random.uniform(kb, (1, fout), jnp.float32, -bound, bound)
    return w, b


def init_params(key, embed_dim):
    ks = jax.random.split(key, 7)
    w_fc, b_fc = _linear(ks[0], embed_dim, HIDDEN)
    w_a, b_a = _linear(ks[1], HIDDEN, ATTN_DIM)
    w_g, b_g = _linear(ks[2], HIDDEN, ATTN_DIM)
    w_w, b_w = _linear(ks[3], ATTN_DIM, 1)
    w_c, b_c = _linear(ks[4], HIDDEN, NUM_CLASSES)
    wi0, bi0 = _linear(ks[5], HIDDEN, NUM_CLASSES)
    wi1, bi1 = _linear(ks[6], HIDDEN, NUM_CLASSES)
    return {
        "w_fc": w_fc, "b_fc": b_fc,
        "w_a": w_a, "b_a": b_a,
        "w_g": w_g, "b_g": b_g,
        "w_w": w_w, "b_w": b_w,
        "w_c": w_c, "b_c": b_c,
        "w_inst": jnp.stack([wi0, wi1], axis=0),            # (2, 512, 2)
        "b_inst": jnp.stack([bi0[0], bi1[0]], axis=0),      # (2, 2)
    }


if __name__ == "__main__":
    # Small but tiling-exercising shapes: 2 bags, 256 instances, 256-dim
    # features.  tile_n=128 forces 2 N-steps per bag so the online-softmax
    # running accumulators are actually exercised across grid steps.
    B, N, EMBED_DIM = 2, 256, 256
    NUM_SAMPLES = 8

    key = jax.random.PRNGKey(0)
    kx, kl, kp = jax.random.split(key, 3)
    x = jax.random.normal(kx, (B, N, EMBED_DIM), jnp.float32)
    labels = jax.random.randint(kl, (B,), 0, NUM_CLASSES)
    params = init_params(kp, EMBED_DIM)

    out = clam_sb_forward(params, x, labels, clustering=True,
                          num_samples=NUM_SAMPLES, tile_n=128)
    jax.block_until_ready(out)

    assert out["logits"].shape == (B, NUM_CLASSES)
    assert out["Y_prob"].shape == (B, NUM_CLASSES)
    assert out["Y_hat"].shape == (B, 1)

    # Generous-tolerance parity check vs. the f32 reference (kernel runs the
    # matmuls / gated-attention path in bf16, so not bit-exact).
    ref_logits, ref_attn, _ = clam_sb_reference(x, params)
    assert jnp.allclose(out["logits"], ref_logits, atol=0.1, rtol=0.1), (
        "logits mismatch vs f32 reference")

    print("KERNEL_OK")
</pallas_src>

<mosaic_0001>
module attributes {stable_mosaic.version = 11 : i64} {
  func.func @clam_sb_kernel(%arg0: i32, %arg1: i32, %arg2: memref<1x128x256xbf16, #tpu.memory_space<vmem>>, %arg3: memref<256x512xbf16, #tpu.memory_space<vmem>>, %arg4: memref<1x512xf32, #tpu.memory_space<vmem>>, %arg5: memref<512x512xbf16, #tpu.memory_space<vmem>>, %arg6: memref<1x512xf32, #tpu.memory_space<vmem>>, %arg7: memref<1x256xf32, #tpu.memory_space<vmem>>, %arg8: memref<1x1xf32, #tpu.memory_space<vmem>>, %arg9: memref<512x2xf32, #tpu.memory_space<vmem>>, %arg10: memref<1x2xf32, #tpu.memory_space<vmem>>, %arg11: memref<1x1x2xf32, #tpu.memory_space<vmem>>, %arg12: memref<1x1x128xf32, #tpu.memory_space<vmem>>, %arg13: memref<1x128x512xbf16, #tpu.memory_space<vmem>>, %arg14: memref<1x1xf32, #tpu.memory_space<vmem>>, %arg15: memref<1x1xf32, #tpu.memory_space<vmem>>, %arg16: memref<1x512xf32, #tpu.memory_space<vmem>>) attributes {dimension_semantics = [#tpu.dimension_semantics<parallel>, #tpu.dimension_semantics<arbitrary>], iteration_bounds = array<i64: 2, 2>, scalar_prefetch = 0 : i64, scratch_operands = 3 : i64, tpu.core_type = #tpu.core_type<tc>, window_params = [{transform_indices = @transform_0, window_bounds = array<i64: 1, 128, 256>}, {pipeline_mode = #tpu.pipeline_mode<synchronous>, transform_indices = @transform_1, window_bounds = array<i64: 256, 512>}, {pipeline_mode = #tpu.pipeline_mode<synchronous>, transform_indices = @transform_2, window_bounds = array<i64: 1, 512>}, {pipeline_mode = #tpu.pipeline_mode<synchronous>, transform_indices = @transform_3, window_bounds = array<i64: 512, 512>}, {pipeline_mode = #tpu.pipeline_mode<synchronous>, transform_indices = @transform_4, window_bounds = array<i64: 1, 512>}, {pipeline_mode = #tpu.pipeline_mode<synchronous>, transform_indices = @transform_5, window_bounds = array<i64: 1, 256>}, {pipeline_mode = #tpu.pipeline_mode<synchronous>, transform_indices = @transform_6, window_bounds = array<i64: 1, 1>}, {pipeline_mode = #tpu.pipeline_mode<synchronous>, transform_indices = @transform_7, window_bounds = array<i64: 512, 2>}, {pipeline_mode = #tpu.pipeline_mode<synchronous>, transform_indices = @transform_8, window_bounds = array<i64: 1, 2>}, {transform_indices = @transform_9, window_bounds = array<i64: 1, 1, 2>}, {transform_indices = @transform_10, window_bounds = array<i64: 1, 1, 128>}, {transform_indices = @transform_11, window_bounds = array<i64: 1, 128, 512>}]} {
    %c0_i32 = arith.constant 0 : i32
    %0 = arith.cmpi eq, %arg1, %c0_i32 : i32
    %1 = arith.extui %0 : i1 to i32
    %c0_i32_0 = arith.constant 0 : i32
    %2 = arith.cmpi ne, %1, %c0_i32_0 : i32
    scf.if %2 {
      %cst_41 = arith.constant 0xFF800000 : f32
      %68 = vector.broadcast %cst_41 : f32 to vector<1x1xf32>
      %c0_42 = arith.constant 0 : index
      %c0_43 = arith.constant 0 : index
      %69 = vector.load %arg14[%c0_42, %c0_43] : memref<1x1xf32, #tpu.memory_space<vmem>>, vector<1x1xf32>
      tpu.vector_store %arg14[%c0_42, %c0_43], %68 {strides = array<i32>} : memref<1x1xf32, #tpu.memory_space<vmem>>, vector<1x1xf32>,
      %cst_44 = arith.constant 0.000000e+00 : f32
      %70 = vector.broadcast %cst_44 : f32 to vector<1x1xf32>
      %c0_45 = arith.constant 0 : index
      %c0_46 = arith.constant 0 : index
      %71 = vector.load %arg15[%c0_45, %c0_46] : memref<1x1xf32, #tpu.memory_space<vmem>>, vector<1x1xf32>
      tpu.vector_store %arg15[%c0_45, %c0_46], %70 {strides = array<i32>} : memref<1x1xf32, #tpu.memory_space<vmem>>, vector<1x1xf32>,
      %cst_47 = arith.constant 0.000000e+00 : f32
      %72 = vector.broadcast %cst_47 : f32 to vector<1x512xf32>
      %c0_48 = arith.constant 0 : index
      %c0_49 = arith.constant 0 : index
      %73 = vector.load %arg16[%c0_48, %c0_49] : memref<1x512xf32, #tpu.memory_space<vmem>>, vector<1x512xf32>
      tpu.vector_store %arg16[%c0_48, %c0_49], %72 {strides = array<i32>} : memref<1x512xf32, #tpu.memory_space<vmem>>, vector<1x512xf32>,
    } else {
    }
    %c0 = arith.constant 0 : index
    %c0_1 = arith.constant 0 : index
    %c0_2 = arith.constant 0 : index
    %3 = vector.load %arg2[%c0, %c0_1, %c0_2] : memref<1x128x256xbf16, #tpu.memory_space<vmem>>, vector<1x128x256xbf16>
    %4 = vector.shape_cast %3 : vector<1x128x256xbf16> to vector<128x256xbf16>
    %c0_3 = arith.constant 0 : index
    %c0_4 = arith.constant 0 : index
    %5 = vector.load %arg3[%c0_3, %c0_4] : memref<256x512xbf16, #tpu.memory_space<vmem>>, vector<256x512xbf16>
    %cst = arith.constant dense<0.000000e+00> : vector<128x512xf32>
    %6 = tpu.matmul %4, %5, %cst {dimension_numbers = #tpu.dot_dimension_numbers<[1], [0], [0], [1], [0, 0, 1, 1], [], []>} : vector<128x256xbf16>, vector<256x512xbf16>, vector<128x512xf32> -> vector<128x512xf32>
    %c0_5 = arith.constant 0 : index
    %c0_6 = arith.constant 0 : index
    %7 = vector.load %arg4[%c0_5, %c0_6] : memref<1x512xf32, #tpu.memory_space<vmem>>, vector<1x512xf32>
    %8 = vector.broadcast %7 : vector<1x512xf32> to vector<128x512xf32>
    %9 = arith.addf %6, %8 : vector<128x512xf32>
    %cst_7 = arith.constant 0.000000e+00 : f32
    %10 = vector.broadcast %cst_7 : f32 to vector<128x512xf32>
    %11 = arith.maximumf %9, %10 : vector<128x512xf32>
    %12 = arith.truncf %11 : vector<128x512xf32> to vector<128x512xbf16>
    %c0_8 = arith.constant 0 : index
    %c0_9 = arith.constant 0 : index
    %c0_10 = arith.constant 0 : index
    %13 = vector.load %arg13[%c0_8, %c0_9, %c0_10] : memref<1x128x512xbf16, #tpu.memory_space<vmem>>, vector<1x128x512xbf16>
    %14 = vector.shape_cast %13 : vector<1x128x512xbf16> to vector<128x512xbf16>
    %15 = vector.shape_cast %12 : vector<128x512xbf16> to vector<1x128x512xbf16>
    tpu.vector_store %arg13[%c0_8, %c0_9, %c0_10], %15 {strides = array<i32>} : memref<1x128x512xbf16, #tpu.memory_space<vmem>>, vector<1x128x512xbf16>,
    %c0_11 = arith.constant 0 : index
    %c0_12 = arith.constant 0 : index
    %16 = vector.load %arg5[%c0_11, %c0_12] : memref<512x512xbf16, #tpu.memory_space<vmem>>, vector<512x512xbf16>
    %cst_13 = arith.constant dense<0.000000e+00> : vector<128x512xf32>
    %17 = tpu.matmul %12, %16, %cst_13 {dimension_numbers = #tpu.dot_dimension_numbers<[1], [0], [0], [1], [0, 0, 1, 1], [], []>} : vector<128x512xbf16>, vector<512x512xbf16>, vector<128x512xf32> -> vector<128x512xf32>
    %c0_14 = arith.constant 0 : index
    %c0_15 = arith.constant 0 : index
    %18 = vector.load %arg6[%c0_14, %c0_15] : memref<1x512xf32, #tpu.memory_space<vmem>>, vector<1x512xf32>
    %19 = vector.broadcast %18 : vector<1x512xf32> to vector<128x512xf32>
    %20 = arith.addf %17, %19 : vector<128x512xf32>
    %21 = vector.extract_strided_slice %20 {offsets = [0, 0], sizes = [128, 256], strides = [1, 1]} : vector<128x512xf32> to vector<128x256xf32>
    %22 = math.tanh %21 : vector<128x256xf32>
    %23 = vector.extract_strided_slice %20 {offsets = [0, 256], sizes = [128, 256], strides = [1, 1]} : vector<128x512xf32> to vector<128x256xf32>
    %24 = arith.negf %23 : vector<128x256xf32>
    %25 = math.exp %24 : vector<128x256xf32>
    %cst_16 = arith.constant 1.000000e+00 : f32
    %26 = vector.broadcast %cst_16 : f32 to vector<128x256xf32>
    %27 = arith.addf %26, %25 : vector<128x256xf32>
    %28 = arith.divf %26, %27 : vector<128x256xf32>
    %29 = arith.mulf %22, %28 : vector<128x256xf32>
    %c0_17 = arith.constant 0 : index
    %c0_18 = arith.constant 0 : index
    %30 = vector.load %arg7[%c0_17, %c0_18] : memref<1x256xf32, #tpu.memory_space<vmem>>, vector<1x256xf32>
    %31 = vector.broadcast %30 : vector<1x256xf32> to vector<128x256xf32>
    %32 = arith.mulf %29, %31 : vector<128x256xf32>
    %cst_19 = arith.constant dense<0.000000e+00> : vector<128xf32>
    %33 = vector.multi_reduction <add>, %32, %cst_19 [1] : vector<128x256xf32> to vector<128xf32>
    %34 = vector.shape_cast %33 : vector<128xf32> to vector<128x1xf32>
    %c0_20 = arith.constant 0 : index
    %c0_21 = arith.constant 0 : index
    %35 = vector.load %arg8[%c0_20, %c0_21] : memref<1x1xf32, #tpu.memory_space<vmem>>, vector<1x1xf32>
    %36 = vector.broadcast %35 : vector<1x1xf32> to vector<128x1xf32>
    %37 = arith.addf %34, %36 : vector<128x1xf32>
    %38 = tpu.transpose %37, [1, 0] : vector<128x1xf32> -> vector<1x128xf32>
    %c0_22 = arith.constant 0 : index
    %c0_23 = arith.constant 0 : index
    %c0_24 = arith.constant 0 : index
    %39 = vector.load %arg12[%c0_22, %c0_23, %c0_24] : memref<1x1x128xf32, #tpu.memory_space<vmem>>, vector<1x1x128xf32>
    %40 = vector.shape_cast %39 : vector<1x1x128xf32> to vector<1x128xf32>
    %41 = vector.shape_cast %38 : vector<1x128xf32> to vector<1x1x128xf32>
    tpu.vector_store %arg12[%c0_22, %c0_23, %c0_24], %41 {strides = array<i32>} : memref<1x1x128xf32, #tpu.memory_space<vmem>>, vector<1x1x128xf32>,
    %c0_25 = arith.constant 0 : index
    %c0_26 = arith.constant 0 : index
    %42 = vector.load %arg14[%c0_25, %c0_26] : memref<1x1xf32, #tpu.memory_space<vmem>>, vector<1x1xf32>
    %cst_27 = arith.constant dense<0xFF800000> : vector<1xf32>
    %43 = vector.multi_reduction <maximumf>, %38, %cst_27 [1] : vector<1x128xf32> to vector<1xf32>
    %44 = vector.shape_cast %43 : vector<1xf32> to vector<1x1xf32>
    %45 = arith.maximumf %42, %44 : vector<1x1xf32>
    %46 = arith.subf %42, %45 : vector<1x1xf32>
    %47 = math.exp %46 : vector<1x1xf32>
    %48 = vector.broadcast %45 : vector<1x1xf32> to vector<1x128xf32>
    %49 = arith.subf %38, %48 : vector<1x128xf32>
    %50 = math.exp %49 : vector<1x128xf32>
    %c0_28 = arith.constant 0 : index
    %c0_29 = arith.constant 0 : index
    %51 = vector.load %arg15[%c0_28, %c0_29] : memref<1x1xf32, #tpu.memory_space<vmem>>, vector<1x1xf32>
    %52 = arith.mulf %47, %51 : vector<1x1xf32>
    %cst_30 = arith.constant dense<0.000000e+00> : vector<1xf32>
    %53 = vector.multi_reduction <add>, %50, %cst_30 [1] : vector<1x128xf32> to vector<1xf32>
    %54 = vector.shape_cast %53 : vector<1xf32> to vector<1x1xf32>
    %55 = arith.addf %52, %54 : vector<1x1xf32>
    %c0_31 = arith.constant 0 : index
    %c0_32 = arith.constant 0 : index
    %56 = vector.load %arg15[%c0_31, %c0_32] : memref<1x1xf32, #tpu.memory_space<vmem>>, vector<1x1xf32>
    tpu.vector_store %arg15[%c0_31, %c0_32], %55 {strides = array<i32>} : memref<1x1xf32, #tpu.memory_space<vmem>>, vector<1x1xf32>,
    %c0_33 = arith.constant 0 : index
    %c0_34 = arith.constant 0 : index
    %57 = vector.load %arg16[%c0_33, %c0_34] : memref<1x512xf32, #tpu.memory_space<vmem>>, vector<1x512xf32>
    %58 = vector.broadcast %47 : vector<1x1xf32> to vector<1x512xf32>
    %59 = arith.mulf %58, %57 : vector<1x512xf32>
    %60 = arith.truncf %50 : vector<1x128xf32> to vector<1x128xbf16>
    %cst_35 = arith.constant dense<0.000000e+00> : vector<1x512xf32>
    %61 = tpu.matmul %60, %12, %cst_35 {dimension_numbers = #tpu.dot_dimension_numbers<[1], [0], [0], [1], [0, 0, 1, 1], [], []>} : vector<1x128xbf16>, vector<128x512xbf16>, vector<1x512xf32> -> vector<1x512xf32>
    %62 = arith.addf %59, %61 : vector<1x512xf32>
    %c0_36 = arith.constant 0 : index
    %c0_37 = arith.constant 0 : index
    %63 = vector.load %arg16[%c0_36, %c0_37] : memref<1x512xf32, #tpu.memory_space<vmem>>, vector<1x512xf32>
    tpu.vector_store %arg16[%c0_36, %c0_37], %62 {strides = array<i32>} : memref<1x512xf32, #tpu.memory_space<vmem>>, vector<1x512xf32>,
    %c0_38 = arith.constant 0 : index
    %c0_39 = arith.constant 0 : index
    %64 = vector.load %arg14[%c0_38, %c0_39] : memref<1x1xf32, #tpu.memory_space<vmem>>, vector<1x1xf32>
    tpu.vector_store %arg14[%c0_38, %c0_39], %45 {strides = array<i32>} : memref<1x1xf32, #tpu.memory_space<vmem>>, vector<1x1xf32>,
    %c1_i32 = arith.constant 1 : i32
    %65 = arith.cmpi eq, %arg1, %c1_i32 : i32
    %66 = arith.extui %65 : i1 to i32
    %c0_i32_40 = arith.constant 0 : i32
    %67 = arith.cmpi ne, %66, %c0_i32_40 : i32
    scf.if %67 {
      %c0_41 = arith.constant 0 : index
      %c0_42 = arith.constant 0 : index
      %68 = vector.load %arg16[%c0_41, %c0_42] : memref<1x512xf32, #tpu.memory_space<vmem>>, vector<1x512xf32>
      %c0_43 = arith.constant 0 : index
      %c0_44 = arith.constant 0 : index
      %69 = vector.load %arg15[%c0_43, %c0_44] : memref<1x1xf32, #tpu.memory_space<vmem>>, vector<1x1xf32>
      %70 = vector.broadcast %69 : vector<1x1xf32> to vector<1x512xf32>
      %71 = arith.divf %68, %70 : vector<1x512xf32>
      %c0_45 = arith.constant 0 : index
      %c0_46 = arith.constant 0 : index
      %72 = vector.load %arg9[%c0_45, %c0_46] : memref<512x2xf32, #tpu.memory_space<vmem>>, vector<512x2xf32>
      %cst_47 = arith.constant dense<0.000000e+00> : vector<1x2xf32>
      %73 = tpu.matmul %71, %72, %cst_47 {dimension_numbers = #tpu.dot_dimension_numbers<[1], [0], [0], [1], [0, 0, 1, 1], [], []>} : vector<1x512xf32>, vector<512x2xf32>, vector<1x2xf32> -> vector<1x2xf32>
      %c0_48 = arith.constant 0 : index
      %c0_49 = arith.constant 0 : index
      %74 = vector.load %arg10[%c0_48, %c0_49] : memref<1x2xf32, #tpu.memory_space<vmem>>, vector<1x2xf32>
      %75 = arith.addf %73, %74 : vector<1x2xf32>
      %c0_50 = arith.constant 0 : index
      %c0_51 = arith.constant 0 : index
      %c0_52 = arith.constant 0 : index
      %76 = vector.load %arg11[%c0_50, %c0_51, %c0_52] : memref<1x1x2xf32, #tpu.memory_space<vmem>>, vector<1x1x2xf32>
      %77 = vector.shape_cast %76 : vector<1x1x2xf32> to vector<1x2xf32>
      %78 = vector.shape_cast %75 : vector<1x2xf32> to vector<1x1x2xf32>
      tpu.vector_store %arg11[%c0_50, %c0_51, %c0_52], %78 {strides = array<i32>} : memref<1x1x2xf32, #tpu.memory_space<vmem>>, vector<1x1x2xf32>,
    } else {
    }
    return
  }
  func.func @transform_0(%arg0: i32, %arg1: i32) -> (i32, i32, i32) {
    %c0_i32 = arith.constant 0 : i32
    %c0_i32_0 = arith.constant 0 : i32
    return %arg0, %arg1, %c0_i32 : i32, i32, i32
  }
  func.func @transform_1(%arg0: i32, %arg1: i32) -> (i32, i32) {
    %c0_i32 = arith.constant 0 : i32
    %c0_i32_0 = arith.constant 0 : i32
    %c0_i32_1 = arith.constant 0 : i32
    return %c0_i32, %c0_i32_0 : i32, i32
  }
  func.func @transform_2(%arg0: i32, %arg1: i32) -> (i32, i32) {
    %c0_i32 = arith.constant 0 : i32
    %c0_i32_0 = arith.constant 0 : i32
    %c0_i32_1 = arith.constant 0 : i32
    return %c0_i32, %c0_i32_0 : i32, i32
  }
  func.func @transform_3(%arg0: i32, %arg1: i32) -> (i32, i32) {
    %c0_i32 = arith.constant 0 : i32
    %c0_i32_0 = arith.constant 0 : i32
    %c0_i32_1 = arith.constant 0 : i32
    return %c0_i32, %c0_i32_0 : i32, i32
  }
  func.func @transform_4(%arg0: i32, %arg1: i32) -> (i32, i32) {
    %c0_i32 = arith.constant 0 : i32
    %c0_i32_0 = arith.constant 0 : i32
    %c0_i32_1 = arith.constant 0 : i32
    return %c0_i32, %c0_i32_0 : i32, i32
  }
  func.func @transform_5(%arg0: i32, %arg1: i32) -> (i32, i32) {
    %c0_i32 = arith.constant 0 : i32
    %c0_i32_0 = arith.constant 0 : i32
    %c0_i32_1 = arith.constant 0 : i32
    return %c0_i32, %c0_i32_0 : i32, i32
  }
  func.func @transform_6(%arg0: i32, %arg1: i32) -> (i32, i32) {
    %c0_i32 = arith.constant 0 : i32
    %c0_i32_0 = arith.constant 0 : i32
    %c0_i32_1 = arith.constant 0 : i32
    return %c0_i32, %c0_i32_0 : i32, i32
  }
  func.func @transform_7(%arg0: i32, %arg1: i32) -> (i32, i32) {
    %c0_i32 = arith.constant 0 : i32
    %c0_i32_0 = arith.constant 0 : i32
    %c0_i32_1 = arith.constant 0 : i32
    return %c0_i32, %c0_i32_0 : i32, i32
  }
  func.func @transform_8(%arg0: i32, %arg1: i32) -> (i32, i32) {
    %c0_i32 = arith.constant 0 : i32
    %c0_i32_0 = arith.constant 0 : i32
    %c0_i32_1 = arith.constant 0 : i32
    return %c0_i32, %c0_i32_0 : i32, i32
  }
  func.func @transform_9(%arg0: i32, %arg1: i32) -> (i32, i32, i32) {
    %c0_i32 = arith.constant 0 : i32
    %c0_i32_0 = arith.constant 0 : i32
    %c0_i32_1 = arith.constant 0 : i32
    return %arg0, %c0_i32, %c0_i32_0 : i32, i32, i32
  }
  func.func @transform_10(%arg0: i32, %arg1: i32) -> (i32, i32, i32) {
    %c0_i32 = arith.constant 0 : i32
    %c0_i32_0 = arith.constant 0 : i32
    return %arg0, %c0_i32, %arg1 : i32, i32, i32
  }
  func.func @transform_11(%arg0: i32, %arg1: i32) -> (i32, i32, i32) {
    %c0_i32 = arith.constant 0 : i32
    %c0_i32_0 = arith.constant 0 : i32
    return %arg0, %arg1, %c0_i32 : i32, i32, i32
  }
}

</mosaic_0001>

<bundles_post_ra>
// kernel: tpu_custom_call.1
= control target key start
LH: loop header
LB: loop body
LE: loop exit
PB: predicated region body
PF: predicated region fallthrough
CT: control target
= control target key end

     0   :  { %s7820_s0 = inlined_call_operand.vmem [shape: bf16[2,256,256], index: 0, kind: input, shape index: {}]   ;;  %s7821_s1 = inlined_call_operand.hbm [shape: bf16[256,512], index: 1, kind: input, shape index: {}]   ;;  %s7822_s2 = inlined_call_operand.vmem [shape: f32[1,512], index: 2, kind: input, shape index: {}]   ;;  %s7823_s3 = inlined_call_operand.hbm [shape: bf16[512,512], index: 3, kind: input, shape index: {}]   ;;  %s7824_s4 = inlined_call_operand.vmem [shape: f32[1,512], index: 4, kind: input, shape index: {}]   ;;  %s7825_s5 = inlined_call_operand.vmem [shape: f32[1,256], index: 5, kind: input, shape index: {}]   ;;  %s7826_s6 = inlined_call_operand.<no memory space> [shape: f32[1,1], index: 6, kind: input, shape index: {}]   ;;  %s7827_s7 = inlined_call_operand.vmem [shape: f32[512,2], index: 7, kind: input, shape index: {}]   ;;  %s7828_s8 = inlined_call_operand.vmem [shape: f32[1,2], index: 8, kind: input, shape index: {}]   ;;  %s7829_s9 = inlined_call_operand.hbm [shape: f32[2,1,2], index: 9, kind: output, shape index: {0}]   ;;  %s7830_s10 = inlined_call_operand.hbm [shape: f32[2,1,256], index: 10, kind: output, shape index: {1}]   ;;  %s7831_s11 = inlined_call_operand.hbm [shape: bf16[2,256,512], index: 11, kind: output, shape index: {2}]  }
   0x1   :  { %7845 = sst [smem:[#allocation46_spill]] %s7820_s0  ;;  %v17_v0 = vstv %s7826_s6 }
   0x2   :  { %7846 = sst [smem:[#allocation47_spill]] %s7821_s1  ;;  %18 = vst [vmem:[#allocation5] sm:$0x1] %v17_v0 }
   0x3   :  { %7847 = sst [smem:[#allocation48_spill]] %s7822_s2 }
   0x4   :  { %7848 = sst [smem:[#allocation49_spill]] %s7823_s3 }
   0x5   :  { %7849 = sst [smem:[#allocation50_spill]] %s7824_s4 }
   0x6   :  { %7850 = sst [smem:[#allocation51_spill]] %s7829_s9 }
   0x7   :  { %7851 = sst [smem:[#allocation52_spill]] %s7831_s11 }
   0x8   :  { %19 = vsyncpa [#allocation7], 0 }
   0x9   :  { %20 = vsyncpa [#allocation10], 0 }
   0xa   :  { %21 = vsyncpa [#allocation8], 0 }
   0xb   :  { %23 = vsyncpa [#allocation8 + $0x1], 0 }
   0xc   :  { %24 = vsyncpa [#allocation13], 0 }
   0xd   :  { %26 = vsyncpa [#allocation13 + $0x1], 0  ;;  %s6290_s19 = smov 0   ;;  %s6292_s20 = smov 0  }
   0xe   :  { %s6294_s21 = smov 0   ;;  %s6296_s22 = smov 0  }
   0xf   :  { %s6298_s23 = smov 0   ;;  %s6300_s24 = smov 0  }
  0x10   :  { %s6302_s6 = smov 0   ;;  %s6304_s25 = smov 0  }
  0x11   :  { %s6306_s26 = smov 0   ;;  %s6308_s27 = smov 0  }
  0x12   :  { %s6310_s28 = smov 0  }
  0x13 LB: > { %7852 = sst [smem:[#allocation19_spill]] %s6183_s21  ;;  %s6346_s29 = sadd.s32 4294967295, %s6215_s28   ;;  %s6215_s28 = sphi %s6310_s28, %s32_s28   ;;  %s6211_s27 = sphi %s6308_s27, %s7922_s27   ;;  %s6207_s26 = sphi %s6306_s26, %s7921_s26   ;;  %s6203_s25 = sphi %s6304_s25, %s7920_s25   ;;  %s6199_s6 = sphi %s6302_s6, %s7919_s6   ;;  %s6195_s24 = sphi %s6300_s24, %s7918_s24   ;;  %s6191_s23 = sphi %s6298_s23, %s7926_s23   ;;  %s6187_s22 = sphi %s6296_s22, %s7925_s22   ;;  %s6183_s21 = sphi %s6294_s21, %s7916_s21   ;;  %s6179_s20 = sphi %s6292_s20, %s7924_s20   ;;  %s6175_s19 = sphi %s6290_s19, %s7923_s19  }
  0x14   : > { %7853 = sst [smem:[#allocation20_spill]] %s6187_s22  ;;  %s7834_s30 = sadd.s32 4294967294, %s6215_s28  }
  0x15   : > { %7854 = sst [smem:[#allocation21_spill]] %s6195_s24  ;;  %s41_s12 = sadd.s32 1, %s6207_s26 }
  0x16   : > { %7855 = sst [smem:[#allocation22_spill]] %s6207_s26  ;;  %s44_s13 = sadd.s32 1, %s6211_s27 }
  0x17   : > { %7856 = sst [smem:[#allocation23_spill]] %s6211_s27  ;;  %p42_p0 = scmp.ge.s32.totalorder %s41_s12, 2 }
  0x18   : > { %s247_s14 = sadd.s32 1, %s6195_s24  ;;  %p257_p1 = scmp.ne.s32.totalorder %s6195_s24, %s6191_s23 }
  0x19   : > { %p258_p2 = scmp.eq.s32.totalorder %s6346_s29, 3  ;;  %s7928_s12 = smov (%p42_p0, %s41_s12), 0 }
  0x1a   : > { %7857 = sst [smem:[#allocation24_spill]] %s7928_s12  ;;  %s7930_s13 = smov (!%p42_p0, %s44_s13), %s6211_s27 }
  0x1b   : > { %p6360_p3 = por %p258_p2, %p257_p1  ;;  %p263_p4 = scmp.ne.s32.totalorder %s6191_s23, %s6187_s22 }
  0x1c   : > { %p46_p5 = scmp.ge.s32.totalorder %s7930_s13, 2  ;;  %p6368_p6 = scmp.eq.s32.totalorder %s7834_s30, 3 }
  0x1d   : > { %s7858_s15 = scalar_select %p6360_p3, 1, 0 }
  0x1e   : > { %s271_s17 = ssub.s32 %s6207_s26, %s7928_s12  ;;  %s275_s18 = sadd.s32 1, %s6183_s21 }
  0x1f   : > { %7859 = sst [smem:[#allocation25_spill]] %s7858_s15  ;;  %s7932_s13 = smov (%p46_p5, %s7930_s13), 0 }
  0x20   : > { %7861 = sst [smem:[#allocation26_spill]] %s7932_s13  ;;  %p6379_p7 = por %p6368_p6, %p263_p4 }
  0x21   : > { %p285_p8 = scmp.ne.s32.totalorder %s6183_s21, %s6179_s20  ;;  %s244_s22 = ssub.s32 %s6211_s27, %s7932_s13 }
  0x22   : > { %p291_p9 = scmp.ne.s32.totalorder %s6179_s20, %s6175_s19  ;;  %p245_p10 = scmp.eq.s32.totalorder %s244_s22, 0 }
  0x23   : > { %s272_s30 = sor.u32 %s271_s17, %s244_s22  ;;  %p6391_p12 = por %p285_p8, %p258_p2 }
  0x24   : > { %p273_p11 = scmp.eq.s32.totalorder %s272_s30, 0  ;;  %p6403_p13 = por %p291_p9, %p6368_p6 }
  0x25   : > { %s6396_s26 = scalar_select %p245_p10, %s6195_s24, %s247_s14  }
  0x26   : > { %s6399_s9 = scalar_select %p273_p11, %s6183_s21, %s275_s18  }
  0x27   : > { %7864 = sst [smem:[#allocation27_spill]] %s6396_s26  ;;  %p4537_p0 = scmp.ge.s32.totalorder %s6215_s28, 1 }
  0x28   : > { %7865 = sst [smem:[#allocation28_spill]] %s6399_s9  ;;  %p327_p1 = scmp.lt.s32.totalorder %s6215_s28, 5 }
  0x29   : > { %p5663_p4 = scmp.eq.s32.totalorder %s6346_s29, 0  ;;  %s7867_s1 = sld [smem:[#allocation47_spill]] }
  0x2a   : > { %p6413_p2 = pnand %p4537_p0, %p327_p1  ;;  %s6217_s14 = smov [#allocation6]  }
  0x2b   : > { %s340_s16 = sshll.u32 %s6217_s14, 4  ;;  %s7869_s3 = sld [smem:[#allocation49_spill]]  ;;  %s341_s16 = int_to_ptr.vmem [resolvable:$true] %s340_s16 }
  0x2c   : > { %p5646_p5 = pneg %p6413_p2  ;;  %s6218_s19 = smov [#allocation9]  }
  0x2d   : > { %s357_s22 = sshll.u32 %s6218_s19, 4  ;;  %s6220_s26 = smov 16   ;;  %s358_s22 = int_to_ptr.vmem [resolvable:$true] %s357_s22 }
  0x2e   : > { %p5647_p6 = pnand %p5663_p4, %p5646_p5  ;;  %402 = sbr.rel (%p6413_p2) target bundleno = 1995 (0x7cb), region = 56 }
  0x2f   : > { %s338_s30 = sshll.u32 %s7867_s1, 4  ;;  %s6219_s1 = smov 256   ;;  %s339_s30 = int_to_ptr.hbm [resolvable:$true] %s338_s30 }
  0x30   : > { %5649 = dma.hbm_to_vmem [thread:$0]  (!%p5647_p6), %s339_s30, 8192, %s341_s16, [#allocation7], %s6219_s1, %s6219_s1, %s6220_s26  }
  0x31   : > { %s355_s27 = sshll.u32 %s7869_s3, 4  ;;  %s356_s27 = int_to_ptr.hbm [resolvable:$true] %s355_s27 }
  0x32   : > { %5652 = dma.hbm_to_vmem [thread:$0]  (!%p5647_p6), %s356_s27, 16384, %s358_s22, [#allocation10], %s6219_s1, %s6219_s1, %s6220_s26  }
  0x33   : > { %6158 = dma.done.wait (%p5663_p4), [#allocation7], 8192  }
  0x34   : > { %6160 = vsyncadd (%p5663_p4), [#allocation7], 4294959104 }
  0x35   : > { %6162 = dma.done.wait (%p5663_p4), [#allocation10], 16384  }
  0x36   : > { %6164 = vsyncadd (%p5663_p4), [#allocation10], 4294950912  ;;  %s7844_s1 = sand.u32 1, %s6191_s23   ;;  %s452_s26 = sand.u32 1, %s6179_s20  }
  0x37   : > { %s4544_s27 = sshll.u32 %s452_s26, 8  ;;  %s4545_s13 = sshll.u32 %s6199_s6, 4 }
  0x38   : > { %p462_p8 = scmp.lt.s32.totalorder %s6203_s25, 1  ;;  %p464_p9 = scmp.lt.s32.totalorder %s4545_s13, 31 }
  0x39   : > { %s7870_s0 = sld [smem:[#allocation46_spill]]  ;;  %s6446_s24 = scalar_lea.vmem [#allocation11], %s7844_s1 }
  0x3a   : > { %s463_s30 = scalar_select %p462_p8, %s6203_s25, 1 }
  0x3b   : > { %s7934_s13 = smov (!%p464_p9, %s4545_s13), 31  ;;  %s6448_s9 = scalar_lea.vmem [#allocation12], %s452_s26 }
  0x3c   : > { %s4547_s17 = sshll.u32 %s463_s30, 6  ;;  %s4546_s14 = sshll.u32 %s7934_s13, 1 }
  0x3d   : > { %s468_s16 = sadd.s32 %s4547_s17, %s4546_s14  ;;  %s6450_s21 = scalar_lea.vmem [#allocation14], %s4544_s27 }
  0x3e   : > { %s4548_s18 = sshll.u32 %s468_s16, 2  ;;  %p4549_p10 = scmp.ne.s32.totalorder %s6199_s6, 0 }
  0x3f   : > { %s6442_s3 = scalar_lea.vmem %s7870_s0, %s4548_s18 }
  0x40   : > { %476 = sbr.rel (%p4549_p10) target bundleno = 73 (0x49), region = 68 }
  0x45   : > { %vm477_vm0 = vcmask 0   ;;  %v480_v1 = vlaneseq  ;;  %v6221_v2 = vmov -inf   ;;  %v6222_v3 = vmov 0.0  }
  0x46   : > { %478 = vst.msk [vmem:[#allocation2] sm:$0x1] %vm477_vm0, %v6221_v2 }
  0x47   : > { %479 = vst.msk [vmem:[#allocation3] sm:$0x1] %vm477_vm0, %v6222_v3  ;;  %vm482_vm1 = vcmp.lt.s32.totalorder %v480_v1, 512 }
  0x48   : > { %484 = vst.msk [vmem:[#allocation4] sm:$0xf] %vm482_vm1, %v6222_v3 }
  0x49 PF: > { %v4728_v4 = vld [vmem:[#allocation6 + $0xe0] sm:$0xf]  ;;  %v5469_v5 = vld [vmem:[#allocation6 + $0xec] sm:$0xf0]  ;;  %v5467_v9 = vld [vmem:[#allocation6 + $0xe4] sm:$0xf] }
  0x4a   : > { %v4856_v6 = vld [vmem:[#allocation6 + $0x1e0] sm:$0xf]  ;;  %v4729_v7 = vor.u32 %v5469_v5, %v4728_v4  ;;  %v5501_v8 = vld [vmem:[#allocation6 + $0x1ec] sm:$0xf0]  ;;  %v4730_v10 = vld [vmem:[#allocation6 + $0xf0] sm:$0xf0] }
  0x4b   : > { %v4857_v11 = vor.u32 %v5501_v8, %v4856_v6  ;;  %v4733_v12 = vor.u32 %v5467_v9, %v4730_v10  ;;  %v5499_v13 = vld [vmem:[#allocation6 + $0x1e4] sm:$0xf]  ;;  %v4858_v14 = vld [vmem:[#allocation6 + $0x1f0] sm:$0xf0]  ;;  %v4712_v15 = vld [vmem:[#allocation6 + $0xc0] sm:$0xf] }
  0x4c   : > { %975 = vmatpush.bf16.msra.mxu0 %v4729_v7  ;;  %v4861_v16 = vor.u32 %v5499_v13, %v4858_v14  ;;  %v5465_v17 = vld [vmem:[#allocation6 + $0xcc] sm:$0xf0]  ;;  %v4840_v18 = vld [vmem:[#allocation6 + $0x1c0] sm:$0xf]  ;;  %v5463_v22 = vld [vmem:[#allocation6 + $0xc4] sm:$0xf] }
  0x4d   : > { %v5497_v19 = vld [vmem:[#allocation6 + $0x1cc] sm:$0xf0]  ;;  %1024 = vmatpush.bf16.msra.mxu1 %v4857_v11  ;;  %1073 = vmatpush.bf16.msra.mxu2 %v4733_v12  ;;  %v4713_v20 = vor.u32 %v5465_v17, %v4712_v15  ;;  %v4714_v23 = vld [vmem:[#allocation6 + $0xd0] sm:$0xf0]  ;;  %v5495_v24 = vld [vmem:[#allocation6 + $0x1c4] sm:$0xf] }
  0x4e   : > { %v4841_v21 = vor.u32 %v5497_v19, %v4840_v18  ;;  %1122 = vmatpush.bf16.msra.mxu3 %v4861_v16  ;;  %v4717_v25 = vor.u32 %v5463_v22, %v4714_v23  ;;  %v4842_v26 = vld [vmem:[#allocation6 + $0x1d0] sm:$0xf0]  ;;  %v4696_v27 = vld [vmem:[#allocation6 + $0xa0] sm:$0xf]  ;;  %v5461_v28 = vld [vmem:[#allocation6 + $0xac] sm:$0xf0] }
  0x4f   : > { %v4845_v29 = vor.u32 %v5495_v24, %v4842_v26  ;;  %v4824_v30 = vld [vmem:[#allocation6 + $0x1a0] sm:$0xf]  ;;  %v5493_v31 = vld [vmem:[#allocation6 + $0x1ac] sm:$0xf0]  ;;  %v5459_v32 = vld [vmem:[#allocation6 + $0xa4] sm:$0xf]  ;;  %v4697_v33 = vor.u32 %v5461_v28, %v4696_v27 }
  0x50   : > { %976 = vmatpush.bf16.msra.mxu0 %v4713_v20  ;;  %v4698_v34 = vld [vmem:[#allocation6 + $0xb0] sm:$0xf0]  ;;  %v5491_v35 = vld [vmem:[#allocation6 + $0x1a4] sm:$0xf]  ;;  %v4825_v37 = vor.u32 %v5493_v31, %v4824_v30  ;;  %v4680_v39 = vld [vmem:[#allocation6 + $0x80] sm:$0xf] }
  0x51   : > { %v4826_v36 = vld [vmem:[#allocation6 + $0x1b0] sm:$0xf0]  ;;  %1025 = vmatpush.bf16.msra.mxu1 %v4841_v21  ;;  %1074 = vmatpush.bf16.msra.mxu2 %v4717_v25  ;;  %v4701_v38 = vor.u32 %v5459_v32, %v4698_v34  ;;  %v5457_v40 = vld [vmem:[#allocation6 + $0x8c] sm:$0xf0]  ;;  %v4808_v41 = vld [vmem:[#allocation6 + $0x180] sm:$0xf] }
  0x52   : > { %1123 = vmatpush.bf16.msra.mxu3 %v4845_v29  ;;  %v4829_v42 = vor.u32 %v5491_v35, %v4826_v36  ;;  %v5489_v43 = vld [vmem:[#allocation6 + $0x18c] sm:$0xf0]  ;;  %v5455_v44 = vld [vmem:[#allocation6 + $0x84] sm:$0xf]  ;;  %v4682_v45 = vld [vmem:[#allocation6 + $0x90] sm:$0xf0]  ;;  %v4681_v48 = vor.u32 %v5457_v40, %v4680_v39 }
  0x53   : > { %v5487_v46 = vld [vmem:[#allocation6 + $0x184] sm:$0xf]  ;;  %v4810_v47 = vld [vmem:[#allocation6 + $0x190] sm:$0xf0]  ;;  %v4809_v49 = vor.u32 %v5489_v43, %v4808_v41  ;;  %v4685_v50 = vor.u32 %v5455_v44, %v4682_v45  ;;  %v4664_v51 = vld [vmem:[#allocation6 + $0x60] sm:$0xf] }
  0x54   : > { %977 = vmatpush.bf16.msra.mxu0 %v4697_v33  ;;  %v5453_v52 = vld [vmem:[#allocation6 + $0x6c] sm:$0xf0]  ;;  %v4792_v53 = vld [vmem:[#allocation6 + $0x160] sm:$0xf]  ;;  %v4813_v54 = vor.u32 %v5487_v46, %v4810_v47  ;;  %v5451_v56 = vld [vmem:[#allocation6 + $0x64] sm:$0xf] }
  0x55   : > { %1026 = vmatpush.bf16.msra.mxu1 %v4825_v37  ;;  %1075 = vmatpush.bf16.msra.mxu2 %v4701_v38  ;;  %v5485_v55 = vld [vmem:[#allocation6 + $0x16c] sm:$0xf0]  ;;  %v4666_v57 = vld [vmem:[#allocation6 + $0x70] sm:$0xf0]  ;;  %v5483_v58 = vld [vmem:[#allocation6 + $0x164] sm:$0xf]  ;;  %v4665_v60 = vor.u32 %v5453_v52, %v4664_v51 }
  0x56   : > { %1124 = vmatpush.bf16.msra.mxu3 %v4829_v42  ;;  %v4794_v59 = vld [vmem:[#allocation6 + $0x170] sm:$0xf0]  ;;  %v4793_v61 = vor.u32 %v5485_v55, %v4792_v53  ;;  %v4669_v62 = vor.u32 %v5451_v56, %v4666_v57  ;;  %v4648_v63 = vld [vmem:[#allocation6 + $0x40] sm:$0xf]  ;;  %v5449_v0 = vld [vmem:[#allocation6 + $0x4c] sm:$0xf0] }
  0x57   : > { %v4776_v1 = vld [vmem:[#allocation6 + $0x140] sm:$0xf]  ;;  %v4797_v2 = vor.u32 %v5483_v58, %v4794_v59  ;;  %v5481_v3 = vld [vmem:[#allocation6 + $0x14c] sm:$0xf0]  ;;  %v5447_v4 = vld [vmem:[#allocation6 + $0x44] sm:$0xf]  ;;  %v4649_v8 = vor.u32 %v5449_v0, %v4648_v63 }
  0x58   : > { %978 = vmatpush.bf16.msra.mxu0 %v4681_v48  ;;  %v4650_v5 = vld [vmem:[#allocation6 + $0x50] sm:$0xf0]  ;;  %v5479_v6 = vld [vmem:[#allocation6 + $0x144] sm:$0xf]  ;;  %v4777_v9 = vor.u32 %v5481_v3, %v4776_v1  ;;  %v4632_v11 = vld [vmem:[#allocation6 + $0x20] sm:$0xf] }
  0x59   : > { %1027 = vmatpush.bf16.msra.mxu1 %v4809_v49  ;;  %1076 = vmatpush.bf16.msra.mxu2 %v4685_v50  ;;  %v4778_v7 = vld [vmem:[#allocation6 + $0x150] sm:$0xf0]  ;;  %v4653_v10 = vor.u32 %v5447_v4, %v4650_v5  ;;  %v5445_v12 = vld [vmem:[#allocation6 + $0x2c] sm:$0xf0]  ;;  %v4760_v13 = vld [vmem:[#allocation6 + $0x120] sm:$0xf] }
  0x5a   : > { %1125 = vmatpush.bf16.msra.mxu3 %v4813_v54  ;;  %v4781_v14 = vor.u32 %v5479_v6, %v4778_v7  ;;  %v5477_v15 = vld [vmem:[#allocation6 + $0x12c] sm:$0xf0]  ;;  %v5443_v16 = vld [vmem:[#allocation6 + $0x24] sm:$0xf]  ;;  %v4634_v17 = vld [vmem:[#allocation6 + $0x30] sm:$0xf0]  ;;  %v4633_v20 = vor.u32 %v5445_v12, %v4632_v11 }
  0x5b   : > { %v5475_v18 = vld [vmem:[#allocation6 + $0x124] sm:$0xf]  ;;  %v4762_v19 = vld [vmem:[#allocation6 + $0x130] sm:$0xf0]  ;;  %v4616_v21 = vld [vmem:[#allocation6] sm:$0xf]  ;;  %v4761_v23 = vor.u32 %v5477_v15, %v4760_v13  ;;  %v4637_v24 = vor.u32 %v5443_v16, %v4634_v17 }
  0x5c   : > { %979 = vmatpush.bf16.msra.mxu0 %v4665_v60  ;;  %v5441_v22 = vld [vmem:[#allocation6 + $0xc] sm:$0xf0]  ;;  %v4744_v25 = vld [vmem:[#allocation6 + $0x100] sm:$0xf]  ;;  %v5439_v27 = vld [vmem:[#allocation6 + $0x4] sm:$0xf]  ;;  %v4765_v28 = vor.u32 %v5475_v18, %v4762_v19 }
  0x5d   : > { %1028 = vmatpush.bf16.msra.mxu1 %v4793_v61  ;;  %1077 = vmatpush.bf16.msra.mxu2 %v4669_v62  ;;  %v5473_v26 = vld [vmem:[#allocation6 + $0x10c] sm:$0xf0]  ;;  %v4618_v29 = vld [vmem:[#allocation6 + $0x10] sm:$0xf0]  ;;  %v5471_v30 = vld [vmem:[#allocation6 + $0x104] sm:$0xf]  ;;  %v4617_v35 = vor.u32 %v5441_v22, %v4616_v21 }
  0x5e   : > { %1126 = vmatpush.bf16.msra.mxu3 %v4797_v2  ;;  %v4746_v31 = vld [vmem:[#allocation6 + $0x110] sm:$0xf0]  ;;  %v4552_v32 = vld [vmem:[%s6442_s3] sm:$0xf]  ;;  %v5468_v33 = vld [vmem:[#allocation6 + $0xec] sm:$0xf]  ;;  %v4745_v39 = vor.u32 %v5473_v26, %v4744_v25  ;;  %v4621_v40 = vor.u32 %v5439_v27, %v4618_v29 }
  0x5f   : > { %v4738_v34 = vld [vmem:[#allocation6 + $0xf8] sm:$0xf0]  ;;  %v5424_v36 = vld [vmem:[%s6442_s3 + $0x4] sm:$0xf0]  ;;  %v5500_v37 = vld [vmem:[#allocation6 + $0x1ec] sm:$0xf]  ;;  %v4749_v44 = vor.u32 %v5471_v30, %v4746_v31 }
  0x60   : > { %980 = vmatpush.bf16.msra.mxu0 %v4649_v8  ;;  %v4866_v38 = vld [vmem:[#allocation6 + $0x1f8] sm:$0xf0]  ;;  %v4554_v42 = vld [vmem:[%s6442_s3 + $0x8] sm:$0xf0]  ;;  %v4741_v45 = vor.u32 %v5468_v33, %v4738_v34  ;;  %v5470_v46 = vld [vmem:[#allocation6 + $0xf4] sm:$0xf0]  ;;  %v6457_v49 = vor.u32 %v5424_v36, %v4552_v32 }
  0x61   : > { %1029 = vmatpush.bf16.msra.mxu1 %v4777_v9  ;;  %1078 = vmatpush.bf16.msra.mxu2 %v4653_v10  ;;  %v5423_v41 = vld [vmem:[%s6442_s3 + $0x4] sm:$0xf]  ;;  %v4736_v43 = vld [vmem:[#allocation6 + $0xe8] sm:$0xf]  ;;  %v5502_v48 = vld [vmem:[#allocation6 + $0x1f4] sm:$0xf0]  ;;  %v4869_v50 = vor.u32 %v5500_v37, %v4866_v38 }
  0x62   : > { %1127 = vmatpush.bf16.msra.mxu3 %v4781_v14  ;;  %v4864_v47 = vld [vmem:[#allocation6 + $0x1e8] sm:$0xf]  ;;  %v5464_v51 = vld [vmem:[#allocation6 + $0xcc] sm:$0xf]  ;;  %v4722_v52 = vld [vmem:[#allocation6 + $0xd8] sm:$0xf0]  ;;  %v6459_v53 = vor.u32 %v5423_v41, %v4554_v42  ;;  %v4737_v56 = vor.u32 %v5470_v46, %v4736_v43 }
  0x63   : > { %v5496_v54 = vld [vmem:[#allocation6 + $0x1cc] sm:$0xf]  ;;  %v4850_v55 = vld [vmem:[#allocation6 + $0x1d8] sm:$0xf0]  ;;  %v4865_v57 = vor.u32 %v5502_v48, %v4864_v47  ;;  %v4725_v58 = vor.u32 %v5464_v51, %v4722_v52  ;;  %v4720_v59 = vld [vmem:[#allocation6 + $0xc8] sm:$0xf] }
  0x64   : > { %981 = vmatpush.bf16.msra.mxu0 %v4633_v20  ;;  %v5466_v60 = vld [vmem:[#allocation6 + $0xd4] sm:$0xf0]  ;;  %v4853_v61 = vor.u32 %v5496_v54, %v4850_v55  ;;  %v4848_v62 = vld [vmem:[#allocation6 + $0x1c8] sm:$0xf]  ;;  %v5460_v1 = vld [vmem:[#allocation6 + $0xac] sm:$0xf] }
  0x65   : > { %1030 = vmatpush.bf16.msra.mxu1 %v4761_v23  ;;  %1079 = vmatpush.bf16.msra.mxu2 %v4637_v24  ;;  %v5498_v63 = vld [vmem:[#allocation6 + $0x1d4] sm:$0xf0]  ;;  %v4721_v0 = vor.u32 %v5466_v60, %v4720_v59  ;;  %v4706_v2 = vld [vmem:[#allocation6 + $0xb8] sm:$0xf0]  ;;  %v5492_v3 = vld [vmem:[#allocation6 + $0x1ac] sm:$0xf] }
  0x66   : > { %1128 = vmatpush.bf16.msra.mxu3 %v4765_v28  ;;  %v4849_v4 = vor.u32 %v5498_v63, %v4848_v62  ;;  %v4709_v5 = vor.u32 %v5460_v1, %v4706_v2  ;;  %v4834_v6 = vld [vmem:[#allocation6 + $0x1b8] sm:$0xf0]  ;;  %v4704_v7 = vld [vmem:[#allocation6 + $0xa8] sm:$0xf]  ;;  %v5462_v8 = vld [vmem:[#allocation6 + $0xb4] sm:$0xf0] }
  0x67   : > { %v4837_v9 = vor.u32 %v5492_v3, %v4834_v6  ;;  %v4832_v10 = vld [vmem:[#allocation6 + $0x1a8] sm:$0xf]  ;;  %v5494_v11 = vld [vmem:[#allocation6 + $0x1b4] sm:$0xf0]  ;;  %v4705_v12 = vor.u32 %v5462_v8, %v4704_v7  ;;  %v5426_v15 = vld [vmem:[%s6442_s3 + $0x14] sm:$0xf0] }
  0x68   : > { %982 = vmatpush.bf16.msra.mxu0 %v4617_v35  ;;  %v4833_v13 = vor.u32 %v5494_v11, %v4832_v10  ;;  %v4560_v14 = vld [vmem:[%s6442_s3 + $0x10] sm:$0xf]  ;;  %v5425_v16 = vld [vmem:[%s6442_s3 + $0x14] sm:$0xf]  ;;  %v4562_v17 = vld [vmem:[%s6442_s3 + $0x18] sm:$0xf0] }
  0x69   : > { %1031 = vmatpush.bf16.msra.mxu1 %v4745_v39  ;;  %1080 = vmatpush.bf16.msra.mxu2 %v4621_v40  ;;  %v6469_v18 = vor.u32 %v5426_v15, %v4560_v14  ;;  %v6471_v19 = vor.u32 %v5425_v16, %v4562_v17  ;;  %v5456_v20 = vld [vmem:[#allocation6 + $0x8c] sm:$0xf]  ;;  %v4690_v21 = vld [vmem:[#allocation6 + $0x98] sm:$0xf0]  ;;  %v4688_v25 = vld [vmem:[#allocation6 + $0x88] sm:$0xf] }
  0x6a   : > { %1129 = vmatpush.bf16.msra.mxu3 %v4749_v44  ;;  %v5488_v22 = vld [vmem:[#allocation6 + $0x18c] sm:$0xf]  ;;  %v4693_v23 = vor.u32 %v5456_v20, %v4690_v21  ;;  %v4818_v24 = vld [vmem:[#allocation6 + $0x198] sm:$0xf0]  ;;  %v5458_v26 = vld [vmem:[#allocation6 + $0x94] sm:$0xf0] }
  0x6b   : > { %983 = vmatmul.bf16.vlgmr.msra.gmra.mxu0 %v6457_v49  ;;  %v4821_v27 = vor.u32 %v5488_v22, %v4818_v24  ;;  %v4689_v28 = vor.u32 %v5458_v26, %v4688_v25  ;;  %v4816_v29 = vld [vmem:[#allocation6 + $0x188] sm:$0xf]  ;;  %v5490_v30 = vld [vmem:[#allocation6 + $0x194] sm:$0xf0]  ;;  %v5428_v33 = vld [vmem:[%s6442_s3 + $0x24] sm:$0xf0] }
  0x6c   : > { %1032 = vmatmul.bf16.vlgmr.msra.gmra.mxu1 %v6459_v53  ;;  %1081 = vmatmul.bf16.vlgmr.msra.gmra.mxu2 %v6457_v49  ;;  %v4817_v31 = vor.u32 %v5490_v30, %v4816_v29  ;;  %v4568_v32 = vld [vmem:[%s6442_s3 + $0x20] sm:$0xf]  ;;  %v5427_v34 = vld [vmem:[%s6442_s3 + $0x24] sm:$0xf]  ;;  %v4570_v35 = vld [vmem:[%s6442_s3 + $0x28] sm:$0xf0] }
  0x6d   : > { %1269 = vmatpush.bf16.msrb.mxu2 %v4741_v45  ;;  %1130 = vmatmul.bf16.vlgmr.msra.gmra.mxu3 %v6459_v53  ;;  %v6481_v36 = vor.u32 %v5428_v33, %v4568_v32  ;;  %v6483_v37 = vor.u32 %v5427_v34, %v4570_v35  ;;  %v5452_v38 = vld [vmem:[#allocation6 + $0x6c] sm:$0xf]  ;;  %v4674_v39 = vld [vmem:[#allocation6 + $0x78] sm:$0xf0]  ;;  %v4672_v43 = vld [vmem:[#allocation6 + $0x68] sm:$0xf] }
  0x6e   : > { %1318 = vmatpush.bf16.msrb.mxu3 %v4869_v50  ;;  %1171 = vmatpush.bf16.msrb.mxu0 %v4737_v56  ;;  %v5484_v40 = vld [vmem:[#allocation6 + $0x16c] sm:$0xf]  ;;  %v4677_v41 = vor.u32 %v5452_v38, %v4674_v39  ;;  %v4802_v42 = vld [vmem:[#allocation6 + $0x178] sm:$0xf0]  ;;  %v5454_v44 = vld [vmem:[#allocation6 + $0x74] sm:$0xf0] }
  0x6f   : > { %1220 = vmatpush.bf16.msrb.mxu1 %v4865_v57  ;;  %v4805_v45 = vor.u32 %v5484_v40, %v4802_v42  ;;  %v4673_v46 = vor.u32 %v5454_v44, %v4672_v43  ;;  %v4800_v47 = vld [vmem:[#allocation6 + $0x168] sm:$0xf]  ;;  %v5486_v48 = vld [vmem:[#allocation6 + $0x174] sm:$0xf0]  ;;  %v5430_v52 = vld [vmem:[%s6442_s3 + $0x34] sm:$0xf0] }
  0x70   : > { %v4801_v50 = vor.u32 %v5486_v48, %v4800_v47  ;;  %v4576_v51 = vld [vmem:[%s6442_s3 + $0x30] sm:$0xf]  ;;  %v5429_v54 = vld [vmem:[%s6442_s3 + $0x34] sm:$0xf]  ;;  %v4578_v55 = vld [vmem:[%s6442_s3 + $0x38] sm:$0xf0] }
  0x71   : > { %1270 = vmatpush.bf16.msrb.mxu2 %v4725_v58  ;;  %v6493_v56 = vor.u32 %v5430_v52, %v4576_v51  ;;  %v6495_v57 = vor.u32 %v5429_v54, %v4578_v55  ;;  %v5448_v58 = vld [vmem:[#allocation6 + $0x4c] sm:$0xf]  ;;  %v4658_v59 = vld [vmem:[#allocation6 + $0x58] sm:$0xf0]  ;;  %v4656_v63 = vld [vmem:[#allocation6 + $0x48] sm:$0xf] }
  0x72   : > { %1319 = vmatpush.bf16.msrb.mxu3 %v4853_v61  ;;  %1172 = vmatpush.bf16.msrb.mxu0 %v4721_v0  ;;  %v5480_v60 = vld [vmem:[#allocation6 + $0x14c] sm:$0xf]  ;;  %v4661_v61 = vor.u32 %v5448_v58, %v4658_v59  ;;  %v4786_v62 = vld [vmem:[#allocation6 + $0x158] sm:$0xf0]  ;;  %v5450_v0 = vld [vmem:[#allocation6 + $0x54] sm:$0xf0] }
  0x73   : > { %1221 = vmatpush.bf16.msrb.mxu1 %v4849_v4  ;;  %v4789_v1 = vor.u32 %v5480_v60, %v4786_v62  ;;  %v4657_v2 = vor.u32 %v5450_v0, %v4656_v63  ;;  %v4784_v3 = vld [vmem:[#allocation6 + $0x148] sm:$0xf]  ;;  %v5482_v4 = vld [vmem:[#allocation6 + $0x154] sm:$0xf0]  ;;  %v5432_v7 = vld [vmem:[%s6442_s3 + $0x44] sm:$0xf0] }
  0x74   : > { %v4584_v6 = vld [vmem:[%s6442_s3 + $0x40] sm:$0xf]  ;;  %v5431_v8 = vld [vmem:[%s6442_s3 + $0x44] sm:$0xf]  ;;  %v5476_v14 = vld [vmem:[#allocation6 + $0x12c] sm:$0xf] }
  0x75   : > { %1271 = vmatpush.bf16.msrb.mxu2 %v4709_v5  ;;  %v4785_v5 = vor.u32 %v5482_v4, %v4784_v3  ;;  %v6505_v10 = vor.u32 %v5432_v7, %v4584_v6  ;;  %v4770_v16 = vld [vmem:[#allocation6 + $0x138] sm:$0xf0]  ;;  %v4640_v17 = vld [vmem:[#allocation6 + $0x28] sm:$0xf]  ;;  %v5446_v20 = vld [vmem:[#allocation6 + $0x34] sm:$0xf0] }
  0x76   : > { %1320 = vmatpush.bf16.msrb.mxu3 %v4837_v9  ;;  %1173 = vmatpush.bf16.msrb.mxu0 %v4705_v12  ;;  %v4586_v9 = vld [vmem:[%s6442_s3 + $0x48] sm:$0xf0]  ;;  %v5444_v12 = vld [vmem:[#allocation6 + $0x2c] sm:$0xf]  ;;  %v4773_v21 = vor.u32 %v5476_v14, %v4770_v16  ;;  %v4641_v22 = vor.u32 %v5446_v20, %v4640_v17  ;;  %v5478_v24 = vld [vmem:[#allocation6 + $0x134] sm:$0xf0] }
  0x77   : > { %1222 = vmatpush.bf16.msrb.mxu1 %v4833_v13  ;;  %v6507_v11 = vor.u32 %v5431_v8, %v4586_v9  ;;  %v4642_v13 = vld [vmem:[#allocation6 + $0x38] sm:$0xf0]  ;;  %v4592_v26 = vld [vmem:[%s6442_s3 + $0x50] sm:$0xf]  ;;  %v4594_v29 = vld [vmem:[%s6442_s3 + $0x58] sm:$0xf0] }
  0x78   : > { %v4645_v15 = vor.u32 %v5444_v12, %v4642_v13  ;;  %v5440_v32 = vld [vmem:[#allocation6 + $0xc] sm:$0xf]  ;;  %v4626_v33 = vld [vmem:[#allocation6 + $0x18] sm:$0xf0]  ;;  %v4624_v39 = vld [vmem:[#allocation6 + $0x8] sm:$0xf] }
  0x79   : > { %1272 = vmatpush.bf16.msrb.mxu2 %v4693_v23  ;;  %v4768_v23 = vld [vmem:[#allocation6 + $0x128] sm:$0xf]  ;;  %v5472_v34 = vld [vmem:[#allocation6 + $0x10c] sm:$0xf]  ;;  %v4629_v35 = vor.u32 %v5440_v32, %v4626_v33  ;;  %v4754_v38 = vld [vmem:[#allocation6 + $0x118] sm:$0xf0] }
  0x7a   : > { %1321 = vmatpush.bf16.msrb.mxu3 %v4821_v27  ;;  %1174 = vmatpush.bf16.msrb.mxu0 %v4689_v28  ;;  %v4769_v25 = vor.u32 %v5478_v24, %v4768_v23  ;;  %v5434_v27 = vld [vmem:[%s6442_s3 + $0x54] sm:$0xf0]  ;;  %v5433_v28 = vld [vmem:[%s6442_s3 + $0x54] sm:$0xf]  ;;  %v5442_v40 = vld [vmem:[#allocation6 + $0x14] sm:$0xf0] }
  0x7b   : > { %988 = vmatmul.bf16.gmra.mxu0 %v6469_v18  ;;  %1223 = vmatpush.bf16.msrb.mxu1 %v4817_v31  ;;  %v6517_v30 = vor.u32 %v5434_v27, %v4592_v26  ;;  %v6519_v31 = vor.u32 %v5433_v28, %v4594_v29  ;;  %v4625_v42 = vor.u32 %v5442_v40, %v4624_v39  ;;  %v4752_v43 = vld [vmem:[#allocation6 + $0x108] sm:$0xf]  ;;  %v5474_v44 = vld [vmem:[#allocation6 + $0x114] sm:$0xf0]  ;;  %v5436_v47 = vld [vmem:[%s6442_s3 + $0x64] sm:$0xf0] }
  0x7c   : > { %1037 = vmatmul.bf16.gmra.mxu1 %v6471_v19  ;;  %1086 = vmatmul.bf16.gmra.mxu2 %v6469_v18  ;;  %v5435_v48 = vld [vmem:[%s6442_s3 + $0x64] sm:$0xf]  ;;  %v4608_v54 = vld [vmem:[%s6442_s3 + $0x70] sm:$0xf]  ;;  %v5438_v55 = vld [vmem:[%s6442_s3 + $0x74] sm:$0xf0] }
  0x7d   : > { %1135 = vmatmul.bf16.gmra.mxu3 %v6471_v19  ;;  %1273 = vmatpush.bf16.msrb.mxu2 %v4677_v41  ;;  %v4757_v41 = vor.u32 %v5472_v34, %v4754_v38  ;;  %v5437_v58 = vld [vmem:[%s6442_s3 + $0x74] sm:$0xf]  ;;  %v4610_v59 = vld [vmem:[%s6442_s3 + $0x78] sm:$0xf0]  ;;  %v6541_v60 = vor.u32 %v5438_v55, %v4608_v54  ;;  %s7871_s2 = sld [smem:[#allocation48_spill]]  ;;  %p5414_p11 = scmp.ne.s32.totalorder %s6199_s6, 1 }
  0x7e   : > { %1322 = vmatpush.bf16.msrb.mxu3 %v4805_v45  ;;  %1175 = vmatpush.bf16.msrb.mxu0 %v4673_v46  ;;  %v4753_v45 = vor.u32 %v5474_v44, %v4752_v43  ;;  %v4600_v46 = vld [vmem:[%s6442_s3 + $0x60] sm:$0xf]  ;;  %v4984_v3 = vld [vmem:[#allocation9 + $0xe0] sm:$0xf]  ;;  %v5533_v6 = vld [vmem:[#allocation9 + $0xec] sm:$0xf0] }
  0x7f   : > { %1224 = vmatpush.bf16.msrb.mxu1 %v4801_v50  ;;  %v4602_v50 = vld [vmem:[%s6442_s3 + $0x68] sm:$0xf0]  ;;  %v6529_v51 = vor.u32 %v5436_v47, %v4600_v46  ;;  %v5368_v7 = vld [vmem:[#allocation9 + $0x3e0] sm:$0xf]  ;;  %v5629_v8 = vld [vmem:[#allocation9 + $0x3ec] sm:$0xf0]  ;;  %v4985_v12 = vor.u32 %v5533_v6, %v4984_v3 }
  0x80   : > { %v6531_v52 = vor.u32 %v5435_v48, %v4602_v50  ;;  %v5369_v13 = vor.u32 %v5629_v8, %v5368_v7  ;;  %v5565_v26 = vld [vmem:[#allocation9 + $0x1ec] sm:$0xf0]  ;;  %v5224_v38 = vld [vmem:[#allocation9 + $0x2c0] sm:$0xf]  ;;  %s7872_s4 = sld [smem:[#allocation50_spill]] }
  0x81   : > { %1274 = vmatpush.bf16.msrb.mxu2 %v4661_v61  ;;  %v6543_v61 = vor.u32 %v5437_v58, %v4610_v59  ;;  %v5593_v39 = vld [vmem:[#allocation9 + $0x2cc] sm:$0xf0]  ;;  %v4968_v40 = vld [vmem:[#allocation9 + $0xc0] sm:$0xf] }
  0x82   : > { %1323 = vmatpush.bf16.msrb.mxu3 %v4789_v1  ;;  %1176 = vmatpush.bf16.msrb.mxu0 %v4657_v2  ;;  %v5240_v1 = vld [vmem:[#allocation9 + $0x2e0] sm:$0xf]  ;;  %v5597_v2 = vld [vmem:[#allocation9 + $0x2ec] sm:$0xf0] }
  0x83   : > { %1225 = vmatpush.bf16.msrb.mxu1 %v4785_v5  ;;  %v6552_v62 = vld [vmem:[%s7871_s2] sm:$0xf]  ;;  %v5241_v5 = vor.u32 %v5597_v2, %v5240_v1  ;;  %v5529_v43 = vld [vmem:[#allocation9 + $0xcc] sm:$0xf0]  ;;  %v5352_v44 = vld [vmem:[#allocation9 + $0x3c0] sm:$0xf] }
  0x84   : > { %v6555_v63 = vperm.slane %v6552_v62, 0  ;;  %v6562_v14 = vperm.slane %v6552_v62, 1  ;;  %v4969_v48 = vor.u32 %v5529_v43, %v4968_v40 }
  0x85   : > { %1275 = vmatpush.bf16.msrb.mxu2 %v4645_v15 }
  0x86   : > { %1324 = vmatpush.bf16.msrb.mxu3 %v4773_v21  ;;  %1177 = vmatpush.bf16.msrb.mxu0 %v4641_v22 }
  0x87   : > { %1226 = vmatpush.bf16.msrb.mxu1 %v4769_v25  ;;  %v5112_v25 = vld [vmem:[#allocation9 + $0x1e0] sm:$0xf] }
  0x89   : > { %1276 = vmatpush.bf16.msrb.mxu2 %v4629_v35 }
  0x8a   : > { %1325 = vmatpush.bf16.msrb.mxu3 %v4757_v41  ;;  %1178 = vmatpush.bf16.msrb.mxu0 %v4625_v42  ;;  %v5225_v42 = vor.u32 %v5593_v39, %v5224_v38  ;;  %v5621_v39 = vld [vmem:[#allocation9 + $0x3ac] sm:$0xf0] }
  0x8b   : > { %993 = vmatmul.bf16.gmra.mxu0 %v6481_v36  ;;  %1227 = vmatpush.bf16.msrb.mxu1 %v4753_v45  ;;  %v5625_v45 = vld [vmem:[#allocation9 + $0x3cc] sm:$0xf0] }
  0x8c   : > { %1042 = vmatmul.bf16.gmra.mxu1 %v6483_v37  ;;  %1091 = vmatmul.bf16.gmra.mxu2 %v6481_v36  ;;  %v5353_v50 = vor.u32 %v5625_v45, %v5352_v44 }
  0x8d   : > { %1140 = vmatmul.bf16.gmra.mxu3 %v6483_v37  ;;  %2531 = vmatpush.bf16.msra.mxu2 %v5241_v5 }
  0x8e   : > { %2433 = vmatpush.bf16.msra.mxu0 %v4985_v12  ;;  %2580 = vmatpush.bf16.msra.mxu3 %v5369_v13  ;;  %v5096_v13 = vld [vmem:[#allocation9 + $0x1c0] sm:$0xf] }
  0x91   : > { %2532 = vmatpush.bf16.msra.mxu2 %v5225_v42 }
  0x92   : > { %2434 = vmatpush.bf16.msra.mxu0 %v4969_v48  ;;  %2581 = vmatpush.bf16.msra.mxu3 %v5353_v50 }
  0x9b   : > { %998 = vmatmul.bf16.gmra.mxu0 %v6493_v56 }
  0x9c   : > { %1047 = vmatmul.bf16.gmra.mxu1 %v6495_v57  ;;  %1096 = vmatmul.bf16.gmra.mxu2 %v6493_v56 }
  0x9d   : > { %1145 = vmatmul.bf16.gmra.mxu3 %v6495_v57 }
  0xab   : > { %1003 = vmatmul.bf16.gmra.mxu0 %v6505_v10 }
  0xac   : > { %1052 = vmatmul.bf16.gmra.mxu1 %v6507_v11  ;;  %1101 = vmatmul.bf16.gmra.mxu2 %v6505_v10 }
  0xad   : > { %1150 = vmatmul.bf16.gmra.mxu3 %v6507_v11 }
  0xbb   : > { %1008 = vmatmul.bf16.gmra.mxu0 %v6517_v30 }
  0xbc   : > { %1057 = vmatmul.bf16.gmra.mxu1 %v6519_v31  ;;  %1106 = vmatmul.bf16.gmra.mxu2 %v6517_v30 }
  0xbd   : > { %1155 = vmatmul.bf16.gmra.mxu3 %v6519_v31 }
  0xcb   : > { %1013 = vmatmul.bf16.gmra.mxu0 %v6529_v51 }
  0xcc   : > { %1062 = vmatmul.bf16.gmra.mxu1 %v6531_v52  ;;  %1111 = vmatmul.bf16.gmra.mxu2 %v6529_v51 }
  0xcd   : > { %1160 = vmatmul.bf16.gmra.mxu3 %v6531_v52 }
  0xdb   : > { %1018 = vmatmul.bf16.gmra.mxu0 %v6541_v60 }
  0xdc   : > { %1067 = vmatmul.bf16.gmra.mxu1 %v6543_v61  ;;  %1116 = vmatmul.bf16.gmra.mxu2 %v6541_v60 }
  0xdd   : > { %1165 = vmatmul.bf16.gmra.mxu3 %v6543_v61 }
  0xe8   : > { %v984_v0 = vpop.f32.mrf.mxu0 }
  0xe9   : > { %v1033_v4 = vpop.f32.mrf.mxu1  ;;  %v985_v9 = vadd.f32 %v984_v0, %v6555_v63 }
  0xeb   : > { %1179 = vmatmul.bf16.vlgmr.msrb.gmra.mxu0 %v6457_v49  ;;  %v1034_v15 = vadd.f32 %v1033_v4, %v985_v9 }
  0xec   : > { %1228 = vmatmul.bf16.vlgmr.msrb.gmra.mxu1 %v6459_v53  ;;  %1277 = vmatmul.bf16.vlgmr.msrb.gmra.mxu2 %v6457_v49  ;;  %v5113_v49 = vor.u32 %v5565_v26, %v5112_v25 }
  0xed   : > { %1326 = vmatmul.bf16.vlgmr.msrb.gmra.mxu3 %v6459_v53  ;;  %v1367_v23 = vmax.f32 %v1034_v15, 0.0  ;;  %v5561_v15 = vld [vmem:[#allocation9 + $0x1cc] sm:$0xf0] }
  0xee   : > { %2482 = vmatpush.bf16.msra.mxu1 %v5113_v49  ;;  %v5208_v49 = vld [vmem:[#allocation9 + $0x2a0] sm:$0xf] }
  0xef   : > { %v1082_v16 = vpop.f32.mrf.mxu2 }
  0xf0   : > { %v1083_v17 = vadd.f32 %v1082_v16, %v6562_v14  ;;  %v1131_v20 = vpop.f32.mrf.mxu3  ;;  %v986_v21 = vpop.f32.mrf.mxu0  ;;  %v5097_v16 = vor.u32 %v5561_v15, %v5096_v13 }
  0xf1   : > { %v1035_v22 = vpop.f32.mrf.mxu1  ;;  %v987_v28 = vadd.f32 %v986_v21, %v6555_v63 }
  0xf2   : > { %v1132_v24 = vadd.f32 %v1131_v20, %v1083_v17  ;;  %2483 = vmatpush.bf16.msra.mxu1 %v5097_v16  ;;  %v5192_v16 = vld [vmem:[#allocation9 + $0x280] sm:$0xf] }
  0xf3   : > { %v1036_v32 = vadd.f32 %v1035_v22, %v987_v28 }
  0xf4   : > { %v1368_v27 = vmax.f32 %v1132_v24, 0.0 }
  0xf5   : > { %v1371_v54 = vmax.f32 %v1036_v32, 0.0  ;;  %v5525_v32 = vld [vmem:[#allocation9 + $0xac] sm:$0xf0] }
  0xf6   : > { %v1431_v53 = vpack.c.bf16 %v1368_v27, %v1367_v23  ;;  %v5589_v27 = vld [vmem:[#allocation9 + $0x2ac] sm:$0xf0] }
  0xf7   : > { %v1084_v29 = vpop.f32.mrf.mxu2 }
  0xf8   : > { %1463 = vst [vmem:[%s6450_s21] sm:$0xff] %v1431_v53  ;;  %v1085_v33 = vadd.f32 %v1084_v29, %v6562_v14  ;;  %v1133_v34 = vpop.f32.mrf.mxu3  ;;  %v989_v35 = vpop.f32.mrf.mxu0  ;;  %v1665_v0 = vunpack.c.l.b16 %v1431_v53  ;;  %v1666_v2 = vunpack.c.h.b16 %v1431_v53  ;;  %v5209_v53 = vor.u32 %v5589_v27, %v5208_v49  ;;  %v4952_v29 = vld [vmem:[#allocation9 + $0xa0] sm:$0xf]  ;;  %v5617_v27 = vld [vmem:[#allocation9 + $0x38c] sm:$0xf0] }
  0xf9   : > { %v1038_v41 = vpop.f32.mrf.mxu1  ;;  %v990_v47 = vadd.f32 %v989_v35, %v6555_v63  ;;  %v4953_v38 = vor.u32 %v5525_v32, %v4952_v29 }
  0xfa   : > { %v1134_v46 = vadd.f32 %v1133_v34, %v1085_v33  ;;  %v5336_v33 = vld [vmem:[#allocation9 + $0x3a0] sm:$0xf]  ;;  %2533 = vmatpush.bf16.msra.mxu2 %v5209_v53 }
  0xfb   : > { %1184 = vmatmul.bf16.gmra.mxu0 %v6469_v18  ;;  %v1039_v59 = vadd.f32 %v1038_v41, %v990_v47  ;;  %v5337_v40 = vor.u32 %v5621_v39, %v5336_v33 }
  0xfc   : > { %v1372_v55 = vmax.f32 %v1134_v46, 0.0  ;;  %1233 = vmatmul.bf16.gmra.mxu1 %v6471_v19  ;;  %1282 = vmatmul.bf16.gmra.mxu2 %v6469_v18 }
  0xfd   : > { %1331 = vmatmul.bf16.gmra.mxu3 %v6471_v19  ;;  %v1375_v19 = vmax.f32 %v1039_v59, 0.0  ;;  %2435 = vmatpush.bf16.msra.mxu0 %v4953_v38 }
  0xfe   : > { %v1433_v58 = vpack.c.bf16 %v1372_v55, %v1371_v54  ;;  %2582 = vmatpush.bf16.msra.mxu3 %v5337_v40 }
  0xff   : > { %v1087_v1 = vpop.f32.mrf.mxu2 }
 0x100   : > { %1465 = vst [vmem:[%s6450_s21 + $0x10] sm:$0xff] %v1433_v58  ;;  %v1669_v3 = vunpack.c.l.b16 %v1433_v58  ;;  %v1670_v4 = vunpack.c.h.b16 %v1433_v58  ;;  %v1088_v5 = vadd.f32 %v1087_v1, %v6562_v14  ;;  %v1136_v6 = vpop.f32.mrf.mxu3  ;;  %v991_v7 = vpop.f32.mrf.mxu0 }
 0x101   : > { %v1040_v8 = vpop.f32.mrf.mxu1  ;;  %v992_v20 = vadd.f32 %v991_v7, %v6555_v63 }
 0x102   : > { %v6576_v9 = vpack.c.b16 %v1669_v3, %v1665_v0  ;;  %v6578_v18 = vpack.c.b16 %v1670_v4, %v1666_v2  ;;  %v1137_v12 = vadd.f32 %v1136_v6, %v1088_v5  ;;  %v5080_v2 = vld [vmem:[#allocation9 + $0x1a0] sm:$0xf]  ;;  %v5557_v3 = vld [vmem:[#allocation9 + $0x1ac] sm:$0xf0] }
 0x103   : > { %v1041_v23 = vadd.f32 %v1040_v8, %v992_v20  ;;  %v5081_v4 = vor.u32 %v5557_v3, %v5080_v2 }
 0x104   : > { %v1376_v17 = vmax.f32 %v1137_v12, 0.0 }
 0x105   : > { %v1379_v41 = vmax.f32 %v1041_v23, 0.0  ;;  %2484 = vmatpush.bf16.msra.mxu1 %v5081_v4  ;;  %v5521_v23 = vld [vmem:[#allocation9 + $0x8c] sm:$0xf0]  ;;  %v5176_v4 = vld [vmem:[#allocation9 + $0x260] sm:$0xf] }
 0x106   : > { %v1435_v21 = vpack.c.bf16 %v1376_v17, %v1375_v19  ;;  %v5585_v17 = vld [vmem:[#allocation9 + $0x28c] sm:$0xf0] }
 0x107   : > { %v1089_v22 = vpop.f32.mrf.mxu2 }
 0x108   : > { %1467 = vst [vmem:[%s6450_s21 + $0x20] sm:$0xff] %v1435_v21  ;;  %v1090_v24 = vadd.f32 %v1089_v22, %v6562_v14  ;;  %v1138_v25 = vpop.f32.mrf.mxu3  ;;  %v994_v26 = vpop.f32.mrf.mxu0  ;;  %v1673_v45 = vunpack.c.l.b16 %v1435_v21  ;;  %v1674_v47 = vunpack.c.h.b16 %v1435_v21  ;;  %v5193_v21 = vor.u32 %v5585_v17, %v5192_v16  ;;  %v4936_v22 = vld [vmem:[#allocation9 + $0x80] sm:$0xf]  ;;  %v5613_v17 = vld [vmem:[#allocation9 + $0x36c] sm:$0xf0] }
 0x109   : > { %v1043_v28 = vpop.f32.mrf.mxu1  ;;  %v995_v35 = vadd.f32 %v994_v26, %v6555_v63  ;;  %v4937_v49 = vor.u32 %v5521_v23, %v4936_v22 }
 0x10a   : > { %v1139_v34 = vadd.f32 %v1138_v25, %v1090_v24  ;;  %v5320_v24 = vld [vmem:[#allocation9 + $0x380] sm:$0xf]  ;;  %2534 = vmatpush.bf16.msra.mxu2 %v5193_v21 }
 0x10b   : > { %1189 = vmatmul.bf16.gmra.mxu0 %v6481_v36  ;;  %v1044_v44 = vadd.f32 %v1043_v28, %v995_v35  ;;  %v5321_v28 = vor.u32 %v5617_v27, %v5320_v24 }
 0x10c   : > { %v1380_v42 = vmax.f32 %v1139_v34, 0.0  ;;  %1238 = vmatmul.bf16.gmra.mxu1 %v6483_v37  ;;  %1287 = vmatmul.bf16.gmra.mxu2 %v6481_v36 }
 0x10d   : > { %1336 = vmatmul.bf16.gmra.mxu3 %v6483_v37  ;;  %v1383_v37 = vmax.f32 %v1044_v44, 0.0  ;;  %2436 = vmatpush.bf16.msra.mxu0 %v4937_v49 }
 0x10e   : > { %v1437_v43 = vpack.c.bf16 %v1380_v42, %v1379_v41  ;;  %2583 = vmatpush.bf16.msra.mxu3 %v5321_v28 }
 0x10f   : > { %v1092_v46 = vpop.f32.mrf.mxu2 }
 0x110   : > { %1469 = vst [vmem:[%s6450_s21 + $0x30] sm:$0xff] %v1437_v43  ;;  %v1677_v48 = vunpack.c.l.b16 %v1437_v43  ;;  %v1678_v50 = vunpack.c.h.b16 %v1437_v43  ;;  %v1093_v54 = vadd.f32 %v1092_v46, %v6562_v14  ;;  %v1141_v55 = vpop.f32.mrf.mxu3  ;;  %v996_v58 = vpop.f32.mrf.mxu0 }
 0x111   : > { %v1045_v59 = vpop.f32.mrf.mxu1  ;;  %v997_v6 = vadd.f32 %v996_v58, %v6555_v63 }
 0x112   : > { %v6590_v0 = vpack.c.b16 %v1677_v48, %v1673_v45  ;;  %v6592_v36 = vpack.c.b16 %v1678_v50, %v1674_v47  ;;  %v1142_v1 = vadd.f32 %v1141_v55, %v1093_v54  ;;  %v5064_v47 = vld [vmem:[#allocation9 + $0x180] sm:$0xf]  ;;  %v5553_v48 = vld [vmem:[#allocation9 + $0x18c] sm:$0xf0] }
 0x113   : > { %v1046_v19 = vadd.f32 %v1045_v59, %v997_v6  ;;  %v5065_v50 = vor.u32 %v5553_v48, %v5064_v47 }
 0x114   : > { %v1384_v5 = vmax.f32 %v1142_v1, 0.0 }
 0x115   : > { %v1387_v53 = vmax.f32 %v1046_v19, 0.0  ;;  %2485 = vmatpush.bf16.msra.mxu1 %v5065_v50  ;;  %v5517_v19 = vld [vmem:[#allocation9 + $0x6c] sm:$0xf0]  ;;  %v5160_v50 = vld [vmem:[#allocation9 + $0x240] sm:$0xf] }
 0x116   : > { %v1439_v7 = vpack.c.bf16 %v1384_v5, %v1383_v37  ;;  %v5581_v5 = vld [vmem:[#allocation9 + $0x26c] sm:$0xf0] }
 0x117   : > { %v1094_v8 = vpop.f32.mrf.mxu2 }
 0x118   : > { %1471 = vst [vmem:[%s6450_s21 + $0x40] sm:$0xff] %v1439_v7  ;;  %v1095_v12 = vadd.f32 %v1094_v8, %v6562_v14  ;;  %v1143_v13 = vpop.f32.mrf.mxu3  ;;  %v999_v15 = vpop.f32.mrf.mxu0  ;;  %v1681_v34 = vunpack.c.l.b16 %v1439_v7  ;;  %v1682_v38 = vunpack.c.h.b16 %v1439_v7  ;;  %v5177_v7 = vor.u32 %v5581_v5, %v5176_v4  ;;  %v4920_v8 = vld [vmem:[#allocation9 + $0x60] sm:$0xf]  ;;  %v5609_v5 = vld [vmem:[#allocation9 + $0x34c] sm:$0xf0] }
 0x119   : > { %v1048_v20 = vpop.f32.mrf.mxu1  ;;  %v1000_v26 = vadd.f32 %v999_v15, %v6555_v63  ;;  %v4921_v16 = vor.u32 %v5517_v19, %v4920_v8 }
 0x11a   : > { %v1144_v25 = vadd.f32 %v1143_v13, %v1095_v12  ;;  %v5304_v12 = vld [vmem:[#allocation9 + $0x360] sm:$0xf]  ;;  %2535 = vmatpush.bf16.msra.mxu2 %v5177_v7 }
 0x11b   : > { %1194 = vmatmul.bf16.gmra.mxu0 %v6493_v56  ;;  %v1049_v33 = vadd.f32 %v1048_v20, %v1000_v26  ;;  %v5305_v20 = vor.u32 %v5613_v17, %v5304_v12  ;;  %v5032_v17 = vld [vmem:[#allocation9 + $0x140] sm:$0xf] }
 0x11c   : > { %v1388_v29 = vmax.f32 %v1144_v25, 0.0  ;;  %1243 = vmatmul.bf16.gmra.mxu1 %v6495_v57  ;;  %1292 = vmatmul.bf16.gmra.mxu2 %v6493_v56 }
 0x11d   : > { %1341 = vmatmul.bf16.gmra.mxu3 %v6495_v57  ;;  %v1391_v57 = vmax.f32 %v1049_v33, 0.0  ;;  %2437 = vmatpush.bf16.msra.mxu0 %v4921_v16 }
 0x11e   : > { %v1441_v32 = vpack.c.bf16 %v1388_v29, %v1387_v53  ;;  %2584 = vmatpush.bf16.msra.mxu3 %v5305_v20  ;;  %v5545_v20 = vld [vmem:[#allocation9 + $0x14c] sm:$0xf0] }
 0x11f   : > { %v1097_v35 = vpop.f32.mrf.mxu2 }
 0x120   : > { %1473 = vst [vmem:[%s6450_s21 + $0x50] sm:$0xff] %v1441_v32  ;;  %v1685_v39 = vunpack.c.l.b16 %v1441_v32  ;;  %v1686_v40 = vunpack.c.h.b16 %v1441_v32  ;;  %v1098_v41 = vadd.f32 %v1097_v35, %v6562_v14  ;;  %v1146_v42 = vpop.f32.mrf.mxu3  ;;  %v1001_v43 = vpop.f32.mrf.mxu0 }
 0x121   : > { %v1050_v44 = vpop.f32.mrf.mxu1  ;;  %v1002_v55 = vadd.f32 %v1001_v43, %v6555_v63 }
 0x122   : > { %v6604_v45 = vpack.c.b16 %v1685_v39, %v1681_v34  ;;  %v6606_v56 = vpack.c.b16 %v1686_v40, %v1682_v38  ;;  %v1147_v46 = vadd.f32 %v1146_v42, %v1098_v41  ;;  %v5048_v38 = vld [vmem:[#allocation9 + $0x160] sm:$0xf]  ;;  %v5549_v39 = vld [vmem:[#allocation9 + $0x16c] sm:$0xf0] }
 0x123   : > { %v1051_v37 = vadd.f32 %v1050_v44, %v1002_v55  ;;  %v5049_v40 = vor.u32 %v5549_v39, %v5048_v38  ;;  %v5541_v38 = vld [vmem:[#allocation9 + $0x12c] sm:$0xf0] }
 0x124   : > { %v1392_v54 = vmax.f32 %v1147_v46, 0.0 }
 0x125   : > { %v1395_v21 = vmax.f32 %v1051_v37, 0.0  ;;  %2486 = vmatpush.bf16.msra.mxu1 %v5049_v40  ;;  %v5513_v37 = vld [vmem:[#allocation9 + $0x4c] sm:$0xf0] }
 0x126   : > { %v1443_v58 = vpack.c.bf16 %v1392_v54, %v1391_v57  ;;  %v5577_v54 = vld [vmem:[#allocation9 + $0x24c] sm:$0xf0] }
 0x127   : > { %v1099_v59 = vpop.f32.mrf.mxu2 }
 0x128   : > { %1475 = vst [vmem:[%s6450_s21 + $0x60] sm:$0xff] %v1443_v58  ;;  %v1100_v1 = vadd.f32 %v1099_v59, %v6562_v14  ;;  %v1148_v2 = vpop.f32.mrf.mxu3  ;;  %v1004_v3 = vpop.f32.mrf.mxu0  ;;  %v1689_v25 = vunpack.c.l.b16 %v1443_v58  ;;  %v1690_v49 = vunpack.c.h.b16 %v1443_v58  ;;  %v5161_v58 = vor.u32 %v5577_v54, %v5160_v50  ;;  %v4904_v59 = vld [vmem:[#allocation9 + $0x40] sm:$0xf]  ;;  %v5573_v54 = vld [vmem:[#allocation9 + $0x22c] sm:$0xf0] }
 0x129   : > { %v1053_v6 = vpop.f32.mrf.mxu1  ;;  %v1005_v15 = vadd.f32 %v1004_v3, %v6555_v63  ;;  %v4905_v4 = vor.u32 %v5513_v37, %v4904_v59  ;;  %v5144_v50 = vld [vmem:[#allocation9 + $0x220] sm:$0xf] }
 0x12a   : > { %v1149_v13 = vadd.f32 %v1148_v2, %v1100_v1  ;;  %v5288_v1 = vld [vmem:[#allocation9 + $0x340] sm:$0xf]  ;;  %2536 = vmatpush.bf16.msra.mxu2 %v5161_v58  ;;  %v5145_v59 = vor.u32 %v5573_v54, %v5144_v50 }
 0x12b   : > { %1199 = vmatmul.bf16.gmra.mxu0 %v6505_v10  ;;  %v1054_v24 = vadd.f32 %v1053_v6, %v1005_v15  ;;  %v5289_v6 = vor.u32 %v5609_v5, %v5288_v1  ;;  %v5272_v37 = vld [vmem:[#allocation9 + $0x320] sm:$0xf]  ;;  %v5605_v1 = vld [vmem:[#allocation9 + $0x32c] sm:$0xf0] }
 0x12c   : > { %v1396_v22 = vmax.f32 %v1149_v13, 0.0  ;;  %1248 = vmatmul.bf16.gmra.mxu1 %v6507_v11  ;;  %1297 = vmatmul.bf16.gmra.mxu2 %v6505_v10  ;;  %v5273_v5 = vor.u32 %v5605_v1, %v5272_v37 }
 0x12d   : > { %1346 = vmatmul.bf16.gmra.mxu3 %v6507_v11  ;;  %v1399_v11 = vmax.f32 %v1054_v24, 0.0  ;;  %2438 = vmatpush.bf16.msra.mxu0 %v4905_v4 }
 0x12e   : > { %v1445_v23 = vpack.c.bf16 %v1396_v22, %v1395_v21  ;;  %2585 = vmatpush.bf16.msra.mxu3 %v5289_v6  ;;  %2537 = vmatpush.bf16.msra.mxu2 %v5145_v59 }
 0x12f   : > { %v1102_v26 = vpop.f32.mrf.mxu2 }
 0x130   : > { %1477 = vst [vmem:[%s6450_s21 + $0x70] sm:$0xff] %v1445_v23  ;;  %v1693_v27 = vunpack.c.l.b16 %v1445_v23  ;;  %v1694_v28 = vunpack.c.h.b16 %v1445_v23  ;;  %v1103_v53 = vadd.f32 %v1102_v26, %v6562_v14  ;;  %v1151_v29 = vpop.f32.mrf.mxu3  ;;  %v1006_v32 = vpop.f32.mrf.mxu0  ;;  %v5033_v26 = vor.u32 %v5545_v20, %v5032_v17 }
 0x131   : > { %v1055_v33 = vpop.f32.mrf.mxu1  ;;  %v1007_v42 = vadd.f32 %v1006_v32, %v6555_v63  ;;  %v5016_v32 = vld [vmem:[#allocation9 + $0x120] sm:$0xf] }
 0x132   : > { %v6618_v34 = vpack.c.b16 %v1693_v27, %v1689_v25  ;;  %v6620_v10 = vpack.c.b16 %v1694_v28, %v1690_v49  ;;  %v1152_v35 = vadd.f32 %v1151_v29, %v1103_v53  ;;  %2487 = vmatpush.bf16.msra.mxu1 %v5033_v26  ;;  %v4888_v53 = vld [vmem:[#allocation9 + $0x20] sm:$0xf]  ;;  %v5509_v29 = vld [vmem:[#allocation9 + $0x2c] sm:$0xf0]  ;;  %v5017_v39 = vor.u32 %v5541_v38, %v5016_v32 }
 0x133   : > { %v1056_v57 = vadd.f32 %v1055_v33, %v1007_v42  ;;  %v4872_v42 = vld [vmem:[#allocation9] sm:$0xf]  ;;  %2586 = vmatpush.bf16.msra.mxu3 %v5273_v5  ;;  %v5569_v38 = vld [vmem:[#allocation9 + $0x20c] sm:$0xf0] }
 0x134   : > { %v1400_v41 = vmax.f32 %v1152_v35, 0.0  ;;  %v4889_v35 = vor.u32 %v5509_v29, %v4888_v53 }
 0x135   : > { %v1403_v7 = vmax.f32 %v1056_v57, 0.0 }
 0x136   : > { %v1447_v43 = vpack.c.bf16 %v1400_v41, %v1399_v11  ;;  %2439 = vmatpush.bf16.msra.mxu0 %v4889_v35  ;;  %2488 = vmatpush.bf16.msra.mxu1 %v5017_v39  ;;  %v5128_v35 = vld [vmem:[#allocation9 + $0x200] sm:$0xf] }
 0x137   : > { %v1104_v44 = vpop.f32.mrf.mxu2 }
 0x138   : > { %1479 = vst [vmem:[%s6450_s21 + $0x80] sm:$0xff] %v1447_v43  ;;  %v1105_v46 = vadd.f32 %v1104_v44, %v6562_v14  ;;  %v1153_v47 = vpop.f32.mrf.mxu3  ;;  %v1009_v48 = vpop.f32.mrf.mxu0  ;;  %v1697_v13 = vunpack.c.l.b16 %v1447_v43  ;;  %v1698_v15 = vunpack.c.h.b16 %v1447_v43  ;;  %v5505_v43 = vld [vmem:[#allocation9 + $0xc] sm:$0xf0]  ;;  %v5000_v44 = vld [vmem:[#allocation9 + $0x100] sm:$0xf] }
 0x139   : > { %v1058_v55 = vpop.f32.mrf.mxu1  ;;  %v1010_v3 = vadd.f32 %v1009_v48, %v6555_v63 }
 0x13a   : > { %v1154_v2 = vadd.f32 %v1153_v47, %v1105_v46 }
 0x13b   : > { %1204 = vmatmul.bf16.gmra.mxu0 %v6517_v30  ;;  %v1059_v12 = vadd.f32 %v1058_v55, %v1010_v3  ;;  %v4873_v55 = vor.u32 %v5505_v43, %v4872_v42  ;;  %v5601_v42 = vld [vmem:[#allocation9 + $0x30c] sm:$0xf0] }
 0x13c   : > { %v1404_v8 = vmax.f32 %v1154_v2, 0.0  ;;  %1253 = vmatmul.bf16.gmra.mxu1 %v6519_v31  ;;  %1302 = vmatmul.bf16.gmra.mxu2 %v6517_v30  ;;  %v5537_v2 = vld [vmem:[#allocation9 + $0x10c] sm:$0xf0] }
 0x13d   : > { %1351 = vmatmul.bf16.gmra.mxu3 %v6519_v31  ;;  %v1407_v27 = vmax.f32 %v1059_v12, 0.0  ;;  %2440 = vmatpush.bf16.msra.mxu0 %v4873_v55  ;;  %v5001_v6 = vor.u32 %v5537_v2, %v5000_v44 }
 0x13e   : > { %v1449_v19 = vpack.c.bf16 %v1404_v8, %v1403_v7 }
 0x13f   : > { %v1107_v16 = vpop.f32.mrf.mxu2  ;;  %2489 = vmatpush.bf16.msra.mxu1 %v5001_v6 }
 0x140   : > { %1481 = vst [vmem:[%s6450_s21 + $0x90] sm:$0xff] %v1449_v19  ;;  %v1701_v21 = vunpack.c.l.b16 %v1449_v19  ;;  %v1702_v22 = vunpack.c.h.b16 %v1449_v19  ;;  %v1108_v23 = vadd.f32 %v1107_v16, %v6562_v14  ;;  %v1156_v24 = vpop.f32.mrf.mxu3  ;;  %v1011_v25 = vpop.f32.mrf.mxu0 }
 0x141   : > { %v1060_v30 = vpop.f32.mrf.mxu1  ;;  %v1012_v11 = vadd.f32 %v1011_v25, %v6555_v63 }
 0x142   : > { %v6632_v49 = vpack.c.b16 %v1701_v21, %v1697_v13  ;;  %v6634_v31 = vpack.c.b16 %v1702_v22, %v1698_v15  ;;  %v1157_v28 = vadd.f32 %v1156_v24, %v1108_v23 }
 0x143   : > { %v1061_v57 = vadd.f32 %v1060_v30, %v1012_v11 }
 0x144   : > { %v1408_v33 = vmax.f32 %v1157_v28, 0.0 }
 0x145   : > { %v1411_v7 = vmax.f32 %v1061_v57, 0.0 }
 0x146   : > { %v1451_v40 = vpack.c.bf16 %v1408_v33, %v1407_v27 }
 0x147   : > { %v1109_v41 = vpop.f32.mrf.mxu2 }
 0x148   : > { %1483 = vst [vmem:[%s6450_s21 + $0xa0] sm:$0xff] %v1451_v40  ;;  %v1110_v46 = vadd.f32 %v1109_v41, %v6562_v14  ;;  %v1158_v47 = vpop.f32.mrf.mxu3  ;;  %v1014_v48 = vpop.f32.mrf.mxu0  ;;  %v1705_v13 = vunpack.c.l.b16 %v1451_v40  ;;  %v1706_v16 = vunpack.c.h.b16 %v1451_v40  ;;  %v5129_v40 = vor.u32 %v5569_v38, %v5128_v35  ;;  %v5256_v41 = vld [vmem:[#allocation9 + $0x300] sm:$0xf] }
 0x149   : > { %v1063_v58 = vpop.f32.mrf.mxu1  ;;  %v1015_v4 = vadd.f32 %v1014_v48, %v6555_v63  ;;  %v5257_v57 = vor.u32 %v5601_v42, %v5256_v41 }
 0x14a   : > { %v1159_v3 = vadd.f32 %v1158_v47, %v1110_v46  ;;  %2538 = vmatpush.bf16.msra.mxu2 %v5129_v40 }
 0x14b   : > { %1209 = vmatmul.bf16.gmra.mxu0 %v6529_v51  ;;  %v1064_v12 = vadd.f32 %v1063_v58, %v1015_v4  ;;  %2587 = vmatpush.bf16.msra.mxu3 %v5257_v57 }
 0x14c   : > { %v1412_v8 = vmax.f32 %v1159_v3, 0.0  ;;  %1258 = vmatmul.bf16.gmra.mxu1 %v6531_v52  ;;  %1307 = vmatmul.bf16.gmra.mxu2 %v6529_v51 }
 0x14d   : > { %1356 = vmatmul.bf16.gmra.mxu3 %v6531_v52  ;;  %v1415_v52 = vmax.f32 %v1064_v12, 0.0  ;;  %v6666_v12 = vperm.slane %v6552_v62, 2 }
 0x14e   : > { %v1453_v19 = vpack.c.bf16 %v1412_v8, %v1411_v7 }
 0x14f   : > { %v1112_v15 = vpop.f32.mrf.mxu2 }
 0x150   : > { %1485 = vst [vmem:[%s6450_s21 + $0xb0] sm:$0xff] %v1453_v19  ;;  %v1709_v17 = vunpack.c.l.b16 %v1453_v19  ;;  %v1710_v20 = vunpack.c.h.b16 %v1453_v19  ;;  %v1113_v21 = vadd.f32 %v1112_v15, %v6562_v14  ;;  %v1161_v22 = vpop.f32.mrf.mxu3  ;;  %v1016_v23 = vpop.f32.mrf.mxu0 }
 0x151   : > { %v1065_v24 = vpop.f32.mrf.mxu1  ;;  %v1017_v27 = vadd.f32 %v1016_v23, %v6555_v63 }
 0x152   : > { %v6646_v25 = vpack.c.b16 %v1709_v17, %v1705_v13  ;;  %v6648_v51 = vpack.c.b16 %v1710_v20, %v1706_v16  ;;  %v1162_v26 = vadd.f32 %v1161_v22, %v1113_v21  ;;  %v5595_v21 = vld [vmem:[#allocation9 + $0x2e4] sm:$0xf]  ;;  %v5242_v22 = vld [vmem:[#allocation9 + $0x2f0] sm:$0xf0] }
 0x153   : > { %v1066_v29 = vadd.f32 %v1065_v24, %v1017_v27  ;;  %v5245_v24 = vor.u32 %v5595_v21, %v5242_v22 }
 0x154   : > { %v1416_v30 = vmax.f32 %v1162_v26, 0.0  ;;  %v4986_v26 = vld [vmem:[#allocation9 + $0xf0] sm:$0xf0] }
 0x155   : > { %v1419_v46 = vmax.f32 %v1066_v29, 0.0  ;;  %2727 = vmatpush.bf16.msrb.mxu2 %v5245_v24 }
 0x156   : > { %v1455_v28 = vpack.c.bf16 %v1416_v30, %v1415_v52  ;;  %v5531_v52 = vld [vmem:[#allocation9 + $0xe4] sm:$0xf] }
 0x157   : > { %v1114_v53 = vpop.f32.mrf.mxu2  ;;  %v5627_v30 = vld [vmem:[#allocation9 + $0x3e4] sm:$0xf] }
 0x158   : > { %1487 = vst [vmem:[%s6450_s21 + $0xc0] sm:$0xff] %v1455_v28  ;;  %v1115_v32 = vadd.f32 %v1114_v53, %v6562_v14  ;;  %v1163_v33 = vpop.f32.mrf.mxu3  ;;  %v1019_v11 = vpop.f32.mrf.mxu0  ;;  %v1713_v54 = vunpack.c.l.b16 %v1455_v28  ;;  %v1714_v58 = vunpack.c.h.b16 %v1455_v28  ;;  %v4989_v28 = vor.u32 %v5531_v52, %v4986_v26  ;;  %v5370_v53 = vld [vmem:[#allocation9 + $0x3f0] sm:$0xf0] }
 0x159   : > { %v1068_v39 = vpop.f32.mrf.mxu1  ;;  %v1020_v44 = vadd.f32 %v1019_v11, %v6555_v63  ;;  %v5373_v29 = vor.u32 %v5627_v30, %v5370_v53 }
 0x15a   : > { %v1164_v43 = vadd.f32 %v1163_v33, %v1115_v32  ;;  %v6674_v33 = vperm.slane %v6552_v62, 3  ;;  %2629 = vmatpush.bf16.msrb.mxu0 %v4989_v28 }
 0x15b   : > { %1214 = vmatmul.bf16.gmra.mxu0 %v6541_v60  ;;  %v1069_v50 = vadd.f32 %v1068_v39, %v1020_v44  ;;  %2776 = vmatpush.bf16.msrb.mxu3 %v5373_v29 }
 0x15c   : > { %v1420_v47 = vmax.f32 %v1164_v43, 0.0  ;;  %1263 = vmatmul.bf16.gmra.mxu1 %v6543_v61  ;;  %1312 = vmatmul.bf16.gmra.mxu2 %v6541_v60 }
 0x15d   : > { %1361 = vmatmul.bf16.gmra.mxu3 %v6543_v61  ;;  %v1423_v61 = vmax.f32 %v1069_v50, 0.0 }
 0x15e   : > { %v1457_v48 = vpack.c.bf16 %v1420_v47, %v1419_v46 }
 0x15f   : > { %v1117_v55 = vpop.f32.mrf.mxu2 }
 0x160   : > { %1489 = vst [vmem:[%s6450_s21 + $0xd0] sm:$0xff] %v1457_v48  ;;  %v1717_v59 = vunpack.c.l.b16 %v1457_v48  ;;  %v1718_v37 = vunpack.c.h.b16 %v1457_v48  ;;  %v1118_v1 = vadd.f32 %v1117_v55, %v6562_v14  ;;  %v1166_v2 = vpop.f32.mrf.mxu3  ;;  %v1021_v3 = vpop.f32.mrf.mxu0  ;;  %v5114_v55 = vld [vmem:[#allocation9 + $0x1f0] sm:$0xf0] }
 0x161   : > { %v1070_v4 = vpop.f32.mrf.mxu1  ;;  %v1022_v8 = vadd.f32 %v1021_v3, %v6555_v63 }
 0x162   : > { %v6660_v5 = vpack.c.b16 %v1717_v59, %v1713_v54  ;;  %v6662_v60 = vpack.c.b16 %v1718_v37, %v1714_v58  ;;  %v1167_v6 = vadd.f32 %v1166_v2, %v1118_v1  ;;  %v5563_v54 = vld [vmem:[#allocation9 + $0x1e4] sm:$0xf] }
 0x163   : > { %v1071_v15 = vadd.f32 %v1070_v4, %v1022_v8  ;;  %v5117_v58 = vor.u32 %v5563_v54, %v5114_v55  ;;  %v5226_v8 = vld [vmem:[#allocation9 + $0x2d0] sm:$0xf0] }
 0x164   : > { %v1424_v7 = vmax.f32 %v1167_v6, 0.0 }
 0x165   : > { %2678 = vmatpush.bf16.msrb.mxu1 %v5117_v58 }
 0x166   : > { %v1459_v19 = vpack.c.bf16 %v1424_v7, %v1423_v61  ;;  %v5591_v7 = vld [vmem:[#allocation9 + $0x2c4] sm:$0xf] }
 0x167   : > { %v1119_v13 = vpop.f32.mrf.mxu2 }
 0x168   : > { %1491 = vst [vmem:[%s6450_s21 + $0xe0] sm:$0xff] %v1459_v19  ;;  %v1120_v16 = vadd.f32 %v1119_v13, %v6562_v14  ;;  %v1168_v17 = vpop.f32.mrf.mxu3  ;;  %v1180_v20 = vpop.f32.mrf.mxu0  ;;  %v1427_v14 = vmax.f32 %v1071_v15, 0.0  ;;  %v1721_v38 = vunpack.c.l.b16 %v1459_v19  ;;  %v1722_v40 = vunpack.c.h.b16 %v1459_v19  ;;  %v5527_v15 = vld [vmem:[#allocation9 + $0xc4] sm:$0xf] }
 0x169   : > { %v1229_v23 = vpop.f32.mrf.mxu1  ;;  %v1181_v63 = vadd.f32 %v1180_v20, %v6666_v12  ;;  %v5229_v13 = vor.u32 %v5591_v7, %v5226_v8  ;;  %v5619_v7 = vld [vmem:[#allocation9 + $0x3a4] sm:$0xf] }
 0x16a   : > { %v1169_v27 = vadd.f32 %v1168_v17, %v1120_v16  ;;  %v4970_v16 = vld [vmem:[#allocation9 + $0xd0] sm:$0xf0]  ;;  %v5623_v17 = vld [vmem:[#allocation9 + $0x3c4] sm:$0xf] }
 0x16b   : > { %2441 = vmatmul.bf16.vlgmr.msra.gmra.mxu0 %v6576_v9  ;;  %v1230_v35 = vadd.f32 %v1229_v23, %v1181_v63  ;;  %v4973_v22 = vor.u32 %v5527_v15, %v4970_v16  ;;  %v5354_v23 = vld [vmem:[#allocation9 + $0x3d0] sm:$0xf0]  ;;  %2728 = vmatpush.bf16.msrb.mxu2 %v5229_v13 }
 0x16c   : > { %v1428_v32 = vmax.f32 %v1169_v27, 0.0  ;;  %2490 = vmatmul.bf16.vlgmr.msra.gmra.mxu1 %v6578_v18  ;;  %v5357_v24 = vor.u32 %v5623_v17, %v5354_v23  ;;  %v5338_v15 = vld [vmem:[#allocation9 + $0x3b0] sm:$0xf0] }
 0x16d   : > { %v1369_v48 = vmax.f32 %v1230_v35, 0.0  ;;  %2630 = vmatpush.bf16.msrb.mxu0 %v4973_v22  ;;  %v5341_v16 = vor.u32 %v5619_v7, %v5338_v15  ;;  %v5322_v7 = vld [vmem:[#allocation9 + $0x390] sm:$0xf0] }
 0x16e   : > { %v1461_v11 = vpack.c.bf16 %v1428_v32, %v1427_v14  ;;  %2777 = vmatpush.bf16.msrb.mxu3 %v5357_v24 }
 0x16f   : > { %v1278_v39 = vpop.f32.mrf.mxu2 }
 0x170   : > { %1493 = vst [vmem:[%s6450_s21 + $0xf0] sm:$0xff] %v1461_v11  ;;  %v1725_v41 = vunpack.c.l.b16 %v1461_v11  ;;  %v1726_v42 = vunpack.c.h.b16 %v1461_v11  ;;  %v1279_v43 = vadd.f32 %v1278_v39, %v6674_v33  ;;  %v1327_v44 = vpop.f32.mrf.mxu3  ;;  %v1182_v57 = vpop.f32.mrf.mxu0 }
 0x171   : > { %v1231_v46 = vpop.f32.mrf.mxu1  ;;  %v1183_v37 = vadd.f32 %v1182_v57, %v6666_v12 }
 0x172   : > { %v6678_v47 = vpack.c.b16 %v1725_v41, %v1721_v38  ;;  %v6680_v62 = vpack.c.b16 %v1726_v42, %v1722_v40  ;;  %v1328_v50 = vadd.f32 %v1327_v44, %v1279_v43  ;;  %v5559_v43 = vld [vmem:[#allocation9 + $0x1c4] sm:$0xf]  ;;  %v5098_v44 = vld [vmem:[#allocation9 + $0x1d0] sm:$0xf0]  ;;  %2778 = vmatpush.bf16.msrb.mxu3 %v5341_v16 }
 0x173   : > { %v1232_v3 = vadd.f32 %v1231_v46, %v1183_v37  ;;  %v5101_v57 = vor.u32 %v5559_v43, %v5098_v44 }
 0x174   : > { %v1370_v59 = vmax.f32 %v1328_v50, 0.0 }
 0x175   : > { %v1373_v52 = vmax.f32 %v1232_v3, 0.0  ;;  %2679 = vmatpush.bf16.msrb.mxu1 %v5101_v57 }
 0x176   : > { %v1432_v1 = vpack.c.bf16 %v1370_v59, %v1369_v48 }
 0x177   : > { %v1280_v2 = vpop.f32.mrf.mxu2 }
 0x178   : > { %1464 = vst [vmem:[%s6450_s21 + $0x8] sm:$0xff] %v1432_v1  ;;  %v1281_v4 = vadd.f32 %v1280_v2, %v6674_v33  ;;  %v1329_v61 = vpop.f32.mrf.mxu3  ;;  %v1185_v6 = vpop.f32.mrf.mxu0  ;;  %v1667_v63 = vunpack.c.l.b16 %v1432_v1  ;;  %v1668_v53 = vunpack.c.h.b16 %v1432_v1  ;;  %v5587_v1 = vld [vmem:[#allocation9 + $0x2a4] sm:$0xf]  ;;  %v5210_v2 = vld [vmem:[#allocation9 + $0x2b0] sm:$0xf0] }
 0x179   : > { %v1234_v19 = vpop.f32.mrf.mxu1  ;;  %v1186_v21 = vadd.f32 %v1185_v6, %v6666_v12  ;;  %v4954_v6 = vld [vmem:[#allocation9 + $0xb0] sm:$0xf0] }
 0x17a   : > { %v1330_v20 = vadd.f32 %v1329_v61, %v1281_v4  ;;  %v5213_v4 = vor.u32 %v5587_v1, %v5210_v2  ;;  %v5523_v61 = vld [vmem:[#allocation9 + $0xa4] sm:$0xf]  ;;  %v4938_v2 = vld [vmem:[#allocation9 + $0x90] sm:$0xf0] }
 0x17b   : > { %2446 = vmatmul.bf16.gmra.mxu0 %v6590_v0  ;;  %v1235_v27 = vadd.f32 %v1234_v19, %v1186_v21  ;;  %v4957_v13 = vor.u32 %v5523_v61, %v4954_v6  ;;  %v5519_v1 = vld [vmem:[#allocation9 + $0x84] sm:$0xf] }
 0x17c   : > { %v1374_v26 = vmax.f32 %v1330_v20, 0.0  ;;  %2495 = vmatmul.bf16.gmra.mxu1 %v6592_v36  ;;  %2729 = vmatpush.bf16.msrb.mxu2 %v5213_v4  ;;  %v4941_v6 = vor.u32 %v5519_v1, %v4938_v2  ;;  %v5611_v1 = vld [vmem:[#allocation9 + $0x364] sm:$0xf] }
 0x17d   : > { %v1377_v41 = vmax.f32 %v1235_v27, 0.0  ;;  %2631 = vmatpush.bf16.msrb.mxu0 %v4957_v13 }
 0x17e   : > { %v1434_v30 = vpack.c.bf16 %v1374_v26, %v1373_v52 }
 0x17f   : > { %v1283_v28 = vpop.f32.mrf.mxu2 }
 0x180   : > { %1466 = vst [vmem:[%s6450_s21 + $0x18] sm:$0xff] %v1434_v30  ;;  %v1671_v29 = vunpack.c.l.b16 %v1434_v30  ;;  %v1672_v14 = vunpack.c.h.b16 %v1434_v30  ;;  %v1284_v32 = vadd.f32 %v1283_v28, %v6674_v33  ;;  %v1332_v11 = vpop.f32.mrf.mxu3  ;;  %v1187_v35 = vpop.f32.mrf.mxu0 }
 0x181   : > { %v1236_v38 = vpop.f32.mrf.mxu1  ;;  %v1188_v48 = vadd.f32 %v1187_v35, %v6666_v12  ;;  %v5555_v35 = vld [vmem:[#allocation9 + $0x1a4] sm:$0xf]  ;;  %2632 = vmatpush.bf16.msrb.mxu0 %v4941_v6 }
 0x182   : > { %v6690_v39 = vpack.c.b16 %v1671_v29, %v1667_v63  ;;  %v6692_v40 = vpack.c.b16 %v1672_v14, %v1668_v53  ;;  %v1333_v42 = vadd.f32 %v1332_v11, %v1284_v32 }
 0x183   : > { %v1237_v55 = vadd.f32 %v1236_v38, %v1188_v48  ;;  %v5082_v38 = vld [vmem:[#allocation9 + $0x1b0] sm:$0xf0] }
 0x184   : > { %v1378_v46 = vmax.f32 %v1333_v42, 0.0  ;;  %2539 = vmatmul.bf16.vlgmr.msra.gmra.mxu2 %v6690_v39  ;;  %2588 = vmatmul.bf16.vlgmr.msra.gmra.mxu3 %v6692_v40 }
 0x185   : > { %v1381_v17 = vmax.f32 %v1237_v55, 0.0  ;;  %v5583_v55 = vld [vmem:[#allocation9 + $0x284] sm:$0xf] }
 0x186   : > { %v1436_v50 = vpack.c.bf16 %v1378_v46, %v1377_v41  ;;  %v5085_v41 = vor.u32 %v5555_v35, %v5082_v38 }
 0x187   : > { %v1285_v54 = vpop.f32.mrf.mxu2 }
 0x188   : > { %1468 = vst [vmem:[%s6450_s21 + $0x28] sm:$0xff] %v1436_v50  ;;  %v1286_v58 = vadd.f32 %v1285_v54, %v6674_v33  ;;  %v1334_v59 = vpop.f32.mrf.mxu3  ;;  %v1190_v37 = vpop.f32.mrf.mxu0  ;;  %v1675_v23 = vunpack.c.l.b16 %v1436_v50  ;;  %v1676_v52 = vunpack.c.h.b16 %v1436_v50  ;;  %2680 = vmatpush.bf16.msrb.mxu1 %v5085_v41 }
 0x189   : > { %v1239_v3 = vpop.f32.mrf.mxu1  ;;  %v1191_v19 = vadd.f32 %v1190_v37, %v6666_v12 }
 0x18a   : > { %v1335_v8 = vadd.f32 %v1334_v59, %v1286_v58  ;;  %v5194_v58 = vld [vmem:[#allocation9 + $0x290] sm:$0xf0] }
 0x18b   : > { %2451 = vmatmul.bf16.gmra.mxu0 %v6604_v45  ;;  %v1240_v22 = vadd.f32 %v1239_v3, %v1191_v19  ;;  %v5197_v37 = vor.u32 %v5583_v55, %v5194_v58  ;;  %v5615_v3 = vld [vmem:[#allocation9 + $0x384] sm:$0xf] }
 0x18c   : > { %v1382_v20 = vmax.f32 %v1335_v8, 0.0  ;;  %2500 = vmatmul.bf16.gmra.mxu1 %v6606_v56  ;;  %v5325_v8 = vor.u32 %v5615_v3, %v5322_v7 }
 0x18d   : > { %v1385_v32 = vmax.f32 %v1240_v22, 0.0  ;;  %2730 = vmatpush.bf16.msrb.mxu2 %v5197_v37  ;;  %v4922_v37 = vld [vmem:[#allocation9 + $0x70] sm:$0xf0] }
 0x18e   : > { %v1438_v21 = vpack.c.bf16 %v1382_v20, %v1381_v17  ;;  %2779 = vmatpush.bf16.msrb.mxu3 %v5325_v8 }
 0x18f   : > { %v1288_v24 = vpop.f32.mrf.mxu2 }
 0x190   : > { %1470 = vst [vmem:[%s6450_s21 + $0x38] sm:$0xff] %v1438_v21  ;;  %v1679_v26 = vunpack.c.l.b16 %v1438_v21  ;;  %v1680_v30 = vunpack.c.h.b16 %v1438_v21  ;;  %v1289_v27 = vadd.f32 %v1288_v24, %v6674_v33  ;;  %v1337_v63 = vpop.f32.mrf.mxu3  ;;  %v1192_v28 = vpop.f32.mrf.mxu0 }
 0x191   : > { %v1241_v53 = vpop.f32.mrf.mxu1  ;;  %v1193_v43 = vadd.f32 %v1192_v28, %v6666_v12 }
 0x192   : > { %v6704_v29 = vpack.c.b16 %v1679_v26, %v1675_v23  ;;  %v6706_v14 = vpack.c.b16 %v1680_v30, %v1676_v52  ;;  %v1338_v11 = vadd.f32 %v1337_v63, %v1289_v27 }
 0x193   : > { %v1242_v46 = vadd.f32 %v1241_v53, %v1193_v43 }
 0x194   : > { %v1386_v42 = vmax.f32 %v1338_v11, 0.0  ;;  %2544 = vmatmul.bf16.gmra.mxu2 %v6704_v29  ;;  %2593 = vmatmul.bf16.gmra.mxu3 %v6706_v14  ;;  %v5066_v11 = vld [vmem:[#allocation9 + $0x190] sm:$0xf0] }
 0x195   : > { %v1389_v19 = vmax.f32 %v1242_v46, 0.0 }
 0x196   : > { %v1440_v44 = vpack.c.bf16 %v1386_v42, %v1385_v32  ;;  %v5551_v32 = vld [vmem:[#allocation9 + $0x184] sm:$0xf] }
 0x197   : > { %v1290_v57 = vpop.f32.mrf.mxu2  ;;  %v5069_v35 = vor.u32 %v5551_v32, %v5066_v11  ;;  %v5547_v32 = vld [vmem:[#allocation9 + $0x164] sm:$0xf]  ;;  %v5050_v11 = vld [vmem:[#allocation9 + $0x170] sm:$0xf0] }
 0x198   : > { %1472 = vst [vmem:[%s6450_s21 + $0x48] sm:$0xff] %v1440_v44  ;;  %v1291_v48 = vadd.f32 %v1290_v57, %v6674_v33  ;;  %v1339_v50 = vpop.f32.mrf.mxu3  ;;  %v1195_v54 = vpop.f32.mrf.mxu0  ;;  %v1683_v17 = vunpack.c.l.b16 %v1440_v44  ;;  %v1684_v21 = vunpack.c.h.b16 %v1440_v44 }
 0x199   : > { %v1244_v59 = vpop.f32.mrf.mxu1  ;;  %v1196_v61 = vadd.f32 %v1195_v54, %v6666_v12  ;;  %2681 = vmatpush.bf16.msrb.mxu1 %v5069_v35  ;;  %v5178_v54 = vld [vmem:[#allocation9 + $0x270] sm:$0xf0]  ;;  %v5053_v35 = vor.u32 %v5547_v32, %v5050_v11 }
 0x19a   : > { %v1340_v4 = vadd.f32 %v1339_v50, %v1291_v48  ;;  %v5579_v50 = vld [vmem:[#allocation9 + $0x264] sm:$0xf] }
 0x19b   : > { %2456 = vmatmul.bf16.gmra.mxu0 %v6618_v34  ;;  %v1245_v16 = vadd.f32 %v1244_v59, %v1196_v61  ;;  %v5181_v58 = vor.u32 %v5579_v50, %v5178_v54  ;;  %v5515_v59 = vld [vmem:[#allocation9 + $0x64] sm:$0xf]  ;;  %v5306_v61 = vld [vmem:[#allocation9 + $0x370] sm:$0xf0] }
 0x19c   : > { %v1390_v13 = vmax.f32 %v1340_v4, 0.0  ;;  %2505 = vmatmul.bf16.gmra.mxu1 %v6620_v10  ;;  %v4925_v4 = vor.u32 %v5515_v59, %v4922_v37  ;;  %v5309_v6 = vor.u32 %v5611_v1, %v5306_v61  ;;  %v5575_v50 = vld [vmem:[#allocation9 + $0x244] sm:$0xf]  ;;  %v5162_v54 = vld [vmem:[#allocation9 + $0x250] sm:$0xf0] }
 0x19d   : > { %v1393_v28 = vmax.f32 %v1245_v16, 0.0  ;;  %2731 = vmatpush.bf16.msrb.mxu2 %v5181_v58  ;;  %2682 = vmatpush.bf16.msrb.mxu1 %v5053_v35  ;;  %v5165_v58 = vor.u32 %v5575_v50, %v5162_v54  ;;  %v5511_v59 = vld [vmem:[#allocation9 + $0x44] sm:$0xf]  ;;  %v4906_v37 = vld [vmem:[#allocation9 + $0x50] sm:$0xf0] }
 0x19e   : > { %v1442_v15 = vpack.c.bf16 %v1390_v13, %v1389_v19  ;;  %2633 = vmatpush.bf16.msrb.mxu0 %v4925_v4  ;;  %2780 = vmatpush.bf16.msrb.mxu3 %v5309_v6  ;;  %v5607_v1 = vld [vmem:[#allocation9 + $0x344] sm:$0xf]  ;;  %v4909_v4 = vor.u32 %v5511_v59, %v4906_v37  ;;  %v5290_v61 = vld [vmem:[#allocation9 + $0x350] sm:$0xf0] }
 0x19f   : > { %v1293_v20 = vpop.f32.mrf.mxu2  ;;  %v5293_v6 = vor.u32 %v5607_v1, %v5290_v61  ;;  %v5018_v50 = vld [vmem:[#allocation9 + $0x130] sm:$0xf0]  ;;  %v5503_v59 = vld [vmem:[#allocation9 + $0x4] sm:$0xf] }
 0x1a0   : > { %1474 = vst [vmem:[%s6450_s21 + $0x58] sm:$0xff] %v1442_v15  ;;  %v1687_v22 = vunpack.c.l.b16 %v1442_v15  ;;  %v1688_v23 = vunpack.c.h.b16 %v1442_v15  ;;  %v1294_v24 = vadd.f32 %v1293_v20, %v6674_v33  ;;  %v1342_v52 = vpop.f32.mrf.mxu3  ;;  %v1197_v26 = vpop.f32.mrf.mxu0  ;;  %v4874_v37 = vld [vmem:[#allocation9 + $0x10] sm:$0xf0]  ;;  %v5535_v1 = vld [vmem:[#allocation9 + $0x104] sm:$0xf] }
 0x1a1   : > { %v1246_v30 = vpop.f32.mrf.mxu1  ;;  %v1198_v41 = vadd.f32 %v1197_v26, %v6666_v12  ;;  %2732 = vmatpush.bf16.msrb.mxu2 %v5165_v58 }
 0x1a2   : > { %v6718_v27 = vpack.c.b16 %v1687_v22, %v1683_v17  ;;  %v6720_v63 = vpack.c.b16 %v1688_v23, %v1684_v21  ;;  %v1343_v53 = vadd.f32 %v1342_v52, %v1294_v24  ;;  %2634 = vmatpush.bf16.msrb.mxu0 %v4909_v4  ;;  %2781 = vmatpush.bf16.msrb.mxu3 %v5293_v6  ;;  %v5571_v6 = vld [vmem:[#allocation9 + $0x224] sm:$0xf] }
 0x1a3   : > { %v1247_v44 = vadd.f32 %v1246_v30, %v1198_v41 }
 0x1a4   : > { %v1394_v38 = vmax.f32 %v1343_v53, 0.0  ;;  %2549 = vmatmul.bf16.gmra.mxu2 %v6718_v27  ;;  %2598 = vmatmul.bf16.gmra.mxu3 %v6720_v63 }
 0x1a5   : > { %v1397_v7 = vmax.f32 %v1247_v44, 0.0 }
 0x1a6   : > { %v1444_v42 = vpack.c.bf16 %v1394_v38, %v1393_v28 }
 0x1a7   : > { %v1295_v43 = vpop.f32.mrf.mxu2 }
 0x1a8   : > { %1476 = vst [vmem:[%s6450_s21 + $0x68] sm:$0xff] %v1444_v42  ;;  %v1296_v57 = vadd.f32 %v1295_v43, %v6674_v33  ;;  %v1344_v46 = vpop.f32.mrf.mxu3  ;;  %v1200_v48 = vpop.f32.mrf.mxu0  ;;  %v1691_v15 = vunpack.c.l.b16 %v1444_v42  ;;  %v1692_v17 = vunpack.c.h.b16 %v1444_v42 }
 0x1a9   : > { %v1249_v55 = vpop.f32.mrf.mxu1  ;;  %v1201_v3 = vadd.f32 %v1200_v48, %v6666_v12 }
 0x1aa   : > { %v1345_v2 = vadd.f32 %v1344_v46, %v1296_v57 }
 0x1ab   : > { %2461 = vmatmul.bf16.gmra.mxu0 %v6632_v49  ;;  %v1250_v13 = vadd.f32 %v1249_v55, %v1201_v3 }
 0x1ac   : > { %v1398_v8 = vmax.f32 %v1345_v2, 0.0  ;;  %2510 = vmatmul.bf16.gmra.mxu1 %v6634_v31 }
 0x1ad   : > { %v1401_v28 = vmax.f32 %v1250_v13, 0.0 }
 0x1ae   : > { %v1446_v19 = vpack.c.bf16 %v1398_v8, %v1397_v7 }
 0x1af   : > { %v1298_v16 = vpop.f32.mrf.mxu2 }
 0x1b0   : > { %1478 = vst [vmem:[%s6450_s21 + $0x78] sm:$0xff] %v1446_v19  ;;  %v1695_v20 = vunpack.c.l.b16 %v1446_v19  ;;  %v1696_v21 = vunpack.c.h.b16 %v1446_v19  ;;  %v1299_v22 = vadd.f32 %v1298_v16, %v6674_v33  ;;  %v1347_v23 = vpop.f32.mrf.mxu3  ;;  %v1202_v24 = vpop.f32.mrf.mxu0 }
 0x1b1   : > { %v1251_v52 = vpop.f32.mrf.mxu1  ;;  %v1203_v41 = vadd.f32 %v1202_v24, %v6666_v12 }
 0x1b2   : > { %v6732_v26 = vpack.c.b16 %v1695_v20, %v1691_v15  ;;  %v6734_v30 = vpack.c.b16 %v1696_v21, %v1692_v17  ;;  %v1348_v53 = vadd.f32 %v1347_v23, %v1299_v22  ;;  %v5543_v20 = vld [vmem:[#allocation9 + $0x144] sm:$0xf]  ;;  %v5034_v21 = vld [vmem:[#allocation9 + $0x150] sm:$0xf0] }
 0x1b3   : > { %v1252_v44 = vadd.f32 %v1251_v52, %v1203_v41 }
 0x1b4   : > { %v1402_v38 = vmax.f32 %v1348_v53, 0.0  ;;  %2554 = vmatmul.bf16.gmra.mxu2 %v6732_v26  ;;  %2603 = vmatmul.bf16.gmra.mxu3 %v6734_v30  ;;  %v5037_v53 = vor.u32 %v5543_v20, %v5034_v21 }
 0x1b5   : > { %v1405_v7 = vmax.f32 %v1252_v44, 0.0  ;;  %v5539_v44 = vld [vmem:[#allocation9 + $0x124] sm:$0xf] }
 0x1b6   : > { %v1448_v42 = vpack.c.bf16 %v1402_v38, %v1401_v28  ;;  %2683 = vmatpush.bf16.msrb.mxu1 %v5037_v53  ;;  %v5021_v54 = vor.u32 %v5539_v44, %v5018_v50 }
 0x1b7   : > { %v1300_v43 = vpop.f32.mrf.mxu2 }
 0x1b8   : > { %1480 = vst [vmem:[%s6450_s21 + $0x88] sm:$0xff] %v1448_v42  ;;  %v1301_v57 = vadd.f32 %v1300_v43, %v6674_v33  ;;  %v1349_v46 = vpop.f32.mrf.mxu3  ;;  %v1205_v48 = vpop.f32.mrf.mxu0  ;;  %v1699_v15 = vunpack.c.l.b16 %v1448_v42  ;;  %v1700_v16 = vunpack.c.h.b16 %v1448_v42  ;;  %v5507_v42 = vld [vmem:[#allocation9 + $0x24] sm:$0xf]  ;;  %v4890_v43 = vld [vmem:[#allocation9 + $0x30] sm:$0xf0] }
 0x1b9   : > { %v1254_v55 = vpop.f32.mrf.mxu1  ;;  %v1206_v3 = vadd.f32 %v1205_v48, %v6666_v12  ;;  %v4893_v48 = vor.u32 %v5507_v42, %v4890_v43 }
 0x1ba   : > { %v1350_v2 = vadd.f32 %v1349_v46, %v1301_v57  ;;  %2684 = vmatpush.bf16.msrb.mxu1 %v5021_v54 }
 0x1bb   : > { %2466 = vmatmul.bf16.gmra.mxu0 %v6646_v25  ;;  %v1255_v13 = vadd.f32 %v1254_v55, %v1206_v3 }
 0x1bc   : > { %v1406_v8 = vmax.f32 %v1350_v2, 0.0  ;;  %2515 = vmatmul.bf16.gmra.mxu1 %v6648_v51  ;;  %2635 = vmatpush.bf16.msrb.mxu0 %v4893_v48 }
 0x1bd   : > { %v1409_v38 = vmax.f32 %v1255_v13, 0.0 }
 0x1be   : > { %v1450_v19 = vpack.c.bf16 %v1406_v8, %v1405_v7  ;;  %v5146_v7 = vld [vmem:[#allocation9 + $0x230] sm:$0xf0]  ;;  %v4877_v8 = vor.u32 %v5503_v59, %v4874_v37 }
 0x1bf   : > { %v1303_v17 = vpop.f32.mrf.mxu2  ;;  %v5149_v13 = vor.u32 %v5571_v6, %v5146_v7 }
 0x1c0   : > { %1482 = vst [vmem:[%s6450_s21 + $0x98] sm:$0xff] %v1450_v19  ;;  %v1703_v22 = vunpack.c.l.b16 %v1450_v19  ;;  %v1704_v23 = vunpack.c.h.b16 %v1450_v19  ;;  %v1304_v24 = vadd.f32 %v1303_v17, %v6674_v33  ;;  %v1352_v52 = vpop.f32.mrf.mxu3  ;;  %v1207_v28 = vpop.f32.mrf.mxu0  ;;  %2636 = vmatpush.bf16.msrb.mxu0 %v4877_v8 }
 0x1c1   : > { %v1256_v32 = vpop.f32.mrf.mxu1  ;;  %v1208_v46 = vadd.f32 %v1207_v28, %v6666_v12  ;;  %2733 = vmatpush.bf16.msrb.mxu2 %v5149_v13 }
 0x1c2   : > { %v6746_v11 = vpack.c.b16 %v1703_v22, %v1699_v15  ;;  %v6748_v35 = vpack.c.b16 %v1704_v23, %v1700_v16  ;;  %v1353_v41 = vadd.f32 %v1352_v52, %v1304_v24  ;;  %v5603_v15 = vld [vmem:[#allocation9 + $0x324] sm:$0xf]  ;;  %v5274_v16 = vld [vmem:[#allocation9 + $0x330] sm:$0xf0] }
 0x1c3   : > { %v1257_v2 = vadd.f32 %v1256_v32, %v1208_v46  ;;  %v5277_v21 = vor.u32 %v5603_v15, %v5274_v16  ;;  %v5002_v22 = vld [vmem:[#allocation9 + $0x110] sm:$0xf0] }
 0x1c4   : > { %v1410_v57 = vmax.f32 %v1353_v41, 0.0  ;;  %2559 = vmatmul.bf16.gmra.mxu2 %v6746_v11  ;;  %2608 = vmatmul.bf16.gmra.mxu3 %v6748_v35  ;;  %v5005_v23 = vor.u32 %v5535_v1, %v5002_v22 }
 0x1c5   : > { %v1413_v24 = vmax.f32 %v1257_v2, 0.0  ;;  %2782 = vmatpush.bf16.msrb.mxu3 %v5277_v21  ;;  %v5130_v2 = vld [vmem:[#allocation9 + $0x210] sm:$0xf0] }
 0x1c6   : > { %v1452_v55 = vpack.c.bf16 %v1410_v57, %v1409_v38  ;;  %2685 = vmatpush.bf16.msrb.mxu1 %v5005_v23 }
 0x1c7   : > { %v1305_v58 = vpop.f32.mrf.mxu2 }
 0x1c8   : > { %1484 = vst [vmem:[%s6450_s21 + $0xa8] sm:$0xff] %v1452_v55  ;;  %v1306_v3 = vadd.f32 %v1305_v58, %v6674_v33  ;;  %v1354_v4 = vpop.f32.mrf.mxu3  ;;  %v1210_v61 = vpop.f32.mrf.mxu0  ;;  %v1707_v32 = vunpack.c.l.b16 %v1452_v55  ;;  %v1708_v41 = vunpack.c.h.b16 %v1452_v55  ;;  %v5567_v55 = vld [vmem:[#allocation9 + $0x204] sm:$0xf] }
 0x1c9   : > { %v1259_v19 = vpop.f32.mrf.mxu1  ;;  %v1211_v20 = vadd.f32 %v1210_v61, %v6666_v12  ;;  %v5258_v61 = vld [vmem:[#allocation9 + $0x310] sm:$0xf0] }
 0x1ca   : > { %v1355_v17 = vadd.f32 %v1354_v4, %v1306_v3  ;;  %v5133_v3 = vor.u32 %v5567_v55, %v5130_v2  ;;  %v5599_v4 = vld [vmem:[#allocation9 + $0x304] sm:$0xf]  ;;  %v5248_v2 = vld [vmem:[#allocation9 + $0x2e8] sm:$0xf] }
 0x1cb   : > { %2471 = vmatmul.bf16.gmra.mxu0 %v6660_v5  ;;  %v1260_v53 = vadd.f32 %v1259_v19, %v1211_v20  ;;  %v5261_v7 = vor.u32 %v5599_v4, %v5258_v61 }
 0x1cc   : > { %v1414_v52 = vmax.f32 %v1355_v17, 0.0  ;;  %2520 = vmatmul.bf16.gmra.mxu1 %v6662_v60  ;;  %2734 = vmatpush.bf16.msrb.mxu2 %v5133_v3  ;;  %v5598_v3 = vld [vmem:[#allocation9 + $0x2f4] sm:$0xf0] }
 0x1cd   : > { %v1417_v58 = vmax.f32 %v1260_v53, 0.0  ;;  %2783 = vmatpush.bf16.msrb.mxu3 %v5261_v7  ;;  %v5249_v61 = vor.u32 %v5598_v3, %v5248_v2  ;;  %v5534_v7 = vld [vmem:[#allocation9 + $0xf4] sm:$0xf0] }
 0x1ce   : > { %v1454_v28 = vpack.c.bf16 %v1414_v52, %v1413_v24 }
 0x1cf   : > { %v1308_v38 = vpop.f32.mrf.mxu2 }
 0x1d0   : > { %1486 = vst [vmem:[%s6450_s21 + $0xb8] sm:$0xff] %v1454_v28  ;;  %v1711_v42 = vunpack.c.l.b16 %v1454_v28  ;;  %v1712_v43 = vunpack.c.h.b16 %v1454_v28  ;;  %v1309_v44 = vadd.f32 %v1308_v38, %v6674_v33  ;;  %v1357_v57 = vpop.f32.mrf.mxu3  ;;  %v1212_v46 = vpop.f32.mrf.mxu0  ;;  %2923 = vmatpush.bf16.msra.mxu2 %v5249_v61 }
 0x1d1   : > { %v1261_v48 = vpop.f32.mrf.mxu1  ;;  %v1213_v1 = vadd.f32 %v1212_v46, %v6666_v12 }
 0x1d2   : > { %v6760_v50 = vpack.c.b16 %v1711_v42, %v1707_v32  ;;  %v6762_v54 = vpack.c.b16 %v1712_v43, %v1708_v41  ;;  %v1358_v59 = vadd.f32 %v1357_v57, %v1309_v44 }
 0x1d3   : > { %v1262_v19 = vadd.f32 %v1261_v48, %v1213_v1 }
 0x1d4   : > { %v1418_v37 = vmax.f32 %v1358_v59, 0.0  ;;  %2564 = vmatmul.bf16.gmra.mxu2 %v6760_v50  ;;  %2613 = vmatmul.bf16.gmra.mxu3 %v6762_v54 }
 0x1d5   : > { %v1421_v22 = vmax.f32 %v1262_v19, 0.0 }
 0x1d6   : > { %v1456_v6 = vpack.c.bf16 %v1418_v37, %v1417_v58  ;;  %v6781_v37 = vld [vmem:[%s7872_s4] sm:$0xf] }
 0x1d7   : > { %v1310_v8 = vpop.f32.mrf.mxu2  ;;  %v6787_v4 = vperm.slane %v6781_v37, 0 }
 0x1d8   : > { %1488 = vst [vmem:[%s6450_s21 + $0xc8] sm:$0xff] %v1456_v6  ;;  %v1311_v13 = vadd.f32 %v1310_v8, %v6674_v33  ;;  %v1359_v15 = vpop.f32.mrf.mxu3  ;;  %v1215_v16 = vpop.f32.mrf.mxu0  ;;  %v1715_v28 = vunpack.c.l.b16 %v1456_v6  ;;  %v1716_v32 = vunpack.c.h.b16 %v1456_v6  ;;  %v4992_v6 = vld [vmem:[#allocation9 + $0xe8] sm:$0xf] }
 0x1d9   : > { %v1264_v17 = vpop.f32.mrf.mxu1  ;;  %v1216_v21 = vadd.f32 %v1215_v16, %v6666_v12  ;;  %v4993_v19 = vor.u32 %v5534_v7, %v4992_v6  ;;  %v5232_v6 = vld [vmem:[#allocation9 + $0x2c8] sm:$0xf]  ;;  %v5594_v7 = vld [vmem:[#allocation9 + $0x2d4] sm:$0xf0] }
 0x1da   : > { %v1360_v20 = vadd.f32 %v1359_v15, %v1311_v13  ;;  %v5376_v13 = vld [vmem:[#allocation9 + $0x3e8] sm:$0xf]  ;;  %v5630_v15 = vld [vmem:[#allocation9 + $0x3f4] sm:$0xf0] }
 0x1db   : > { %2476 = vmatmul.bf16.gmra.mxu0 %v6678_v47  ;;  %v1265_v52 = vadd.f32 %v1264_v17, %v1216_v21 }
 0x1dc   : > { %v1422_v23 = vmax.f32 %v1360_v20, 0.0  ;;  %2525 = vmatmul.bf16.gmra.mxu1 %v6680_v62  ;;  %2825 = vmatpush.bf16.msra.mxu0 %v4993_v19  ;;  %v4976_v19 = vld [vmem:[#allocation9 + $0xc8] sm:$0xf] }
 0x1dd   : > { %v1425_v58 = vmax.f32 %v1265_v52, 0.0 }
 0x1de   : > { %v1458_v24 = vpack.c.bf16 %v1422_v23, %v1421_v22 }
 0x1df   : > { %v1313_v53 = vpop.f32.mrf.mxu2 }
 0x1e0   : > { %1490 = vst [vmem:[%s6450_s21 + $0xd8] sm:$0xff] %v1458_v24  ;;  %v1719_v38 = vunpack.c.l.b16 %v1458_v24  ;;  %v1720_v41 = vunpack.c.h.b16 %v1458_v24  ;;  %v1314_v42 = vadd.f32 %v1313_v53, %v6674_v33  ;;  %v1362_v43 = vpop.f32.mrf.mxu3  ;;  %v1217_v44 = vpop.f32.mrf.mxu0 }
 0x1e1   : > { %v1266_v57 = vpop.f32.mrf.mxu1  ;;  %v1218_v55 = vadd.f32 %v1217_v44, %v6666_v12  ;;  %v5377_v12 = vor.u32 %v5630_v15, %v5376_v13  ;;  %v5530_v13 = vld [vmem:[#allocation9 + $0xd4] sm:$0xf0]  ;;  %v5360_v15 = vld [vmem:[#allocation9 + $0x3c8] sm:$0xf] }
 0x1e2   : > { %v6774_v46 = vpack.c.b16 %v1719_v38, %v1715_v28  ;;  %v6776_v48 = vpack.c.b16 %v1720_v41, %v1716_v32  ;;  %v1363_v59 = vadd.f32 %v1362_v43, %v1314_v42  ;;  %v5120_v38 = vld [vmem:[#allocation9 + $0x1e8] sm:$0xf]  ;;  %v5566_v41 = vld [vmem:[#allocation9 + $0x1f4] sm:$0xf0] }
 0x1e3   : > { %v1267_v17 = vadd.f32 %v1266_v57, %v1218_v55  ;;  %2972 = vmatpush.bf16.msra.mxu3 %v5377_v12  ;;  %v4977_v12 = vor.u32 %v5530_v13, %v4976_v19 }
 0x1e4   : > { %v1426_v1 = vmax.f32 %v1363_v59, 0.0  ;;  %2569 = vmatmul.bf16.gmra.mxu2 %v6774_v46  ;;  %2618 = vmatmul.bf16.gmra.mxu3 %v6776_v48 }
 0x1e5   : > { %v1429_v53 = vmax.f32 %v1267_v17, 0.0  ;;  %2826 = vmatpush.bf16.msra.mxu0 %v4977_v12 }
 0x1e6   : > { %v1460_v8 = vpack.c.bf16 %v1426_v1, %v1425_v58 }
 0x1e7   : > { %v1315_v16 = vpop.f32.mrf.mxu2 }
 0x1e8   : > { %1492 = vst [vmem:[%s6450_s21 + $0xe8] sm:$0xff] %v1460_v8  ;;  %v1316_v20 = vadd.f32 %v1315_v16, %v6674_v33  ;;  %v2442_v21 = vpop.f32.mrf.mxu0  ;;  %v1364_v22 = vpop.f32.mrf.mxu3  ;;  %v5121_v33 = vor.u32 %v5566_v41, %v5120_v38  ;;  %v1723_v43 = vunpack.c.l.b16 %v1460_v8  ;;  %v1724_v44 = vunpack.c.h.b16 %v1460_v8  ;;  %v5626_v16 = vld [vmem:[#allocation9 + $0x3d4] sm:$0xf0] }
 0x1e9   : > { %v2443_v23 = vadd.f32 %v2442_v21, %v6787_v4  ;;  %v2491_v24 = vpop.f32.mrf.mxu1  ;;  %v5233_v8 = vor.u32 %v5594_v7, %v5232_v6  ;;  %v5361_v17 = vor.u32 %v5626_v16, %v5360_v15 }
 0x1ea   : > { %v1365_v52 = vadd.f32 %v1364_v22, %v1316_v20  ;;  %2874 = vmatpush.bf16.msra.mxu1 %v5121_v33 }
 0x1eb   : > { %v6792_v28 = vadd.f32 %v2491_v24, %v2443_v23  ;;  %2637 = vmatmul.bf16.vlgmr.msrb.gmra.mxu0 %v6576_v9  ;;  %2924 = vmatpush.bf16.msra.mxu2 %v5233_v8  ;;  %v5104_v24 = vld [vmem:[#allocation9 + $0x1c8] sm:$0xf] }
 0x1ec   : > { %v1430_v32 = vmax.f32 %v1365_v52, 0.0  ;;  %2686 = vmatmul.bf16.vlgmr.msrb.gmra.mxu1 %v6578_v18  ;;  %2973 = vmatpush.bf16.msra.mxu3 %v5361_v17  ;;  %v5562_v52 = vld [vmem:[#allocation9 + $0x1d4] sm:$0xf0] }
 0x1ee   : > { %v1462_v42 = vpack.c.bf16 %v1430_v32, %v1429_v53  ;;  %v5105_v53 = vor.u32 %v5562_v52, %v5104_v24 }
 0x1f0   : > { %1494 = vst [vmem:[%s6450_s21 + $0xf8] sm:$0xff] %v1462_v42  ;;  %v1727_v57 = vunpack.c.l.b16 %v1462_v42  ;;  %v1728_v58 = vunpack.c.h.b16 %v1462_v42  ;;  %v2444_v59 = vpop.f32.mrf.mxu0  ;;  %2875 = vmatpush.bf16.msra.mxu1 %v5105_v53  ;;  %v5216_v42 = vld [vmem:[#allocation9 + $0x2a8] sm:$0xf] }
 0x1f1   : > { %v2445_v1 = vadd.f32 %v2444_v59, %v6787_v4  ;;  %v2493_v55 = vpop.f32.mrf.mxu1  ;;  %v5344_v59 = vld [vmem:[#allocation9 + $0x3a8] sm:$0xf] }
 0x1f2   : > { %v6798_v2 = vpack.c.b16 %v1727_v57, %v1723_v43  ;;  %v6800_v3 = vpack.c.b16 %v1728_v58, %v1724_v44  ;;  %v5590_v43 = vld [vmem:[#allocation9 + $0x2b4] sm:$0xf0]  ;;  %v4960_v44 = vld [vmem:[#allocation9 + $0xa8] sm:$0xf] }
 0x1f3   : > { %v2494_v61 = vadd.f32 %v2493_v55, %v2445_v1  ;;  %v5217_v57 = vor.u32 %v5590_v43, %v5216_v42  ;;  %v5526_v58 = vld [vmem:[#allocation9 + $0xb4] sm:$0xf0]  ;;  %v5200_v43 = vld [vmem:[#allocation9 + $0x288] sm:$0xf] }
 0x1f4   : > { %2574 = vmatmul.bf16.gmra.mxu2 %v6798_v2  ;;  %2623 = vmatmul.bf16.gmra.mxu3 %v6800_v3  ;;  %v5622_v1 = vld [vmem:[#allocation9 + $0x3b4] sm:$0xf0]  ;;  %v4961_v55 = vor.u32 %v5526_v58, %v4960_v44 }
 0x1f5   : > { %v5345_v6 = vor.u32 %v5622_v1, %v5344_v59  ;;  %2925 = vmatpush.bf16.msra.mxu2 %v5217_v57  ;;  %v5586_v44 = vld [vmem:[#allocation9 + $0x294] sm:$0xf0]  ;;  %v4944_v57 = vld [vmem:[#allocation9 + $0x88] sm:$0xf] }
 0x1f6   : > { %2827 = vmatpush.bf16.msra.mxu0 %v4961_v55  ;;  %v5201_v58 = vor.u32 %v5586_v44, %v5200_v43  ;;  %v5522_v59 = vld [vmem:[#allocation9 + $0x94] sm:$0xf0]  ;;  %v5328_v1 = vld [vmem:[#allocation9 + $0x388] sm:$0xf] }
 0x1f7   : > { %2974 = vmatpush.bf16.msra.mxu3 %v5345_v6  ;;  %v5618_v55 = vld [vmem:[#allocation9 + $0x394] sm:$0xf0]  ;;  %v5056_v44 = vld [vmem:[#allocation9 + $0x168] sm:$0xf] }
 0x1f8   : > { %v2447_v20 = vpop.f32.mrf.mxu0  ;;  %v5329_v6 = vor.u32 %v5618_v55, %v5328_v1  ;;  %v5518_v43 = vld [vmem:[#allocation9 + $0x74] sm:$0xf0] }
 0x1f9   : > { %v2448_v21 = vadd.f32 %v2447_v20, %v6787_v4  ;;  %v2496_v22 = vpop.f32.mrf.mxu1  ;;  %v5088_v20 = vld [vmem:[#allocation9 + $0x1a8] sm:$0xf]  ;;  %2926 = vmatpush.bf16.msra.mxu2 %v5201_v58  ;;  %v5550_v1 = vld [vmem:[#allocation9 + $0x174] sm:$0xf0] }
 0x1fb   : > { %v2497_v23 = vadd.f32 %v2496_v22, %v2448_v21  ;;  %2642 = vmatmul.bf16.gmra.mxu0 %v6590_v0  ;;  %v5558_v21 = vld [vmem:[#allocation9 + $0x1b4] sm:$0xf0]  ;;  %2975 = vmatpush.bf16.msra.mxu3 %v5329_v6 }
 0x1fc   : > { %2691 = vmatmul.bf16.gmra.mxu1 %v6592_v36  ;;  %v5089_v22 = vor.u32 %v5558_v21, %v5088_v20 }
 0x1fe   : > { %2876 = vmatpush.bf16.msra.mxu1 %v5089_v22  ;;  %v5072_v22 = vld [vmem:[#allocation9 + $0x188] sm:$0xf] }
 0x200   : > { %v2449_v32 = vpop.f32.mrf.mxu0 }
 0x201   : > { %v2450_v38 = vadd.f32 %v2449_v32, %v6787_v4  ;;  %v2498_v41 = vpop.f32.mrf.mxu1 }
 0x203   : > { %v6808_v33 = vadd.f32 %v2498_v41, %v2450_v38 }
 0x204   : > { %2735 = vmatmul.bf16.vlgmr.msrb.gmra.mxu2 %v6690_v39  ;;  %2784 = vmatmul.bf16.vlgmr.msrb.gmra.mxu3 %v6692_v40 }
 0x207   : > { %v2540_v7 = vpop.f32.mrf.mxu2  ;;  %v2589_v19 = vpop.f32.mrf.mxu3 }
 0x208   : > { %v2541_v8 = vadd.f32 %v2540_v7, %v6792_v28  ;;  %v2452_v13 = vpop.f32.mrf.mxu0 }
 0x209   : > { %v2453_v15 = vadd.f32 %v2452_v13, %v6787_v4  ;;  %v2501_v16 = vpop.f32.mrf.mxu1 }
 0x20a   : > { %v6814_v12 = vadd.f32 %v2589_v19, %v2541_v8 }
 0x20b   : > { %v6816_v17 = vadd.f32 %v2501_v16, %v2453_v15  ;;  %2647 = vmatmul.bf16.gmra.mxu0 %v6604_v45 }
 0x20c   : > { %2696 = vmatmul.bf16.gmra.mxu1 %v6606_v56 }
 0x20f   : > { %v2542_v24 = vpop.f32.mrf.mxu2  ;;  %v2591_v52 = vpop.f32.mrf.mxu3 }
 0x210   : > { %v2543_v28 = vadd.f32 %v2542_v24, %v2494_v61  ;;  %v2454_v53 = vpop.f32.mrf.mxu0  ;;  %v4945_v61 = vor.u32 %v5522_v59, %v4944_v57  ;;  %v5554_v24 = vld [vmem:[#allocation9 + $0x194] sm:$0xf0] }
 0x211   : > { %v2455_v32 = vadd.f32 %v2454_v53, %v6787_v4  ;;  %v2503_v38 = vpop.f32.mrf.mxu1 }
 0x212   : > { %v6821_v41 = vadd.f32 %v2591_v52, %v2543_v28  ;;  %2828 = vmatpush.bf16.msra.mxu0 %v4945_v61  ;;  %v5073_v52 = vor.u32 %v5554_v24, %v5072_v22  ;;  %v5057_v61 = vor.u32 %v5550_v1, %v5056_v44  ;;  %v4896_v44 = vld [vmem:[#allocation9 + $0x28] sm:$0xf] }
 0x213   : > { %v6823_v42 = vadd.f32 %v2503_v38, %v2455_v32  ;;  %v4928_v38 = vld [vmem:[#allocation9 + $0x68] sm:$0xf] }
 0x214   : > { %2740 = vmatmul.bf16.gmra.mxu2 %v6704_v29  ;;  %2789 = vmatmul.bf16.gmra.mxu3 %v6706_v14  ;;  %v4929_v59 = vor.u32 %v5518_v43, %v4928_v38 }
 0x215   : > { %2877 = vmatpush.bf16.msra.mxu1 %v5073_v52  ;;  %v5312_v52 = vld [vmem:[#allocation9 + $0x368] sm:$0xf] }
 0x216   : > { %2829 = vmatpush.bf16.msra.mxu0 %v4929_v59 }
 0x217   : > { %v2545_v7 = vpop.f32.mrf.mxu2  ;;  %v2594_v19 = vpop.f32.mrf.mxu3 }
 0x218   : > { %v2546_v8 = vadd.f32 %v2545_v7, %v2497_v23  ;;  %v2457_v13 = vpop.f32.mrf.mxu0  ;;  %v5582_v7 = vld [vmem:[#allocation9 + $0x274] sm:$0xf0] }
 0x219   : > { %v2458_v15 = vadd.f32 %v2457_v13, %v6787_v4  ;;  %v2506_v16 = vpop.f32.mrf.mxu1  ;;  %2878 = vmatpush.bf16.msra.mxu1 %v5057_v61  ;;  %v5514_v13 = vld [vmem:[#allocation9 + $0x54] sm:$0xf0] }
 0x21a   : > { %v6828_v20 = vadd.f32 %v2594_v19, %v2546_v8  ;;  %v4912_v19 = vld [vmem:[#allocation9 + $0x48] sm:$0xf] }
 0x21b   : > { %v6830_v21 = vadd.f32 %v2506_v16, %v2458_v15  ;;  %2652 = vmatmul.bf16.gmra.mxu0 %v6618_v34  ;;  %v5040_v15 = vld [vmem:[#allocation9 + $0x148] sm:$0xf]  ;;  %v5546_v16 = vld [vmem:[#allocation9 + $0x154] sm:$0xf0]  ;;  %v4913_v22 = vor.u32 %v5514_v13, %v4912_v19 }
 0x21c   : > { %2701 = vmatmul.bf16.gmra.mxu1 %v6620_v10  ;;  %v5041_v24 = vor.u32 %v5546_v16, %v5040_v15  ;;  %v5008_v15 = vld [vmem:[#allocation9 + $0x108] sm:$0xf] }
 0x21d   : > { %2830 = vmatpush.bf16.msra.mxu0 %v4913_v22  ;;  %v5538_v22 = vld [vmem:[#allocation9 + $0x114] sm:$0xf0] }
 0x21e   : > { %2879 = vmatpush.bf16.msra.mxu1 %v5041_v24  ;;  %v5532_v24 = vld [vmem:[#allocation9 + $0xec] sm:$0xf] }
 0x21f   : > { %v2547_v28 = vpop.f32.mrf.mxu2  ;;  %v2596_v53 = vpop.f32.mrf.mxu3 }
 0x220   : > { %v2548_v23 = vadd.f32 %v2547_v28, %v6808_v33  ;;  %v2459_v32 = vpop.f32.mrf.mxu0  ;;  %v5184_v33 = vld [vmem:[#allocation9 + $0x268] sm:$0xf]  ;;  %v5614_v28 = vld [vmem:[#allocation9 + $0x374] sm:$0xf0] }
 0x221   : > { %v2460_v57 = vadd.f32 %v2459_v32, %v6787_v4  ;;  %v2508_v58 = vpop.f32.mrf.mxu1  ;;  %v5185_v8 = vor.u32 %v5582_v7, %v5184_v33  ;;  %v5313_v32 = vor.u32 %v5614_v28, %v5312_v52  ;;  %v5542_v33 = vld [vmem:[#allocation9 + $0x134] sm:$0xf0]  ;;  %v4994_v52 = vld [vmem:[#allocation9 + $0xf8] sm:$0xf0]  ;;  %v5009_v28 = vor.u32 %v5538_v22, %v5008_v15 }
 0x222   : > { %v6836_v55 = vadd.f32 %v2596_v53, %v2548_v23  ;;  %v5106_v15 = vld [vmem:[#allocation9 + $0x1d8] sm:$0xf0] }
 0x223   : > { %v6838_v6 = vadd.f32 %v2508_v58, %v2460_v57  ;;  %2927 = vmatpush.bf16.msra.mxu2 %v5185_v8  ;;  %v5510_v57 = vld [vmem:[#allocation9 + $0x34] sm:$0xf0]  ;;  %v5024_v58 = vld [vmem:[#allocation9 + $0x128] sm:$0xf]  ;;  %2976 = vmatpush.bf16.msra.mxu3 %v5313_v32  ;;  %v5122_v32 = vld [vmem:[#allocation9 + $0x1f8] sm:$0xf0] }
 0x224   : > { %7873 = vst [vmem:[#allocation29_spill] sm:$0xff] %v6836_v55  ;;  %2745 = vmatmul.bf16.gmra.mxu2 %v6718_v27  ;;  %2794 = vmatmul.bf16.gmra.mxu3 %v6720_v63  ;;  %v4897_v61 = vor.u32 %v5510_v57, %v4896_v44  ;;  %v5025_v19 = vor.u32 %v5542_v33, %v5024_v58  ;;  %v5506_v8 = vld [vmem:[#allocation9 + $0x14] sm:$0xf0]  ;;  %v4978_v33 = vld [vmem:[#allocation9 + $0xd8] sm:$0xf0] }
 0x226   : > { %2831 = vmatpush.bf16.msra.mxu0 %v4897_v61  ;;  %2880 = vmatpush.bf16.msra.mxu1 %v5025_v19  ;;  %v5528_v61 = vld [vmem:[#allocation9 + $0xcc] sm:$0xf] }
 0x227   : > { %v2550_v53 = vpop.f32.mrf.mxu2  ;;  %v2599_v23 = vpop.f32.mrf.mxu3  ;;  %v5560_v19 = vld [vmem:[#allocation9 + $0x1cc] sm:$0xf] }
 0x228   : > { %v2551_v38 = vadd.f32 %v2550_v53, %v6816_v17  ;;  %v2462_v43 = vpop.f32.mrf.mxu0  ;;  %v4880_v17 = vld [vmem:[#allocation9 + $0x8] sm:$0xf]  ;;  %v4997_v53 = vor.u32 %v5532_v24, %v4994_v52  ;;  %v5109_v24 = vor.u32 %v5560_v19, %v5106_v15  ;;  %v5520_v15 = vld [vmem:[#allocation9 + $0x8c] sm:$0xf] }
 0x229   : > { %v2463_v59 = vadd.f32 %v2462_v43, %v6787_v4  ;;  %v2511_v1 = vpop.f32.mrf.mxu1  ;;  %v4881_v16 = vor.u32 %v5506_v8, %v4880_v17  ;;  %v4981_v8 = vor.u32 %v5528_v61, %v4978_v33  ;;  %v5296_v52 = vld [vmem:[#allocation9 + $0x348] sm:$0xf] }
 0x22a   : > { %v6844_v7 = vadd.f32 %v2599_v23, %v2551_v38  ;;  %v5564_v23 = vld [vmem:[#allocation9 + $0x1ec] sm:$0xf]  ;;  %2881 = vmatpush.bf16.msra.mxu1 %v5009_v28 }
 0x22b   : > { %v6846_v13 = vadd.f32 %v2511_v1, %v2463_v59  ;;  %2657 = vmatmul.bf16.gmra.mxu0 %v6632_v49  ;;  %v5125_v44 = vor.u32 %v5564_v23, %v5122_v32  ;;  %v5524_v23 = vld [vmem:[#allocation9 + $0xac] sm:$0xf]  ;;  %v4962_v32 = vld [vmem:[#allocation9 + $0xb8] sm:$0xf0] }
 0x22c   : > { %7874 = vst [vmem:[#allocation30_spill] sm:$0xff] %v6844_v7  ;;  %2706 = vmatmul.bf16.gmra.mxu1 %v6634_v31  ;;  %2832 = vmatpush.bf16.msra.mxu0 %v4881_v16  ;;  %v5578_v16 = vld [vmem:[#allocation9 + $0x254] sm:$0xf0] }
 0x22e   : > { %3070 = vmatpush.bf16.msrb.mxu1 %v5125_v44  ;;  %v5556_v44 = vld [vmem:[#allocation9 + $0x1ac] sm:$0xf] }
 0x22f   : > { %v2552_v38 = vpop.f32.mrf.mxu2  ;;  %v2601_v43 = vpop.f32.mrf.mxu3 }
 0x230   : > { %v2553_v57 = vadd.f32 %v2552_v38, %v6823_v42  ;;  %v2464_v58 = vpop.f32.mrf.mxu0  ;;  %3021 = vmatpush.bf16.msrb.mxu0 %v4997_v53  ;;  %v5168_v42 = vld [vmem:[#allocation9 + $0x248] sm:$0xf]  ;;  %v5610_v53 = vld [vmem:[#allocation9 + $0x354] sm:$0xf0] }
 0x231   : > { %v2465_v59 = vadd.f32 %v2464_v58, %v6787_v4  ;;  %v2513_v1 = vpop.f32.mrf.mxu1  ;;  %v5169_v28 = vor.u32 %v5578_v16, %v5168_v42  ;;  %v5297_v38 = vor.u32 %v5610_v53, %v5296_v52  ;;  %v4946_v42 = vld [vmem:[#allocation9 + $0x98] sm:$0xf0]  ;;  %v5552_v16 = vld [vmem:[#allocation9 + $0x18c] sm:$0xf] }
 0x232   : > { %v6852_v17 = vadd.f32 %v2601_v43, %v2553_v57  ;;  %3071 = vmatpush.bf16.msrb.mxu1 %v5109_v24  ;;  %v4965_v43 = vor.u32 %v5524_v23, %v4962_v32  ;;  %v5090_v57 = vld [vmem:[#allocation9 + $0x1b8] sm:$0xf0]  ;;  %v4949_v52 = vor.u32 %v5520_v15, %v4946_v42 }
 0x233   : > { %v6854_v22 = vadd.f32 %v2513_v1, %v2465_v59  ;;  %2928 = vmatpush.bf16.msra.mxu2 %v5169_v28  ;;  %v5093_v1 = vor.u32 %v5556_v44, %v5090_v57  ;;  %2977 = vmatpush.bf16.msra.mxu3 %v5297_v38  ;;  %v5074_v53 = vld [vmem:[#allocation9 + $0x198] sm:$0xf0]  ;;  %v5548_v38 = vld [vmem:[#allocation9 + $0x16c] sm:$0xf] }
 0x234   : > { %7875 = vst [vmem:[#allocation31_spill] sm:$0xff] %v6852_v17  ;;  %2750 = vmatmul.bf16.gmra.mxu2 %v6732_v26  ;;  %2799 = vmatmul.bf16.gmra.mxu3 %v6734_v30  ;;  %v5077_v28 = vor.u32 %v5552_v16, %v5074_v53  ;;  %v4930_v32 = vld [vmem:[#allocation9 + $0x78] sm:$0xf0]  ;;  %v5512_v53 = vld [vmem:[#allocation9 + $0x4c] sm:$0xf] }
 0x235   : > { %3022 = vmatpush.bf16.msrb.mxu0 %v4981_v8  ;;  %v5058_v44 = vld [vmem:[#allocation9 + $0x178] sm:$0xf0] }
 0x236   : > { %3072 = vmatpush.bf16.msrb.mxu1 %v5093_v1  ;;  %v5378_v17 = vld [vmem:[#allocation9 + $0x3f8] sm:$0xf0] }
 0x237   : > { %v2555_v58 = vpop.f32.mrf.mxu2  ;;  %v2604_v59 = vpop.f32.mrf.mxu3 }
 0x238   : > { %v2556_v61 = vadd.f32 %v2555_v58, %v6830_v21  ;;  %v2467_v33 = vpop.f32.mrf.mxu0  ;;  %v5516_v21 = vld [vmem:[#allocation9 + $0x6c] sm:$0xf] }
 0x239   : > { %v2468_v19 = vadd.f32 %v2467_v33, %v6787_v4  ;;  %v2516_v8 = vpop.f32.mrf.mxu1  ;;  %3023 = vmatpush.bf16.msrb.mxu0 %v4965_v43  ;;  %v4933_v43 = vor.u32 %v5516_v21, %v4930_v32  ;;  %v5152_v33 = vld [vmem:[#allocation9 + $0x228] sm:$0xf] }
 0x23a   : > { %v6860_v24 = vadd.f32 %v2604_v59, %v2556_v61  ;;  %3073 = vmatpush.bf16.msrb.mxu1 %v5077_v28  ;;  %v5061_v59 = vor.u32 %v5548_v38, %v5058_v44  ;;  %v5544_v38 = vld [vmem:[#allocation9 + $0x14c] sm:$0xf]  ;;  %v5042_v44 = vld [vmem:[#allocation9 + $0x158] sm:$0xf0] }
 0x23b   : > { %v6862_v23 = vadd.f32 %v2516_v8, %v2468_v19  ;;  %2662 = vmatmul.bf16.gmra.mxu0 %v6646_v25  ;;  %v5574_v19 = vld [vmem:[#allocation9 + $0x234] sm:$0xf0]  ;;  %v5280_v8 = vld [vmem:[#allocation9 + $0x328] sm:$0xf] }
 0x23c   : > { %7876 = vst [vmem:[#allocation32_spill] sm:$0xff] %v6860_v24  ;;  %2711 = vmatmul.bf16.gmra.mxu1 %v6648_v51  ;;  %v5153_v16 = vor.u32 %v5574_v19, %v5152_v33  ;;  %v4914_v24 = vld [vmem:[#allocation9 + $0x58] sm:$0xf0]  ;;  %v5264_v33 = vld [vmem:[#allocation9 + $0x308] sm:$0xf] }
 0x23d   : > { %3024 = vmatpush.bf16.msrb.mxu0 %v4949_v52  ;;  %v5606_v52 = vld [vmem:[#allocation9 + $0x334] sm:$0xf0]  ;;  %v4917_v32 = vor.u32 %v5512_v53, %v4914_v24  ;;  %v4898_v19 = vld [vmem:[#allocation9 + $0x38] sm:$0xf0] }
 0x23e   : > { %3074 = vmatpush.bf16.msrb.mxu1 %v5061_v59  ;;  %v5281_v21 = vor.u32 %v5606_v52, %v5280_v8  ;;  %2929 = vmatpush.bf16.msra.mxu2 %v5153_v16  ;;  %v5508_v59 = vld [vmem:[#allocation9 + $0x2c] sm:$0xf] }
 0x23f   : > { %v2557_v57 = vpop.f32.mrf.mxu2  ;;  %v2606_v58 = vpop.f32.mrf.mxu3  ;;  %v4901_v8 = vor.u32 %v5508_v59, %v4898_v19  ;;  %v5596_v16 = vld [vmem:[#allocation9 + $0x2ec] sm:$0xf] }
 0x240   : > { %v2558_v1 = vadd.f32 %v2557_v57, %v6838_v6  ;;  %v2469_v61 = vpop.f32.mrf.mxu0  ;;  %v5045_v57 = vor.u32 %v5544_v38, %v5042_v44  ;;  %2978 = vmatpush.bf16.msra.mxu3 %v5281_v21  ;;  %v5250_v44 = vld [vmem:[#allocation9 + $0x2f8] sm:$0xf0]  ;;  %v5536_v19 = vld [vmem:[#allocation9 + $0x10c] sm:$0xf] }
 0x241   : > { %v2470_v15 = vadd.f32 %v2469_v61, %v6787_v4  ;;  %v2518_v42 = vpop.f32.mrf.mxu1  ;;  %3025 = vmatpush.bf16.msrb.mxu0 %v4933_v43  ;;  %v5136_v43 = vld [vmem:[#allocation9 + $0x208] sm:$0xf]  ;;  %v5570_v61 = vld [vmem:[#allocation9 + $0x214] sm:$0xf0] }
 0x242   : > { %v6868_v28 = vadd.f32 %v2606_v58, %v2558_v1  ;;  %v5137_v58 = vor.u32 %v5570_v61, %v5136_v43  ;;  %v5602_v1 = vld [vmem:[#allocation9 + $0x314] sm:$0xf0]  ;;  %3075 = vmatpush.bf16.msrb.mxu1 %v5045_v57  ;;  %v5253_v43 = vor.u32 %v5596_v16, %v5250_v44 }
 0x243   : > { %v6870_v6 = vadd.f32 %v2518_v42, %v2470_v15  ;;  %v5265_v24 = vor.u32 %v5602_v1, %v5264_v33  ;;  %v5540_v15 = vld [vmem:[#allocation9 + $0x12c] sm:$0xf]  ;;  %v5026_v42 = vld [vmem:[#allocation9 + $0x138] sm:$0xf0] }
 0x244   : > { %7877 = vst [vmem:[#allocation33_spill] sm:$0xff] %v6868_v28  ;;  %2755 = vmatmul.bf16.gmra.mxu2 %v6746_v11  ;;  %2804 = vmatmul.bf16.gmra.mxu3 %v6748_v35  ;;  %v5029_v38 = vor.u32 %v5540_v15, %v5026_v42  ;;  %v5628_v28 = vld [vmem:[#allocation9 + $0x3ec] sm:$0xf]  ;;  %v4882_v1 = vld [vmem:[#allocation9 + $0x18] sm:$0xf0] }
 0x245   : > { %3026 = vmatpush.bf16.msrb.mxu0 %v4917_v32  ;;  %2930 = vmatpush.bf16.msra.mxu2 %v5137_v58  ;;  %v5381_v61 = vor.u32 %v5628_v28, %v5378_v17  ;;  %v5504_v33 = vld [vmem:[#allocation9 + $0xc] sm:$0xf]  ;;  %v5010_v15 = vld [vmem:[#allocation9 + $0x118] sm:$0xf0] }
 0x246   : > { %2979 = vmatpush.bf16.msra.mxu3 %v5265_v24  ;;  %3076 = vmatpush.bf16.msrb.mxu1 %v5029_v38  ;;  %v4885_v58 = vor.u32 %v5504_v33, %v4882_v1  ;;  %v5592_v42 = vld [vmem:[#allocation9 + $0x2cc] sm:$0xf]  ;;  %v5234_v17 = vld [vmem:[#allocation9 + $0x2d8] sm:$0xf0] }
 0x247   : > { %v2560_v52 = vpop.f32.mrf.mxu2  ;;  %v2609_v53 = vpop.f32.mrf.mxu3  ;;  %v5624_v28 = vld [vmem:[#allocation9 + $0x3cc] sm:$0xf]  ;;  %v5362_v24 = vld [vmem:[#allocation9 + $0x3d8] sm:$0xf0] }
 0x248   : > { %v2561_v21 = vadd.f32 %v2560_v52, %v6846_v13  ;;  %v2472_v32 = vpop.f32.mrf.mxu0  ;;  %v5013_v13 = vor.u32 %v5536_v19, %v5010_v15  ;;  %v5365_v16 = vor.u32 %v5624_v28, %v5362_v24  ;;  %v5588_v52 = vld [vmem:[#allocation9 + $0x2ac] sm:$0xf]  ;;  %v5202_v15 = vld [vmem:[#allocation9 + $0x298] sm:$0xf0] }
 0x249   : > { %v2473_v7 = vadd.f32 %v2472_v32, %v6787_v4  ;;  %v2521_v57 = vpop.f32.mrf.mxu1  ;;  %3027 = vmatpush.bf16.msrb.mxu0 %v4901_v8  ;;  %3119 = vmatpush.bf16.msrb.mxu2 %v5253_v43  ;;  %v5237_v8 = vor.u32 %v5592_v42, %v5234_v17  ;;  %v5620_v38 = vld [vmem:[#allocation9 + $0x3ac] sm:$0xf]  ;;  %v5330_v17 = vld [vmem:[#allocation9 + $0x398] sm:$0xf0] }
 0x24a   : > { %v6876_v59 = vadd.f32 %v2609_v53, %v2561_v21  ;;  %3168 = vmatpush.bf16.msrb.mxu3 %v5381_v61  ;;  %v5218_v53 = vld [vmem:[#allocation9 + $0x2b8] sm:$0xf0]  ;;  %3077 = vmatpush.bf16.msrb.mxu1 %v5013_v13  ;;  %v5584_v19 = vld [vmem:[#allocation9 + $0x28c] sm:$0xf] }
 0x24b   : > { %v6878_v55 = vadd.f32 %v2521_v57, %v2473_v7  ;;  %2667 = vmatmul.bf16.gmra.mxu0 %v6660_v5  ;;  %v5221_v44 = vor.u32 %v5588_v52, %v5218_v53  ;;  %v5346_v7 = vld [vmem:[#allocation9 + $0x3b8] sm:$0xf0]  ;;  %v5205_v13 = vor.u32 %v5584_v19, %v5202_v15 }
 0x24c   : > { %2716 = vmatmul.bf16.gmra.mxu1 %v6662_v60  ;;  %v5349_v43 = vor.u32 %v5620_v38, %v5346_v7  ;;  %v5314_v53 = vld [vmem:[#allocation9 + $0x378] sm:$0xf0] }
 0x24d   : > { %3028 = vmatpush.bf16.msrb.mxu0 %v4885_v58  ;;  %3120 = vmatpush.bf16.msrb.mxu2 %v5237_v8  ;;  %v5616_v58 = vld [vmem:[#allocation9 + $0x38c] sm:$0xf]  ;;  %v5186_v8 = vld [vmem:[#allocation9 + $0x278] sm:$0xf0] }
 0x24e   : > { %3169 = vmatpush.bf16.msrb.mxu3 %v5365_v16  ;;  %v5333_v24 = vor.u32 %v5616_v58, %v5330_v17  ;;  %v5612_v16 = vld [vmem:[#allocation9 + $0x36c] sm:$0xf]  ;;  %v5298_v58 = vld [vmem:[#allocation9 + $0x358] sm:$0xf0] }
 0x24f   : > { %v2562_v21 = vpop.f32.mrf.mxu2  ;;  %v2611_v32 = vpop.f32.mrf.mxu3 }
 0x250   : > { %v2563_v61 = vadd.f32 %v2562_v21, %v6854_v22  ;;  %v2474_v57 = vpop.f32.mrf.mxu0  ;;  %v5580_v22 = vld [vmem:[#allocation9 + $0x26c] sm:$0xf] }
 0x251   : > { %v2475_v33 = vadd.f32 %v2474_v57, %v6787_v4  ;;  %v2523_v1 = vpop.f32.mrf.mxu1  ;;  %3121 = vmatpush.bf16.msrb.mxu2 %v5221_v44  ;;  %v5189_v52 = vor.u32 %v5580_v22, %v5186_v8  ;;  %v5317_v44 = vor.u32 %v5612_v16, %v5314_v53  ;;  %v5576_v57 = vld [vmem:[#allocation9 + $0x24c] sm:$0xf]  ;;  %v5282_v16 = vld [vmem:[#allocation9 + $0x338] sm:$0xf0] }
 0x252   : > { %v6884_v42 = vadd.f32 %v2611_v32, %v2563_v61  ;;  %3170 = vmatpush.bf16.msrb.mxu3 %v5349_v43  ;;  %v5604_v22 = vld [vmem:[#allocation9 + $0x32c] sm:$0xf] }
 0x253   : > { %v6886_v28 = vadd.f32 %v2523_v1, %v2475_v33  ;;  %v5170_v33 = vld [vmem:[#allocation9 + $0x258] sm:$0xf0]  ;;  %v5608_v1 = vld [vmem:[#allocation9 + $0x34c] sm:$0xf] }
 0x254   : > { %7878 = vst [vmem:[#allocation34_spill] sm:$0xff] %v6884_v42  ;;  %2760 = vmatmul.bf16.gmra.mxu2 %v6760_v50  ;;  %2809 = vmatmul.bf16.gmra.mxu3 %v6762_v54  ;;  %v5173_v15 = vor.u32 %v5576_v57, %v5170_v33  ;;  %v5301_v17 = vor.u32 %v5608_v1, %v5298_v58  ;;  %v5600_v57 = vld [vmem:[#allocation9 + $0x30c] sm:$0xf] }
 0x255   : > { %3122 = vmatpush.bf16.msrb.mxu2 %v5205_v13 }
 0x256   : > { %3171 = vmatpush.bf16.msrb.mxu3 %v5333_v24  ;;  %v5154_v24 = vld [vmem:[#allocation9 + $0x238] sm:$0xf0] }
 0x257   : > { %v2565_v38 = vpop.f32.mrf.mxu2  ;;  %v2614_v7 = vpop.f32.mrf.mxu3 }
 0x258   : > { %v2566_v21 = vadd.f32 %v2565_v38, %v6862_v23  ;;  %v2477_v32 = vpop.f32.mrf.mxu0  ;;  %v5572_v23 = vld [vmem:[#allocation9 + $0x22c] sm:$0xf] }
 0x259   : > { %v2478_v43 = vadd.f32 %v2477_v32, %v6787_v4  ;;  %v2526_v61 = vpop.f32.mrf.mxu1  ;;  %3123 = vmatpush.bf16.msrb.mxu2 %v5189_v52  ;;  %v5157_v8 = vor.u32 %v5572_v23, %v5154_v24 }
 0x25a   : > { %v6892_v19 = vadd.f32 %v2614_v7, %v2566_v21  ;;  %3172 = vmatpush.bf16.msrb.mxu3 %v5317_v44  ;;  %v5285_v7 = vor.u32 %v5604_v22, %v5282_v16  ;;  %v5568_v44 = vld [vmem:[#allocation9 + $0x20c] sm:$0xf] }
 0x25b   : > { %v2527_v13 = vadd.f32 %v2526_v61, %v2478_v43  ;;  %2672 = vmatmul.bf16.gmra.mxu0 %v6678_v47  ;;  %v5138_v61 = vld [vmem:[#allocation9 + $0x218] sm:$0xf0] }
 0x25c   : > { %2721 = vmatmul.bf16.gmra.mxu1 %v6680_v62  ;;  %v5141_v1 = vor.u32 %v5568_v44, %v5138_v61 }
 0x25d   : > { %3124 = vmatpush.bf16.msrb.mxu2 %v5173_v15  ;;  %v5266_v15 = vld [vmem:[#allocation9 + $0x318] sm:$0xf0] }
 0x25e   : > { %3173 = vmatpush.bf16.msrb.mxu3 %v5301_v17  ;;  %v5269_v23 = vor.u32 %v5600_v57, %v5266_v15 }
 0x25f   : > { %v2567_v53 = vpop.f32.mrf.mxu2  ;;  %v2616_v38 = vpop.f32.mrf.mxu3 }
 0x260   : > { %v2568_v52 = vadd.f32 %v2567_v53, %v6870_v6  ;;  %v2479_v21 = vpop.f32.mrf.mxu0  ;;  %v6903_v6 = vperm.slane %v6781_v37, 1 }
 0x261   : > { %v2480_v32 = vadd.f32 %v2479_v21, %v6787_v4  ;;  %v2528_v43 = vpop.f32.mrf.mxu1  ;;  %3125 = vmatpush.bf16.msrb.mxu2 %v5157_v8 }
 0x262   : > { %v6898_v33 = vadd.f32 %v2616_v38, %v2568_v52  ;;  %3174 = vmatpush.bf16.msrb.mxu3 %v5285_v7 }
 0x263   : > { %v2529_v58 = vadd.f32 %v2528_v43, %v2480_v32 }
 0x264   : > { %2765 = vmatmul.bf16.gmra.mxu2 %v6774_v46  ;;  %2814 = vmatmul.bf16.gmra.mxu3 %v6776_v48 }
 0x265   : > { %3126 = vmatpush.bf16.msrb.mxu2 %v5141_v1 }
 0x266   : > { %3175 = vmatpush.bf16.msrb.mxu3 %v5269_v23 }
 0x267   : > { %v2570_v4 = vpop.f32.mrf.mxu2  ;;  %v2619_v17 = vpop.f32.mrf.mxu3 }
 0x268   : > { %v2571_v24 = vadd.f32 %v2570_v4, %v6878_v55  ;;  %v2638_v22 = vpop.f32.mrf.mxu0 }
 0x269   : > { %v2639_v8 = vadd.f32 %v2638_v22, %v6903_v6  ;;  %v2687_v16 = vpop.f32.mrf.mxu1 }
 0x26a   : > { %v6907_v53 = vadd.f32 %v2619_v17, %v2571_v24 }
 0x26b   : > { %v2688_v38 = vadd.f32 %v2687_v16, %v2639_v8  ;;  %2833 = vmatmul.bf16.vlgmr.msra.gmra.mxu0 %v6576_v9 }
 0x26c   : > { %2882 = vmatmul.bf16.vlgmr.msra.gmra.mxu1 %v6578_v18  ;;  %4063 = vmatpush.bf16.msra.mxu0 %v6678_v47 }
 0x26d   : > { %4076 = vmatpush.bf16.msra.mxu1 %v6680_v62 }
 0x26f   : > { %v2572_v37 = vpop.f32.mrf.mxu2  ;;  %v2621_v7 = vpop.f32.mrf.mxu3 }
 0x270   : > { %v2573_v52 = vadd.f32 %v2572_v37, %v6886_v28  ;;  %4064 = vmatpush.bf16.msra.mxu0 %v6660_v5  ;;  %v2640_v55 = vpop.f32.mrf.mxu0 }
 0x271   : > { %4077 = vmatpush.bf16.msra.mxu1 %v6662_v60  ;;  %v2641_v21 = vadd.f32 %v2640_v55, %v6903_v6  ;;  %v2689_v32 = vpop.f32.mrf.mxu1 }
 0x272   : > { %v6917_v43 = vadd.f32 %v2621_v7, %v2573_v52 }
 0x273   : > { %v2690_v44 = vadd.f32 %v2689_v32, %v2641_v21 }
 0x274   : > { %2770 = vmatmul.bf16.gmra.mxu2 %v6798_v2  ;;  %2819 = vmatmul.bf16.gmra.mxu3 %v6800_v3 }
 0x275   : > { %4065 = vmatpush.bf16.msra.mxu0 %v6646_v25  ;;  %4078 = vmatpush.bf16.msra.mxu1 %v6648_v51 }
 0x277   : > { %v2575_v28 = vpop.f32.mrf.mxu2  ;;  %v2624_v61 = vpop.f32.mrf.mxu3 }
 0x278   : > { %v2576_v57 = vadd.f32 %v2575_v28, %v2527_v13  ;;  %v2643_v1 = vpop.f32.mrf.mxu0 }
 0x279   : > { %4066 = vmatpush.bf16.msra.mxu0 %v6632_v49  ;;  %4079 = vmatpush.bf16.msra.mxu1 %v6634_v31  ;;  %v2644_v15 = vadd.f32 %v2643_v1, %v6903_v6  ;;  %v2692_v23 = vpop.f32.mrf.mxu1 }
 0x27a   : > { %v6926_v4 = vadd.f32 %v2624_v61, %v2576_v57 }
 0x27b   : > { %v2693_v17 = vadd.f32 %v2692_v23, %v2644_v15  ;;  %2838 = vmatmul.bf16.gmra.mxu0 %v6590_v0 }
 0x27c   : > { %2887 = vmatmul.bf16.gmra.mxu1 %v6592_v36 }
 0x27d   : > { %4067 = vmatpush.bf16.msra.mxu0 %v6618_v34  ;;  %4080 = vmatpush.bf16.msra.mxu1 %v6620_v10 }
 0x27f   : > { %v2577_v13 = vpop.f32.mrf.mxu2  ;;  %v2626_v24 = vpop.f32.mrf.mxu3 }
 0x280   : > { %v2578_v22 = vadd.f32 %v2577_v13, %v2529_v58  ;;  %v2645_v8 = vpop.f32.mrf.mxu0 }
 0x281   : > { %4068 = vmatpush.bf16.msra.mxu0 %v6604_v45  ;;  %4081 = vmatpush.bf16.msra.mxu1 %v6606_v56  ;;  %v2646_v16 = vadd.f32 %v2645_v8, %v6903_v6  ;;  %v2694_v37 = vpop.f32.mrf.mxu1 }
 0x282   : > { %v6935_v7 = vadd.f32 %v2626_v24, %v2578_v22 }
 0x283   : > { %v2695_v52 = vadd.f32 %v2694_v37, %v2646_v16 }
 0x284   : > { %2931 = vmatmul.bf16.vlgmr.msra.gmra.mxu2 %v6690_v39  ;;  %2980 = vmatmul.bf16.vlgmr.msra.gmra.mxu3 %v6692_v40 }
 0x285   : > { %4069 = vmatpush.bf16.msra.mxu0 %v6590_v0  ;;  %4082 = vmatpush.bf16.msra.mxu1 %v6592_v36 }
 0x286   : > { %4089 = vmatpush.bf16.msra.mxu2 %v6798_v2  ;;  %4102 = vmatpush.bf16.msra.mxu3 %v6800_v3 }
 0x287   : > { %v2736_v58 = vpop.f32.mrf.mxu2  ;;  %v2785_v55 = vpop.f32.mrf.mxu3 }
 0x288   : > { %v2737_v21 = vadd.f32 %v2736_v58, %v2688_v38  ;;  %v2648_v32 = vpop.f32.mrf.mxu0 }
 0x289   : > { %4070 = vmatpush.bf16.msra.mxu0 %v6576_v9  ;;  %4083 = vmatpush.bf16.msra.mxu1 %v6578_v18  ;;  %v2649_v28 = vadd.f32 %v2648_v32, %v6903_v6  ;;  %v2697_v61 = vpop.f32.mrf.mxu1 }
 0x28a   : > { %v6946_v57 = vadd.f32 %v2785_v55, %v2737_v21  ;;  %4090 = vmatpush.bf16.msra.mxu2 %v6774_v46  ;;  %4103 = vmatpush.bf16.msra.mxu3 %v6776_v48 }
 0x28b   : > { %v2698_v1 = vadd.f32 %v2697_v61, %v2649_v28  ;;  %2843 = vmatmul.bf16.gmra.mxu0 %v6604_v45 }
 0x28c   : > { %2892 = vmatmul.bf16.gmra.mxu1 %v6606_v56 }
 0x28e   : > { %4091 = vmatpush.bf16.msra.mxu2 %v6760_v50  ;;  %4104 = vmatpush.bf16.msra.mxu3 %v6762_v54 }
 0x28f   : > { %v2738_v38 = vpop.f32.mrf.mxu2  ;;  %v2787_v15 = vpop.f32.mrf.mxu3 }
 0x290   : > { %v2739_v23 = vadd.f32 %v2738_v38, %v2690_v44  ;;  %v2650_v13 = vpop.f32.mrf.mxu0 }
 0x291   : > { %v2651_v24 = vadd.f32 %v2650_v13, %v6903_v6  ;;  %v2699_v22 = vpop.f32.mrf.mxu1 }
 0x292   : > { %v6955_v8 = vadd.f32 %v2787_v15, %v2739_v23  ;;  %4092 = vmatpush.bf16.msra.mxu2 %v6746_v11  ;;  %4105 = vmatpush.bf16.msra.mxu3 %v6748_v35 }
 0x293   : > { %v2700_v16 = vadd.f32 %v2699_v22, %v2651_v24 }
 0x294   : > { %7879 = vst [vmem:[#allocation35_spill] sm:$0xff] %v6955_v8  ;;  %2936 = vmatmul.bf16.gmra.mxu2 %v6704_v29  ;;  %2985 = vmatmul.bf16.gmra.mxu3 %v6706_v14 }
 0x296   : > { %4093 = vmatpush.bf16.msra.mxu2 %v6732_v26  ;;  %4106 = vmatpush.bf16.msra.mxu3 %v6734_v30 }
 0x297   : > { %v2741_v44 = vpop.f32.mrf.mxu2  ;;  %v2790_v37 = vpop.f32.mrf.mxu3 }
 0x298   : > { %v2742_v58 = vadd.f32 %v2741_v44, %v2693_v17  ;;  %v2653_v55 = vpop.f32.mrf.mxu0 }
 0x299   : > { %v2654_v21 = vadd.f32 %v2653_v55, %v6903_v6  ;;  %v2702_v32 = vpop.f32.mrf.mxu1 }
 0x29a   : > { %v6964_v28 = vadd.f32 %v2790_v37, %v2742_v58  ;;  %4094 = vmatpush.bf16.msra.mxu2 %v6718_v27  ;;  %4107 = vmatpush.bf16.msra.mxu3 %v6720_v63 }
 0x29b   : > { %v2703_v61 = vadd.f32 %v2702_v32, %v2654_v21  ;;  %2848 = vmatmul.bf16.gmra.mxu0 %v6618_v34 }
 0x29c   : > { %7880 = vst [vmem:[#allocation36_spill] sm:$0xff] %v6964_v28  ;;  %2897 = vmatmul.bf16.gmra.mxu1 %v6620_v10 }
 0x29e   : > { %4095 = vmatpush.bf16.msra.mxu2 %v6704_v29  ;;  %4108 = vmatpush.bf16.msra.mxu3 %v6706_v14 }
 0x29f   : > { %v2743_v17 = vpop.f32.mrf.mxu2  ;;  %v2792_v38 = vpop.f32.mrf.mxu3 }
 0x2a0   : > { %v2744_v15 = vadd.f32 %v2743_v17, %v2695_v52  ;;  %v2655_v23 = vpop.f32.mrf.mxu0 }
 0x2a1   : > { %v2656_v13 = vadd.f32 %v2655_v23, %v6903_v6  ;;  %v2704_v24 = vpop.f32.mrf.mxu1 }
 0x2a2   : > { %v6973_v22 = vadd.f32 %v2792_v38, %v2744_v15  ;;  %4096 = vmatpush.bf16.msra.mxu2 %v6690_v39  ;;  %4109 = vmatpush.bf16.msra.mxu3 %v6692_v40 }
 0x2a3   : > { %v2705_v44 = vadd.f32 %v2704_v24, %v2656_v13 }
 0x2a4   : > { %7881 = vst [vmem:[#allocation37_spill] sm:$0xff] %v6973_v22  ;;  %2941 = vmatmul.bf16.gmra.mxu2 %v6718_v27  ;;  %2990 = vmatmul.bf16.gmra.mxu3 %v6720_v63 }
 0x2a7   : > { %v2746_v37 = vpop.f32.mrf.mxu2  ;;  %v2795_v58 = vpop.f32.mrf.mxu3 }
 0x2a8   : > { %v2747_v55 = vadd.f32 %v2746_v37, %v2698_v1  ;;  %v2658_v21 = vpop.f32.mrf.mxu0 }
 0x2a9   : > { %v2659_v52 = vadd.f32 %v2658_v21, %v6903_v6  ;;  %v2707_v32 = vpop.f32.mrf.mxu1 }
 0x2aa   : > { %v6980_v17 = vadd.f32 %v2795_v58, %v2747_v55 }
 0x2ab   : > { %v2708_v38 = vadd.f32 %v2707_v32, %v2659_v52  ;;  %2853 = vmatmul.bf16.gmra.mxu0 %v6632_v49 }
 0x2ac   : > { %7882 = vst [vmem:[#allocation38_spill] sm:$0xff] %v6980_v17  ;;  %2902 = vmatmul.bf16.gmra.mxu1 %v6634_v31 }
 0x2af   : > { %v2748_v15 = vpop.f32.mrf.mxu2  ;;  %v2797_v23 = vpop.f32.mrf.mxu3 }
 0x2b0   : > { %v2749_v13 = vadd.f32 %v2748_v15, %v2700_v16  ;;  %v2660_v24 = vpop.f32.mrf.mxu0 }
 0x2b1   : > { %v2661_v42 = vadd.f32 %v2660_v24, %v6903_v6  ;;  %v2709_v22 = vpop.f32.mrf.mxu1 }
 0x2b2   : > { %v6985_v28 = vadd.f32 %v2797_v23, %v2749_v13 }
 0x2b3   : > { %v2710_v1 = vadd.f32 %v2709_v22, %v2661_v42 }
 0x2b4   : > { %7883 = vst [vmem:[#allocation39_spill] sm:$0xff] %v6985_v28  ;;  %2946 = vmatmul.bf16.gmra.mxu2 %v6732_v26  ;;  %2995 = vmatmul.bf16.gmra.mxu3 %v6734_v30 }
 0x2b7   : > { %v2751_v37 = vpop.f32.mrf.mxu2  ;;  %v2800_v58 = vpop.f32.mrf.mxu3 }
 0x2b8   : > { %v2752_v55 = vadd.f32 %v2751_v37, %v2703_v61  ;;  %v2663_v21 = vpop.f32.mrf.mxu0 }
 0x2b9   : > { %v2664_v52 = vadd.f32 %v2663_v21, %v6903_v6  ;;  %v2712_v32 = vpop.f32.mrf.mxu1 }
 0x2ba   : > { %v6990_v17 = vadd.f32 %v2800_v58, %v2752_v55 }
 0x2bb   : > { %v2713_v16 = vadd.f32 %v2712_v32, %v2664_v52  ;;  %2858 = vmatmul.bf16.gmra.mxu0 %v6646_v25 }
 0x2bc   : > { %7884 = vst [vmem:[#allocation40_spill] sm:$0xff] %v6990_v17  ;;  %2907 = vmatmul.bf16.gmra.mxu1 %v6648_v51 }
 0x2bf   : > { %v2753_v15 = vpop.f32.mrf.mxu2  ;;  %v2802_v42 = vpop.f32.mrf.mxu3 }
 0x2c0   : > { %v2754_v22 = vadd.f32 %v2753_v15, %v2705_v44  ;;  %v2665_v23 = vpop.f32.mrf.mxu0 }
 0x2c1   : > { %v2666_v13 = vadd.f32 %v2665_v23, %v6903_v6  ;;  %v2714_v24 = vpop.f32.mrf.mxu1 }
 0x2c2   : > { %v6995_v28 = vadd.f32 %v2802_v42, %v2754_v22 }
 0x2c3   : > { %v2715_v61 = vadd.f32 %v2714_v24, %v2666_v13 }
 0x2c4   : > { %7885 = vst [vmem:[#allocation41_spill] sm:$0xff] %v6995_v28  ;;  %2951 = vmatmul.bf16.gmra.mxu2 %v6746_v11  ;;  %3000 = vmatmul.bf16.gmra.mxu3 %v6748_v35 }
 0x2c7   : > { %v2756_v37 = vpop.f32.mrf.mxu2  ;;  %v2805_v58 = vpop.f32.mrf.mxu3 }
 0x2c8   : > { %v2757_v55 = vadd.f32 %v2756_v37, %v2708_v38  ;;  %v2668_v21 = vpop.f32.mrf.mxu0 }
 0x2c9   : > { %v2669_v52 = vadd.f32 %v2668_v21, %v6903_v6  ;;  %v2717_v32 = vpop.f32.mrf.mxu1 }
 0x2ca   : > { %v7000_v17 = vadd.f32 %v2805_v58, %v2757_v55 }
 0x2cb   : > { %v2718_v44 = vadd.f32 %v2717_v32, %v2669_v52  ;;  %2863 = vmatmul.bf16.gmra.mxu0 %v6660_v5 }
 0x2cc   : > { %7886 = vst [vmem:[#allocation42_spill] sm:$0xff] %v7000_v17  ;;  %2912 = vmatmul.bf16.gmra.mxu1 %v6662_v60 }
 0x2cf   : > { %v2758_v15 = vpop.f32.mrf.mxu2  ;;  %v2807_v42 = vpop.f32.mrf.mxu3 }
 0x2d0   : > { %v2759_v22 = vadd.f32 %v2758_v15, %v2710_v1  ;;  %v2670_v23 = vpop.f32.mrf.mxu0 }
 0x2d1   : > { %v2671_v13 = vadd.f32 %v2670_v23, %v6903_v6  ;;  %v2719_v24 = vpop.f32.mrf.mxu1 }
 0x2d2   : > { %v7005_v28 = vadd.f32 %v2807_v42, %v2759_v22 }
 0x2d3   : > { %v2720_v38 = vadd.f32 %v2719_v24, %v2671_v13 }
 0x2d4   : > { %7887 = vst [vmem:[#allocation43_spill] sm:$0xff] %v7005_v28  ;;  %2956 = vmatmul.bf16.gmra.mxu2 %v6760_v50  ;;  %3005 = vmatmul.bf16.gmra.mxu3 %v6762_v54 }
 0x2d7   : > { %v2761_v37 = vpop.f32.mrf.mxu2  ;;  %v2810_v58 = vpop.f32.mrf.mxu3 }
 0x2d8   : > { %v2762_v55 = vadd.f32 %v2761_v37, %v2713_v16  ;;  %v2673_v21 = vpop.f32.mrf.mxu0  ;;  %v7022_v37 = vld [vmem:[%s7872_s4] sm:$0xf] }
 0x2d9   : > { %v2674_v52 = vadd.f32 %v2673_v21, %v6903_v6  ;;  %v2722_v32 = vpop.f32.mrf.mxu1 }
 0x2da   : > { %v7010_v17 = vadd.f32 %v2810_v58, %v2762_v55  ;;  %v7025_v58 = vperm.slane %v7022_v37, 2 }
 0x2db   : > { %v2723_v1 = vadd.f32 %v2722_v32, %v2674_v52  ;;  %2868 = vmatmul.bf16.gmra.mxu0 %v6678_v47 }
 0x2dc   : > { %7888 = vst [vmem:[#allocation44_spill] sm:$0xff] %v7010_v17  ;;  %2917 = vmatmul.bf16.gmra.mxu1 %v6680_v62 }
 0x2df   : > { %v2763_v15 = vpop.f32.mrf.mxu2  ;;  %v2812_v42 = vpop.f32.mrf.mxu3 }
 0x2e0   : > { %v2764_v22 = vadd.f32 %v2763_v15, %v2715_v61  ;;  %v2675_v23 = vpop.f32.mrf.mxu0 }
 0x2e1   : > { %v2676_v13 = vadd.f32 %v2675_v23, %v6903_v6  ;;  %v2724_v24 = vpop.f32.mrf.mxu1 }
 0x2e2   : > { %v7015_v28 = vadd.f32 %v2812_v42, %v2764_v22 }
 0x2e3   : > { %v2725_v16 = vadd.f32 %v2724_v24, %v2676_v13 }
 0x2e4   : > { %7889 = vst [vmem:[#allocation45_spill] sm:$0xff] %v7015_v28  ;;  %2961 = vmatmul.bf16.gmra.mxu2 %v6774_v46  ;;  %3010 = vmatmul.bf16.gmra.mxu3 %v6776_v48 }
 0x2e7   : > { %v2766_v61 = vpop.f32.mrf.mxu2  ;;  %v2815_v55 = vpop.f32.mrf.mxu3 }
 0x2e8   : > { %v2767_v21 = vadd.f32 %v2766_v61, %v2718_v44  ;;  %v2834_v6 = vpop.f32.mrf.mxu0 }
 0x2e9   : > { %v2835_v52 = vadd.f32 %v2834_v6, %v7025_v58  ;;  %v2883_v32 = vpop.f32.mrf.mxu1 }
 0x2ea   : > { %v7028_v15 = vadd.f32 %v2815_v55, %v2767_v21 }
 0x2eb   : > { %v2884_v42 = vadd.f32 %v2883_v32, %v2835_v52  ;;  %3029 = vmatmul.bf16.vlgmr.msrb.gmra.mxu0 %v6576_v9 }
 0x2ec   : > { %3078 = vmatmul.bf16.vlgmr.msrb.gmra.mxu1 %v6578_v18 }
 0x2ef   : > { %v2768_v22 = vpop.f32.mrf.mxu2  ;;  %v2817_v23 = vpop.f32.mrf.mxu3 }
 0x2f0   : > { %v2769_v13 = vadd.f32 %v2768_v22, %v2720_v38  ;;  %v2836_v24 = vpop.f32.mrf.mxu0 }
 0x2f1   : > { %v2837_v28 = vadd.f32 %v2836_v24, %v7025_v58  ;;  %v2885_v17 = vpop.f32.mrf.mxu1 }
 0x2f2   : > { %v7033_v8 = vadd.f32 %v2817_v23, %v2769_v13 }
 0x2f3   : > { %v2886_v44 = vadd.f32 %v2885_v17, %v2837_v28 }
 0x2f4   : > { %2966 = vmatmul.bf16.gmra.mxu2 %v6798_v2  ;;  %3015 = vmatmul.bf16.gmra.mxu3 %v6800_v3 }
 0x2f7   : > { %v2771_v61 = vpop.f32.mrf.mxu2  ;;  %v2820_v55 = vpop.f32.mrf.mxu3 }
 0x2f8   : > { %v2772_v21 = vadd.f32 %v2771_v61, %v2723_v1  ;;  %v2839_v9 = vpop.f32.mrf.mxu0 }
 0x2f9   : > { %v2840_v18 = vadd.f32 %v2839_v9, %v7025_v58  ;;  %v2888_v6 = vpop.f32.mrf.mxu1 }
 0x2fa   : > { %v7038_v52 = vadd.f32 %v2820_v55, %v2772_v21 }
 0x2fb   : > { %v2889_v38 = vadd.f32 %v2888_v6, %v2840_v18  ;;  %3034 = vmatmul.bf16.gmra.mxu0 %v6590_v0 }
 0x2fc   : > { %3083 = vmatmul.bf16.gmra.mxu1 %v6592_v36 }
 0x2ff   : > { %v2773_v32 = vpop.f32.mrf.mxu2  ;;  %v2822_v28 = vpop.f32.mrf.mxu3 }
 0x300   : > { %v2774_v17 = vadd.f32 %v2773_v32, %v2725_v16  ;;  %v2841_v22 = vpop.f32.mrf.mxu0 }
 0x301   : > { %v2842_v23 = vadd.f32 %v2841_v22, %v7025_v58  ;;  %v2890_v13 = vpop.f32.mrf.mxu1 }
 0x302   : > { %v7043_v24 = vadd.f32 %v2822_v28, %v2774_v17 }
 0x303   : > { %v2891_v1 = vadd.f32 %v2890_v13, %v2842_v23 }
 0x304   : > { %3127 = vmatmul.bf16.vlgmr.msrb.gmra.mxu2 %v6690_v39  ;;  %3176 = vmatmul.bf16.vlgmr.msrb.gmra.mxu3 %v6692_v40 }
 0x307   : > { %v2932_v61 = vpop.f32.mrf.mxu2  ;;  %v2981_v55 = vpop.f32.mrf.mxu3 }
 0x308   : > { %v2933_v21 = vadd.f32 %v2932_v61, %v2884_v42  ;;  %v2844_v0 = vpop.f32.mrf.mxu0 }
 0x309   : > { %v2845_v36 = vadd.f32 %v2844_v0, %v7025_v58  ;;  %v2893_v9 = vpop.f32.mrf.mxu1 }
 0x30a   : > { %v2982_v18 = vadd.f32 %v2981_v55, %v2933_v21 }
 0x30b   : > { %v7048_v16 = vadd.f32 %v2893_v9, %v2845_v36  ;;  %3039 = vmatmul.bf16.gmra.mxu0 %v6604_v45 }
 0x30c   : > { %v5382_v6 = vmul.f32 -1.442695, %v2982_v18  ;;  %3088 = vmatmul.bf16.gmra.mxu1 %v6606_v56 }
 0x30e   : > { %5769 = vpow2.f32 %v5382_v6 }
 0x30f   : > { %v2934_v32 = vpop.f32.mrf.mxu2  ;;  %v2983_v39 = vpop.f32.mrf.mxu3 }
 0x310   : > { %v2935_v28 = vadd.f32 %v2934_v32, %v2886_v44  ;;  %v2846_v40 = vpop.f32.mrf.mxu0 }
 0x311   : > { %v2847_v17 = vadd.f32 %v2846_v40, %v7025_v58  ;;  %v2895_v42 = vpop.f32.mrf.mxu1 }
 0x312   : > { %v2984_v22 = vadd.f32 %v2983_v39, %v2935_v28 }
 0x313   : > { %v7053_v23 = vadd.f32 %v2895_v42, %v2847_v17 }
 0x314   : > { %v5770_v13 = vpop.eup %5769  ;;  %v5384_v61 = vmul.f32 -1.442695, %v2984_v22  ;;  %3132 = vmatmul.bf16.gmra.mxu2 %v6704_v29  ;;  %3181 = vmatmul.bf16.gmra.mxu3 %v6706_v14 }
 0x315   : > { %v3345_v45 = vadd.f32 1.0, %v5770_v13 }
 0x316   : > { %5771 = vpow2.f32 %v5384_v61 }
 0x317   : > { %5773 = vrcp.f32 %v3345_v45  ;;  %v2937_v56 = vpop.f32.mrf.mxu2  ;;  %v2986_v55 = vpop.f32.mrf.mxu3  ;;  %v3388_v13 = vand.u32 2147483648, %v3345_v45  ;;  %vm3382_vm3 = vweird.f32 %v3345_v45 }
 0x318   : > { %v2938_v21 = vadd.f32 %v2937_v56, %v2889_v38  ;;  %v2849_v44 = vpop.f32.mrf.mxu0  ;;  %v3386_v56 = vand.u32 2147483647, %v3345_v45 }
 0x319   : > { %v2850_v0 = vadd.f32 %v2849_v44, %v7025_v58  ;;  %v2898_v36 = vpop.f32.mrf.mxu1 }
 0x31a   : > { %v2987_v9 = vadd.f32 %v2986_v55, %v2938_v21  ;;  %vm3387_vm5 = vcmp.eq.f32.partialorder %v3386_v56, 8.507059e+37 }
 0x31b   : > { %v7058_v18 = vadd.f32 %v2898_v36, %v2850_v0  ;;  %3044 = vmatmul.bf16.gmra.mxu0 %v6618_v34  ;;  %v3389_v36 = vor.u32 1.1754944e-38, %v3388_v13 }
 0x31c   : > { %v5772_v6 = vpop.eup %5771  ;;  %v5386_v32 = vmul.f32 -1.442695, %v2987_v9  ;;  %3093 = vmatmul.bf16.gmra.mxu1 %v6620_v10 }
 0x31d   : > { %v5774_v29 = vpop.eup %5773  ;;  %v7062_v14 = vadd.f32 1.0, %v5772_v6 }
 0x31e   : > { %v3378_v39 = vmul.f32 %v5774_v29, %v3345_v45  ;;  %5775 = vpow2.f32 %v5386_v32  ;;  %vm3383_vm2 = vweird.f32 %v5774_v29 }
 0x31f   : > { %5777 = vrcp.f32 %v7062_v14  ;;  %v2939_v38 = vpop.f32.mrf.mxu2  ;;  %v2988_v28 = vpop.f32.mrf.mxu3  ;;  %vm3384_vm4 = vmor %vm3382_vm3, %vm3383_vm2  ;;  %v3416_v13 = vand.u32 2147483647, %v7062_v14  ;;  %vm3412_vm7 = vweird.f32 %v7062_v14 }
 0x320   : > { %v2940_v40 = vadd.f32 %v2939_v38, %v2891_v1  ;;  %v2851_v17 = vpop.f32.mrf.mxu0  ;;  %v3379_v42 = vsub.f32 1.0, %v3378_v39  ;;  %5779 = vtanh.f32 %v6814_v12 }
 0x321   : > { %v2852_v34 = vadd.f32 %v2851_v17, %v7025_v58  ;;  %v2900_v22 = vpop.f32.mrf.mxu1  ;;  %vm3417_vm9 = vcmp.eq.f32.partialorder %v3416_v13, 8.507059e+37 }
 0x322   : > { %v2989_v61 = vadd.f32 %v2988_v28, %v2940_v40  ;;  %v3380_v10 = vmul.f32 %v5774_v29, %v3379_v42 }
 0x323   : > { %v7067_v55 = vadd.f32 %v2900_v22, %v2852_v34 }
 0x324   : > { %v5776_v21 = vpop.eup %5775  ;;  %v5388_v44 = vmul.f32 -1.442695, %v2989_v61  ;;  %3137 = vmatmul.bf16.gmra.mxu2 %v6718_v27  ;;  %3186 = vmatmul.bf16.gmra.mxu3 %v6720_v63  ;;  %v3381_v1 = vadd.f32 %v5774_v29, %v3380_v10 }
 0x325   : > { %v5778_v0 = vpop.eup %5777  ;;  %v7071_v12 = vadd.f32 1.0, %v5776_v21 }
 0x326   : > { %v3408_v9 = vmul.f32 %v5778_v0, %v7062_v14  ;;  %5781 = vpow2.f32 %v5388_v44  ;;  %v3385_v6 = vsel %vm3384_vm4, %v5774_v29, %v3381_v1  ;;  %v5780_v32 = vpop.eup %5779  ;;  %v3418_v29 = vand.u32 2147483648, %v7062_v14 }
 0x327   : > { %5783 = vrcp.f32 %v7071_v12  ;;  %v2942_v39 = vpop.f32.mrf.mxu2  ;;  %v2991_v38 = vpop.f32.mrf.mxu3  ;;  %v3390_v27 = vsel %vm3387_vm5, %v3389_v36, %v3385_v6  ;;  %vm3413_vm6 = vweird.f32 %v5778_v0  ;;  %vm3442_vm11 = vweird.f32 %v7071_v12 }
 0x328   : > { %v2943_v63 = vadd.f32 %v2942_v39, %v7048_v16  ;;  %v2854_v28 = vpop.f32.mrf.mxu0  ;;  %v7076_v45 = vmul.f32 %v5780_v32, %v3390_v27  ;;  %v3409_v40 = vsub.f32 1.0, %v3408_v9  ;;  %5785 = vtanh.f32 %v6821_v41  ;;  %vm3414_vm8 = vmor %vm3412_vm7, %vm3413_vm6 }
 0x329   : > { %v2855_v17 = vadd.f32 %v2854_v28, %v7025_v58  ;;  %v2903_v42 = vpop.f32.mrf.mxu1  ;;  %v3419_v44 = vor.u32 1.1754944e-38, %v3418_v29 }
 0x32a   : > { %v2992_v34 = vadd.f32 %v2991_v38, %v2943_v63  ;;  %v3410_v22 = vmul.f32 %v5778_v0, %v3409_v40  ;;  %v3446_v40 = vand.u32 2147483647, %v7071_v12 }
 0x32b   : > { %v7082_v61 = vadd.f32 %v2903_v42, %v2855_v17  ;;  %3049 = vmatmul.bf16.gmra.mxu0 %v6632_v49 }
 0x32c   : > { %v5782_v16 = vpop.eup %5781  ;;  %v5390_v10 = vmul.f32 -1.442695, %v2992_v34  ;;  %3098 = vmatmul.bf16.gmra.mxu1 %v6634_v31  ;;  %v3411_v56 = vadd.f32 %v5778_v0, %v3410_v22  ;;  %vm3447_vm13 = vcmp.eq.f32.partialorder %v3446_v40, 8.507059e+37 }
 0x32d   : > { %v5784_v41 = vpop.eup %5783  ;;  %v7087_v21 = vadd.f32 1.0, %v5782_v16 }
 0x32e   : > { %v3438_v1 = vmul.f32 %v5784_v41, %v7071_v12  ;;  %5787 = vpow2.f32 %v5390_v10  ;;  %v3415_v36 = vsel %vm3414_vm8, %v5778_v0, %v3411_v56  ;;  %v5786_v9 = vpop.eup %5785  ;;  %v3448_v0 = vand.u32 2147483648, %v7071_v12 }
 0x32f   : > { %5789 = vrcp.f32 %v7087_v21  ;;  %v2944_v49 = vpop.f32.mrf.mxu2  ;;  %v2993_v6 = vpop.f32.mrf.mxu3  ;;  %v3420_v32 = vsel %vm3417_vm9, %v3419_v44, %v3415_v36  ;;  %vm3443_vm10 = vweird.f32 %v5784_v41  ;;  %v7890_v36 = vld [vmem:[#allocation29_spill] sm:$0xff]  ;;  %vm3472_vm15 = vweird.f32 %v7087_v21 }
 0x330   : > { %v2945_v31 = vadd.f32 %v2944_v49, %v7053_v23  ;;  %v7092_v39 = vpop.f32.mrf.mxu0  ;;  %v7094_v14 = vmul.f32 %v5786_v9, %v3420_v32  ;;  %v3439_v38 = vsub.f32 1.0, %v3438_v1  ;;  %5791 = vtanh.f32 %v6828_v20  ;;  %vm3444_vm12 = vmor %vm3442_vm11, %vm3443_vm10 }
 0x331   : > { %v7097_v27 = vpop.f32.mrf.mxu1  ;;  %v3449_v34 = vor.u32 1.1754944e-38, %v3448_v0 }
 0x332   : > { %v2994_v63 = vadd.f32 %v2993_v6, %v2945_v31  ;;  %v3440_v28 = vmul.f32 %v5784_v41, %v3439_v38  ;;  %v3476_v31 = vand.u32 2147483647, %v7087_v21 }
 0x334   : > { %v5788_v17 = vpop.eup %5787  ;;  %v5392_v42 = vmul.f32 -1.442695, %v2994_v63  ;;  %3142 = vmatmul.bf16.gmra.mxu2 %v6732_v26  ;;  %3191 = vmatmul.bf16.gmra.mxu3 %v6734_v30  ;;  %v3441_v23 = vadd.f32 %v5784_v41, %v3440_v28  ;;  %vm3477_vm1 = vcmp.eq.f32.partialorder %v3476_v31, 8.507059e+37 }
 0x335   : > { %v5790_v29 = vpop.eup %5789  ;;  %v7104_v20 = vadd.f32 1.0, %v5788_v17 }
 0x336   : > { %v3468_v22 = vmul.f32 %v5790_v29, %v7087_v21  ;;  %5793 = vpow2.f32 %v5392_v42  ;;  %v3445_v13 = vsel %vm3444_vm12, %v5784_v41, %v3441_v23  ;;  %v5792_v16 = vpop.eup %5791  ;;  %v3478_v41 = vand.u32 2147483648, %v7087_v21 }
 0x337   : > { %5795 = vrcp.f32 %v7104_v20  ;;  %v2947_v10 = vpop.f32.mrf.mxu2  ;;  %v2996_v26 = vpop.f32.mrf.mxu3  ;;  %v3450_v56 = vsel %vm3447_vm13, %v3449_v34, %v3445_v13  ;;  %vm3473_vm14 = vweird.f32 %v5790_v29  ;;  %vm3502_vm3 = vweird.f32 %v7104_v20 }
 0x338   : > { %v2948_v30 = vadd.f32 %v2947_v10, %v7058_v18  ;;  %v2859_v44 = vpop.f32.mrf.mxu0  ;;  %v7109_v12 = vmul.f32 %v5792_v16, %v3450_v56  ;;  %v3469_v1 = vsub.f32 1.0, %v3468_v22  ;;  %5797 = vtanh.f32 %v7890_v36  ;;  %vm3474_vm0 = vmor %vm3472_vm15, %vm3473_vm14 }
 0x339   : > { %v2860_v9 = vadd.f32 %v2859_v44, %v7025_v58  ;;  %v2908_v49 = vpop.f32.mrf.mxu1  ;;  %v3479_v17 = vor.u32 1.1754944e-38, %v3478_v41  ;;  %v3506_v36 = vand.u32 2147483647, %v7104_v20 }
 0x33a   : > { %v2997_v6 = vadd.f32 %v2996_v26, %v2948_v30  ;;  %v3470_v32 = vmul.f32 %v5790_v29, %v3469_v1  ;;  %v7891_v26 = vld [vmem:[#allocation30_spill] sm:$0xff] }
 0x33b   : > { %v7115_v38 = vadd.f32 %v2908_v49, %v2860_v9  ;;  %3054 = vmatmul.bf16.gmra.mxu0 %v6646_v25  ;;  %vm3507_vm5 = vcmp.eq.f32.partialorder %v3506_v36, 8.507059e+37 }
 0x33c   : > { %v5794_v18 = vpop.eup %5793  ;;  %v5394_v0 = vmul.f32 -1.442695, %v2997_v6  ;;  %3103 = vmatmul.bf16.gmra.mxu1 %v6648_v51  ;;  %v3471_v63 = vadd.f32 %v5790_v29, %v3470_v32 }
 0x33d   : > { %v5796_v28 = vpop.eup %5795  ;;  %v7120_v40 = vadd.f32 1.0, %v5794_v18 }
 0x33e   : > { %v3498_v42 = vmul.f32 %v5796_v28, %v7104_v20  ;;  %5799 = vpow2.f32 %v5394_v0  ;;  %v3475_v23 = vsel %vm3474_vm0, %v5790_v29, %v3471_v63  ;;  %v5798_v34 = vpop.eup %5797  ;;  %v3508_v29 = vand.u32 2147483648, %v7104_v20 }
 0x33f   : > { %5801 = vrcp.f32 %v7120_v40  ;;  %v2949_v25 = vpop.f32.mrf.mxu2  ;;  %v2998_v22 = vpop.f32.mrf.mxu3  ;;  %v3480_v13 = vsel %vm3477_vm1, %v3479_v17, %v3475_v23  ;;  %vm3503_vm2 = vweird.f32 %v5796_v28  ;;  %vm3532_vm7 = vweird.f32 %v7120_v40 }
 0x340   : > { %v2950_v51 = vadd.f32 %v2949_v25, %v7067_v55  ;;  %v2861_v16 = vpop.f32.mrf.mxu0  ;;  %v7125_v21 = vmul.f32 %v5798_v34, %v3480_v13  ;;  %v3499_v10 = vsub.f32 1.0, %v3498_v42  ;;  %5803 = vtanh.f32 %v7891_v26  ;;  %vm3504_vm4 = vmor %vm3502_vm3, %vm3503_vm2  ;;  %v7892_v25 = vld [vmem:[#allocation31_spill] sm:$0xff] }
 0x341   : > { %v2862_v56 = vadd.f32 %v2861_v16, %v7025_v58  ;;  %v2910_v30 = vpop.f32.mrf.mxu1  ;;  %v3509_v31 = vor.u32 1.1754944e-38, %v3508_v29 }
 0x342   : > { %v2999_v44 = vadd.f32 %v2998_v22, %v2950_v51  ;;  %v3500_v1 = vmul.f32 %v5796_v28, %v3499_v10  ;;  %v3536_v10 = vand.u32 2147483647, %v7120_v40 }
 0x343   : > { %v7131_v9 = vadd.f32 %v2910_v30, %v2862_v56 }
 0x344   : > { %v5800_v49 = vpop.eup %5799  ;;  %v5396_v55 = vmul.f32 -1.442695, %v2999_v44  ;;  %3147 = vmatmul.bf16.gmra.mxu2 %v6746_v11  ;;  %3196 = vmatmul.bf16.gmra.mxu3 %v6748_v35  ;;  %v3501_v41 = vadd.f32 %v5796_v28, %v3500_v1  ;;  %vm3537_vm9 = vcmp.eq.f32.partialorder %v3536_v10, 8.507059e+37 }
 0x345   : > { %v5802_v6 = vpop.eup %5801  ;;  %v7136_v32 = vadd.f32 1.0, %v5800_v49 }
 0x346   : > { %v3528_v18 = vmul.f32 %v5802_v6, %v7120_v40  ;;  %5805 = vpow2.f32 %v5396_v55  ;;  %v3505_v0 = vsel %vm3504_vm4, %v5796_v28, %v3501_v41  ;;  %v5804_v63 = vpop.eup %5803  ;;  %v3538_v28 = vand.u32 2147483648, %v7120_v40 }
 0x347   : > { %5807 = vrcp.f32 %v7136_v32  ;;  %v2952_v17 = vpop.f32.mrf.mxu2  ;;  %v3001_v11 = vpop.f32.mrf.mxu3  ;;  %v3510_v42 = vsel %vm3507_vm5, %v3509_v31, %v3505_v0  ;;  %vm3533_vm6 = vweird.f32 %v5802_v6  ;;  %v7893_v0 = vld [vmem:[#allocation32_spill] sm:$0xff]  ;;  %vm3562_vm11 = vweird.f32 %v7136_v32 }
 0x348   : > { %v2953_v35 = vadd.f32 %v2952_v17, %v7082_v61  ;;  %v2864_v23 = vpop.f32.mrf.mxu0  ;;  %v7141_v20 = vmul.f32 %v5804_v63, %v3510_v42  ;;  %v3529_v34 = vsub.f32 1.0, %v3528_v18  ;;  %5809 = vtanh.f32 %v7892_v25  ;;  %vm3534_vm8 = vmor %vm3532_vm7, %vm3533_vm6 }
 0x349   : > { %v2865_v22 = vadd.f32 %v2864_v23, %v7025_v58  ;;  %v2913_v13 = vpop.f32.mrf.mxu1  ;;  %v3539_v1 = vor.u32 1.1754944e-38, %v3538_v28  ;;  %v3566_v42 = vand.u32 2147483647, %v7136_v32 }
 0x34a   : > { %v3002_v51 = vadd.f32 %v3001_v11, %v2953_v35  ;;  %v3530_v16 = vmul.f32 %v5802_v6, %v3529_v34 }
 0x34b   : > { %v7147_v26 = vadd.f32 %v2913_v13, %v2865_v22  ;;  %3059 = vmatmul.bf16.gmra.mxu0 %v6660_v5  ;;  %vm3567_vm13 = vcmp.eq.f32.partialorder %v3566_v42, 8.507059e+37 }
 0x34c   : > { %v5806_v61 = vpop.eup %5805  ;;  %v5398_v56 = vmul.f32 -1.442695, %v3002_v51  ;;  %3108 = vmatmul.bf16.gmra.mxu1 %v6662_v60  ;;  %v3531_v30 = vadd.f32 %v5802_v6, %v3530_v16 }
 0x34d   : > { %v5808_v29 = vpop.eup %5807  ;;  %v7152_v44 = vadd.f32 1.0, %v5806_v61 }
 0x34e   : > { %v3558_v36 = vmul.f32 %v5808_v29, %v7136_v32  ;;  %5811 = vpow2.f32 %v5398_v56  ;;  %v3535_v49 = vsel %vm3534_vm8, %v5802_v6, %v3531_v30  ;;  %v5810_v55 = vpop.eup %5809  ;;  %v3568_v6 = vand.u32 2147483648, %v7136_v32 }
 0x34f   : > { %5813 = vrcp.f32 %v7152_v44  ;;  %v7156_v5 = vpop.f32.mrf.mxu2  ;;  %v7158_v41 = vpop.f32.mrf.mxu3  ;;  %v3540_v60 = vsel %vm3537_vm9, %v3539_v1, %v3535_v49  ;;  %vm3563_vm10 = vweird.f32 %v5808_v29  ;;  %v7894_v1 = vld [vmem:[#allocation33_spill] sm:$0xff]  ;;  %vm3592_vm15 = vweird.f32 %v7152_v44 }
 0x350   : > { %v3559_v31 = vsub.f32 1.0, %v3558_v36  ;;  %v2866_v40 = vpop.f32.mrf.mxu0  ;;  %v7160_v18 = vmul.f32 %v5810_v55, %v3540_v60  ;;  %5815 = vtanh.f32 %v7893_v0  ;;  %vm3564_vm12 = vmor %vm3562_vm11, %vm3563_vm10  ;;  %v3569_v13 = vor.u32 1.1754944e-38, %v3568_v6 }
 0x351   : > { %v2867_v63 = vadd.f32 %v2866_v40, %v7025_v58  ;;  %v2915_v17 = vpop.f32.mrf.mxu1 }
 0x352   : > { %v3560_v11 = vmul.f32 %v5808_v29, %v3559_v31  ;;  %v3596_v31 = vand.u32 2147483647, %v7152_v44 }
 0x353   : > { %v7166_v35 = vadd.f32 %v2915_v17, %v2867_v63 }
 0x354   : > { %v5812_v23 = vpop.eup %5811  ;;  %3152 = vmatmul.bf16.gmra.mxu2 %v6760_v50  ;;  %3201 = vmatmul.bf16.gmra.mxu3 %v6762_v54  ;;  %v3561_v34 = vadd.f32 %v5808_v29, %v3560_v11  ;;  %vm3597_vm1 = vcmp.eq.f32.partialorder %v3596_v31, 8.507059e+37 }
 0x355   : > { %v5814_v25 = vpop.eup %5813  ;;  %v7171_v22 = vadd.f32 1.0, %v5812_v23 }
 0x356   : > { %v3588_v28 = vmul.f32 %v5814_v25, %v7152_v44  ;;  %v3565_v51 = vsel %vm3564_vm12, %v5808_v29, %v3561_v34  ;;  %v5816_v16 = vpop.eup %5815  ;;  %v3598_v29 = vand.u32 2147483648, %v7152_v44  ;;  %vm3593_vm14 = vweird.f32 %v5814_v25 }
 0x357   : > { %5817 = vrcp.f32 %v7171_v22  ;;  %v2957_v10 = vpop.f32.mrf.mxu2  ;;  %v3006_v61 = vpop.f32.mrf.mxu3  ;;  %v3570_v50 = vsel %vm3567_vm13, %v3569_v13, %v3565_v51  ;;  %vm3594_vm0 = vmor %vm3592_vm15, %vm3593_vm14  ;;  %vm3622_vm3 = vweird.f32 %v7171_v22 }
 0x358   : > { %v2958_v54 = vadd.f32 %v2957_v10, %v7115_v38  ;;  %v2869_v56 = vpop.f32.mrf.mxu0  ;;  %v7176_v30 = vmul.f32 %v5816_v16, %v3570_v50  ;;  %v3589_v32 = vsub.f32 1.0, %v3588_v28  ;;  %5819 = vtanh.f32 %v7894_v1 }
 0x359   : > { %v2870_v36 = vadd.f32 %v2869_v56, %v7025_v58  ;;  %v2918_v49 = vpop.f32.mrf.mxu1  ;;  %v3599_v17 = vor.u32 1.1754944e-38, %v3598_v29  ;;  %v3628_v10 = vand.u32 2147483648, %v7171_v22  ;;  %v3626_v50 = vand.u32 2147483647, %v7171_v22 }
 0x35a   : > { %v3007_v55 = vadd.f32 %v3006_v61, %v2958_v54  ;;  %v3590_v60 = vmul.f32 %v5814_v25, %v3589_v32 }
 0x35b   : > { %v7182_v40 = vadd.f32 %v2918_v49, %v2870_v36  ;;  %3064 = vmatmul.bf16.gmra.mxu0 %v6678_v47  ;;  %v3629_v1 = vor.u32 1.1754944e-38, %v3628_v10  ;;  %vm3627_vm5 = vcmp.eq.f32.partialorder %v3626_v50, 8.507059e+37 }
 0x35c   : > { %v5402_v38 = vmul.f32 -1.442695, %v3007_v55  ;;  %3113 = vmatmul.bf16.gmra.mxu1 %v6680_v62  ;;  %v3591_v0 = vadd.f32 %v5814_v25, %v3590_v60 }
 0x35d   : > { %v5818_v63 = vpop.eup %5817 }
 0x35e   : > { %v3618_v6 = vmul.f32 %v5818_v63, %v7171_v22  ;;  %5821 = vpow2.f32 %v5402_v38  ;;  %v3595_v11 = vsel %vm3594_vm0, %v5814_v25, %v3591_v0  ;;  %v5820_v42 = vpop.eup %5819  ;;  %vm3623_vm2 = vweird.f32 %v5818_v63 }
 0x35f   : > { %v2959_v23 = vpop.f32.mrf.mxu2  ;;  %v3008_v34 = vpop.f32.mrf.mxu3  ;;  %v3600_v13 = vsel %vm3597_vm1, %v3599_v17, %v3595_v11  ;;  %5823 = vtanh.f32 %v6876_v59  ;;  %vm3624_vm4 = vmor %vm3622_vm3, %vm3623_vm2 }
 0x360   : > { %v3619_v28 = vsub.f32 1.0, %v3618_v6  ;;  %v2960_v47 = vadd.f32 %v2959_v23, %v7131_v9  ;;  %v2871_v51 = vpop.f32.mrf.mxu0  ;;  %v7189_v62 = vmul.f32 %v5820_v42, %v3600_v13 }
 0x361   : > { %v2872_v44 = vadd.f32 %v2871_v51, %v7025_v58  ;;  %v2920_v16 = vpop.f32.mrf.mxu1 }
 0x362   : > { %v3009_v61 = vadd.f32 %v3008_v34, %v2960_v47  ;;  %v3620_v25 = vmul.f32 %v5818_v63, %v3619_v28 }
 0x363   : > { %v7195_v54 = vadd.f32 %v2920_v16, %v2872_v44 }
 0x364   : > { %v5822_v56 = vpop.eup %5821  ;;  %v5404_v32 = vmul.f32 -1.442695, %v3009_v61  ;;  %3157 = vmatmul.bf16.gmra.mxu2 %v6774_v46  ;;  %3206 = vmatmul.bf16.gmra.mxu3 %v6776_v48  ;;  %v3621_v9 = vadd.f32 %v5818_v63, %v3620_v25 }
 0x365   : > { %v3365_v59 = vadd.f32 1.0, %v5822_v56  ;;  %v5824_v49 = vpop.eup %5823 }
 0x366   : > { %5825 = vpow2.f32 %v5404_v32  ;;  %v3625_v36 = vsel %vm3624_vm4, %v5818_v63, %v3621_v9 }
 0x367   : > { %5827 = vrcp.f32 %v3365_v59  ;;  %v2962_v29 = vpop.f32.mrf.mxu2  ;;  %v3011_v55 = vpop.f32.mrf.mxu3  ;;  %v3630_v60 = vsel %vm3627_vm5, %v3629_v1, %v3625_v36  ;;  %v3688_v47 = vand.u32 2147483648, %v3365_v59  ;;  %v3686_v16 = vand.u32 2147483647, %v3365_v59 }
 0x368   : > { %v2963_v31 = vadd.f32 %v2962_v29, %v7147_v26  ;;  %v7201_v38 = vpop.f32.mrf.mxu0  ;;  %v7203_v46 = vmul.f32 %v5824_v49, %v3630_v60  ;;  %vm3682_vm7 = vweird.f32 %v3365_v59 }
 0x369   : > { %v7205_v48 = vpop.f32.mrf.mxu1  ;;  %vm3687_vm9 = vcmp.eq.f32.partialorder %v3686_v16, 8.507059e+37 }
 0x36a   : > { %v3012_v22 = vadd.f32 %v3011_v55, %v2963_v31 }
 0x36c   : > { %v5826_v0 = vpop.eup %5825  ;;  %v5406_v17 = vmul.f32 -1.442695, %v3012_v22 }
 0x36d   : > { %v5828_v6 = vpop.eup %5827  ;;  %v3367_v11 = vadd.f32 1.0, %v5826_v0 }
 0x36e   : > { %v3678_v63 = vmul.f32 %v5828_v6, %v3365_v59  ;;  %5829 = vpow2.f32 %v5406_v17  ;;  %vm3683_vm6 = vweird.f32 %v5828_v6 }
 0x36f   : > { %5831 = vrcp.f32 %v3367_v11  ;;  %v2964_v42 = vpop.f32.mrf.mxu2  ;;  %v3013_v23 = vpop.f32.mrf.mxu3  ;;  %vm3684_vm8 = vmor %vm3682_vm7, %vm3683_vm6  ;;  %v3718_v55 = vand.u32 2147483648, %v3367_v11  ;;  %v3716_v0 = vand.u32 2147483647, %v3367_v11  ;;  %vm3712_vm11 = vweird.f32 %v3367_v11 }
 0x370   : > { %v3679_v34 = vsub.f32 1.0, %v3678_v63  ;;  %v2965_v13 = vadd.f32 %v2964_v42, %v7166_v35  ;;  %v7208_v26 = vpop.f32.mrf.mxu0  ;;  %5833 = vtanh.f32 %v6892_v19  ;;  %v3689_v19 = vor.u32 1.1754944e-38, %v3688_v47 }
 0x371   : > { %v7211_v28 = vpop.f32.mrf.mxu1  ;;  %vm3717_vm13 = vcmp.eq.f32.partialorder %v3716_v0, 8.507059e+37 }
 0x372   : > { %v3014_v51 = vadd.f32 %v3013_v23, %v2965_v13  ;;  %v3680_v44 = vmul.f32 %v5828_v6, %v3679_v34  ;;  %v3719_v34 = vor.u32 1.1754944e-38, %v3718_v55 }
 0x374   : > { %v5830_v10 = vpop.eup %5829  ;;  %v5408_v61 = vmul.f32 -1.442695, %v3014_v51  ;;  %3162 = vmatmul.bf16.gmra.mxu2 %v6798_v2  ;;  %3211 = vmatmul.bf16.gmra.mxu3 %v6800_v3  ;;  %v3681_v25 = vadd.f32 %v5828_v6, %v3680_v44 }
 0x375   : > { %v5832_v35 = vpop.eup %5831  ;;  %v7215_v50 = vadd.f32 1.0, %v5830_v10 }
 0x376   : > { %v3708_v56 = vmul.f32 %v5832_v35, %v3367_v11  ;;  %5835 = vpow2.f32 %v5408_v61  ;;  %v3685_v32 = vsel %vm3684_vm8, %v5828_v6, %v3681_v25  ;;  %v5834_v9 = vpop.eup %5833  ;;  %vm3713_vm10 = vweird.f32 %v5832_v35 }
 0x377   : > { %5837 = vrcp.f32 %v7215_v50  ;;  %v2967_v1 = vpop.f32.mrf.mxu2  ;;  %v3016_v36 = vpop.f32.mrf.mxu3  ;;  %v3690_v49 = vsel %vm3687_vm9, %v3689_v19, %v3685_v32  ;;  %vm3714_vm12 = vmor %vm3712_vm11, %vm3713_vm10  ;;  %v3746_v32 = vand.u32 2147483647, %v7215_v50  ;;  %vm3742_vm15 = vweird.f32 %v7215_v50 }
 0x378   : > { %v3709_v2 = vsub.f32 1.0, %v3708_v56  ;;  %v2968_v3 = vadd.f32 %v2967_v1, %v7182_v40  ;;  %v7219_v29 = vpop.f32.mrf.mxu0  ;;  %v7221_v59 = vmul.f32 %v5834_v9, %v3690_v49  ;;  %5839 = vtanh.f32 %v6898_v33 }
 0x379   : > { %v7224_v31 = vpop.f32.mrf.mxu1  ;;  %v7227_v40 = vperm.slane %v7022_v37, 3  ;;  %vm3747_vm1 = vcmp.eq.f32.partialorder %v3746_v32, 8.507059e+37 }
 0x37a   : > { %v3017_v60 = vadd.f32 %v3016_v36, %v2968_v3  ;;  %v3710_v22 = vmul.f32 %v5832_v35, %v3709_v2 }
 0x37b   : > { %v3031_v25 = vadd.f32 %v7201_v38, %v7227_v40 }
 0x37c   : > { %v5836_v17 = vpop.eup %5835  ;;  %v5410_v6 = vmul.f32 -1.442695, %v3017_v60  ;;  %v3711_v63 = vadd.f32 %v5832_v35, %v3710_v22 }
 0x37d   : > { %v5838_v42 = vpop.eup %5837  ;;  %v7229_v23 = vadd.f32 1.0, %v5836_v17 }
 0x37e   : > { %v3738_v33 = vmul.f32 %v5838_v42, %v7215_v50  ;;  %5841 = vpow2.f32 %v5410_v6  ;;  %v3715_v13 = vsel %vm3714_vm12, %v5832_v35, %v3711_v63  ;;  %v5840_v47 = vpop.eup %5839  ;;  %v3748_v35 = vand.u32 2147483648, %v7215_v50 }
 0x37f   : > { %5843 = vrcp.f32 %v7229_v23  ;;  %v2969_v51 = vpop.f32.mrf.mxu2  ;;  %v3018_v44 = vpop.f32.mrf.mxu3  ;;  %v3720_v16 = vsel %vm3717_vm13, %v3719_v34, %v3715_v13  ;;  %vm3743_vm14 = vweird.f32 %v5838_v42  ;;  %v3033_v34 = vadd.f32 %v7208_v26, %v7227_v40 }
 0x380   : > { %v3739_v11 = vsub.f32 1.0, %v3738_v33  ;;  %v2970_v10 = vadd.f32 %v2969_v51, %v7195_v54  ;;  %v7234_v37 = vpop.f32.mrf.mxu0  ;;  %v7236_v61 = vmul.f32 %v5840_v47, %v3720_v16  ;;  %5845 = vtanh.f32 %v6907_v53  ;;  %vm3744_vm0 = vmor %vm3742_vm15, %vm3743_vm14 }
 0x381   : > { %v7243_v36 = vpop.f32.mrf.mxu1  ;;  %v3080_v53 = vadd.f32 %v7205_v48, %v3031_v25  ;;  %v3749_v38 = vor.u32 1.1754944e-38, %v3748_v35  ;;  %v3776_v47 = vand.u32 2147483647, %v7229_v23  ;;  %vm3772_vm3 = vweird.f32 %v7229_v23 }
 0x382   : > { %v3019_v19 = vadd.f32 %v3018_v44, %v2970_v10  ;;  %v3740_v56 = vmul.f32 %v5838_v42, %v3739_v11  ;;  %v3082_v10 = vadd.f32 %v7211_v28, %v3033_v34 }
 0x383   : > { %vm3777_vm5 = vcmp.eq.f32.partialorder %v3776_v47, 8.507059e+37 }
 0x384   : > { %v5842_v9 = vpop.eup %5841  ;;  %v5412_v1 = vmul.f32 -1.442695, %v3019_v19  ;;  %v3741_v54 = vadd.f32 %v5838_v42, %v3740_v56 }
 0x385   : > { %v5844_v49 = vpop.eup %5843  ;;  %v7247_v2 = vadd.f32 1.0, %v5842_v9 }
 0x386   : > { %v3768_v3 = vmul.f32 %v5844_v49, %v7229_v23  ;;  %5847 = vpow2.f32 %v5412_v1  ;;  %v3745_v55 = vsel %vm3744_vm0, %v5838_v42, %v3741_v54  ;;  %v5846_v60 = vpop.eup %5845  ;;  %v3778_v42 = vand.u32 2147483648, %v7229_v23 }
 0x387   : > { %5849 = vrcp.f32 %v7247_v2  ;;  %v3128_v22 = vpop.f32.mrf.mxu2  ;;  %v3177_v0 = vpop.f32.mrf.mxu3  ;;  %v3750_v17 = vsel %vm3747_vm1, %v3749_v38, %v3745_v55  ;;  %vm3773_vm2 = vweird.f32 %v5844_v49  ;;  %v3808_v55 = vand.u32 2147483648, %v7247_v2 }
 0x388   : > { %v3769_v6 = vsub.f32 1.0, %v3768_v3  ;;  %v3129_v50 = vadd.f32 %v3128_v22, %v3080_v53  ;;  %v7251_v63 = vpop.f32.mrf.mxu0  ;;  %v7253_v48 = vmul.f32 %v5846_v60, %v3750_v17  ;;  %5851 = vtanh.f32 %v6917_v43  ;;  %vm3774_vm4 = vmor %vm3772_vm3, %vm3773_vm2 }
 0x389   : > { %v3779_v43 = vor.u32 1.1754944e-38, %v3778_v42  ;;  %v7265_v35 = vpop.f32.mrf.mxu1  ;;  %v3036_v53 = vadd.f32 %v7219_v29, %v7227_v40  ;;  %v3806_v60 = vand.u32 2147483647, %v7247_v2  ;;  %vm3802_vm7 = vweird.f32 %v7247_v2 }
 0x38a   : > { %v3178_v33 = vadd.f32 %v3177_v0, %v3129_v50  ;;  %v3770_v13 = vmul.f32 %v5844_v49, %v3769_v6  ;;  %v3809_v42 = vor.u32 1.1754944e-38, %v3808_v55 }
 0x38b   : > { %vm3807_vm9 = vcmp.eq.f32.partialorder %v3806_v60, 8.507059e+37 }
 0x38c   : > { %v5848_v51 = vpop.eup %5847  ;;  %v5383_v44 = vmul.f32 -1.442695, %v3178_v33  ;;  %v3771_v16 = vadd.f32 %v5844_v49, %v3770_v13 }
 0x38d   : > { %v5850_v11 = vpop.eup %5849  ;;  %v7262_v25 = vadd.f32 1.0, %v5848_v51 }
 0x38e   : > { %v3798_v26 = vmul.f32 %v5850_v11, %v7247_v2  ;;  %5853 = vpow2.f32 %v5383_v44  ;;  %v3775_v19 = vsel %vm3774_vm4, %v5844_v49, %v3771_v16  ;;  %v5852_v56 = vpop.eup %5851  ;;  %vm3803_vm6 = vweird.f32 %v5850_v11 }
 0x38f   : > { %5855 = vrcp.f32 %v7262_v25  ;;  %v3130_v32 = vpop.f32.mrf.mxu2  ;;  %v3179_v9 = vpop.f32.mrf.mxu3  ;;  %v3780_v23 = vsel %vm3777_vm5, %v3779_v43, %v3775_v19  ;;  %vm3804_vm8 = vmor %vm3802_vm7, %vm3803_vm6  ;;  %v3836_v19 = vand.u32 2147483647, %v7262_v25  ;;  %vm3832_vm11 = vweird.f32 %v7262_v25 }
 0x390   : > { %v3799_v1 = vsub.f32 1.0, %v3798_v26  ;;  %v3131_v54 = vadd.f32 %v3130_v32, %v3082_v10  ;;  %v7268_v28 = vmul.f32 %v5852_v56, %v3780_v23  ;;  %5857 = vtanh.f32 %v6926_v4  ;;  %v7273_v3 = vpop.f32.mrf.mxu0 }
 0x391   : > { %v3085_v4 = vadd.f32 %v7224_v31, %v3036_v53  ;;  %v7283_v44 = vpop.f32.mrf.mxu1  ;;  %v3038_v31 = vadd.f32 %v7234_v37, %v7227_v40  ;;  %v3838_v26 = vand.u32 2147483648, %v7262_v25  ;;  %vm3837_vm13 = vcmp.eq.f32.partialorder %v3836_v19, 8.507059e+37 }
 0x392   : > { %v3180_v38 = vadd.f32 %v3179_v9, %v3131_v54  ;;  %v3800_v49 = vmul.f32 %v5850_v11, %v3799_v1 }
 0x393   : > { %v3087_v1 = vadd.f32 %v7243_v36, %v3038_v31  ;;  %v3041_v36 = vadd.f32 %v7251_v63, %v7227_v40 }
 0x394   : > { %v5854_v22 = vpop.eup %5853  ;;  %v5385_v0 = vmul.f32 -1.442695, %v3180_v38  ;;  %v3801_v17 = vadd.f32 %v5850_v11, %v3800_v49  ;;  %v3839_v38 = vor.u32 1.1754944e-38, %v3838_v26 }
 0x395   : > { %v5856_v6 = vpop.eup %5855  ;;  %v7279_v50 = vadd.f32 1.0, %v5854_v22 }
 0x396   : > { %v3828_v29 = vmul.f32 %v5856_v6, %v7262_v25  ;;  %5859 = vpow2.f32 %v5385_v0  ;;  %v3805_v34 = vsel %vm3804_vm8, %v5850_v11, %v3801_v17  ;;  %v5858_v33 = vpop.eup %5857  ;;  %vm3833_vm10 = vweird.f32 %v5856_v6 }
 0x397   : > { %5861 = vrcp.f32 %v7279_v50  ;;  %v3133_v13 = vpop.f32.mrf.mxu2  ;;  %v3182_v47 = vpop.f32.mrf.mxu3  ;;  %v3810_v16 = vsel %vm3807_vm9, %v3809_v42, %v3805_v34  ;;  %vm3834_vm12 = vmor %vm3832_vm11, %vm3833_vm10  ;;  %v3403_v17 = vand.u32 2147483648, %v7279_v50  ;;  %vm3397_vm15 = vweird.f32 %v7279_v50 }
 0x398   : > { %v3829_v51 = vsub.f32 1.0, %v3828_v29  ;;  %v3134_v2 = vadd.f32 %v3133_v13, %v3085_v4  ;;  %5863 = vtanh.f32 %v6935_v7  ;;  %v7288_v10 = vmul.f32 %v5858_v33, %v3810_v16  ;;  %v7292_v9 = vpop.f32.mrf.mxu0 }
 0x399   : > { %v7309_v29 = vpop.f32.mrf.mxu1  ;;  %v3401_v33 = vand.u32 2147483647, %v7279_v50  ;;  %v3404_v31 = vor.u32 1.1754944e-38, %v3403_v17 }
 0x39a   : > { %v3183_v11 = vadd.f32 %v3182_v47, %v3134_v2  ;;  %v3830_v43 = vmul.f32 %v5856_v6, %v3829_v51  ;;  %v3090_v2 = vadd.f32 %v7265_v35, %v3041_v36  ;;  %v7895_v35 = vld [vmem:[#allocation35_spill] sm:$0xff] }
 0x39b   : > { %vm3402_vm1 = vcmp.eq.f32.partialorder %v3401_v33, 8.507059e+37 }
 0x39c   : > { %v5860_v56 = vpop.eup %5859  ;;  %v5387_v32 = vmul.f32 -1.442695, %v3183_v11  ;;  %v3831_v23 = vadd.f32 %v5856_v6, %v3830_v43 }
 0x39d   : > { %v5862_v7 = vpop.eup %5861  ;;  %v7296_v37 = vadd.f32 1.0, %v5860_v56 }
 0x39e   : > { %v3393_v54 = vmul.f32 %v5862_v7, %v7279_v50  ;;  %5865 = vpow2.f32 %v5387_v32  ;;  %v3835_v53 = vsel %vm3834_vm12, %v5856_v6, %v3831_v23  ;;  %v5864_v49 = vpop.eup %5863  ;;  %v3889_v6 = vld [vmem:[%s7825_s5] sm:$0x3]  ;;  %vm3398_vm14 = vweird.f32 %v5862_v7 }
 0x39f   : > { %5867 = vrcp.f32 %v7296_v37  ;;  %v3135_v55 = vpop.f32.mrf.mxu2  ;;  %v3184_v60 = vpop.f32.mrf.mxu3  ;;  %v3840_v25 = vsel %vm3837_vm13, %v3839_v38, %v3835_v53  ;;  %v7313_v63 = vperm.slane %v3889_v6, 0  ;;  %vm3399_vm0 = vmor %vm3397_vm15, %vm3398_vm14  ;;  %v7318_v11 = vperm.slane %v3889_v6, 1 }
 0x3a0   : > { %v3136_v22 = vadd.f32 %v3135_v55, %v3087_v1  ;;  %v3394_v0 = vsub.f32 1.0, %v3393_v54  ;;  %5869 = vtanh.f32 %v6946_v57  ;;  %v7307_v4 = vmul.f32 %v5864_v49, %v3840_v25  ;;  %v7321_v26 = vpop.f32.mrf.mxu0 }
 0x3a1   : > { %v3043_v38 = vadd.f32 %v7273_v3, %v7227_v40  ;;  %v3895_v49 = vmul.f32 %v7313_v63, %v7076_v45  ;;  %v3433_v55 = vand.u32 2147483648, %v7296_v37  ;;  %v2857_v25 = vadd.f32 %v7092_v39, %v7025_v58  ;;  %v7334_v17 = vpop.f32.mrf.mxu1 }
 0x3a2   : > { %v3185_v34 = vadd.f32 %v3184_v60, %v3136_v22  ;;  %v3395_v42 = vmul.f32 %v5862_v7, %v3394_v0  ;;  %vm3427_vm3 = vweird.f32 %v7296_v37 }
 0x3a3   : > { %v3092_v33 = vadd.f32 %v7283_v44, %v3043_v38 }
 0x3a4   : > { %v5866_v13 = vpop.eup %5865  ;;  %v5389_v57 = vmul.f32 -1.442695, %v3185_v34  ;;  %v3396_v47 = vadd.f32 %v5862_v7, %v3395_v42  ;;  %v7896_v42 = vld [vmem:[#allocation36_spill] sm:$0xff] }
 0x3a5   : > { %v5868_v51 = vpop.eup %5867  ;;  %v7316_v16 = vadd.f32 1.0, %v5866_v13 }
 0x3a6   : > { %v3423_v43 = vmul.f32 %v5868_v51, %v7296_v37  ;;  %5871 = vpow2.f32 %v5389_v57  ;;  %v3400_v19 = vsel %vm3399_vm0, %v5862_v7, %v3396_v47  ;;  %v5870_v56 = vpop.eup %5869  ;;  %v3431_v7 = vand.u32 2147483647, %v7296_v37 }
 0x3a7   : > { %5873 = vrcp.f32 %v7316_v16  ;;  %v3138_v50 = vpop.f32.mrf.mxu2  ;;  %v3187_v32 = vpop.f32.mrf.mxu3  ;;  %v3405_v23 = vsel %vm3402_vm1, %v3404_v31, %v3400_v19  ;;  %vm3428_vm2 = vweird.f32 %v5868_v51  ;;  %v3434_v57 = vor.u32 1.1754944e-38, %v3433_v55 }
 0x3a8   : > { %5875 = vtanh.f32 %v7895_v35  ;;  %v3424_v1 = vsub.f32 1.0, %v3423_v43  ;;  %v3139_v54 = vadd.f32 %v3138_v50, %v3090_v2  ;;  %v3858_v53 = vmul.f32 %v5870_v56, %v3405_v23  ;;  %vm3429_vm4 = vmor %vm3427_vm3, %vm3428_vm2  ;;  %v7344_v19 = vpop.f32.mrf.mxu0 }
 0x3a9   : > { %5877 = vtanh.f32 %v7896_v42  ;;  %vm3432_vm5 = vcmp.eq.f32.partialorder %v3431_v7, 8.507059e+37  ;;  %v2906_v2 = vadd.f32 %v7097_v27, %v2857_v25  ;;  %v3897_v50 = vmul.f32 %v7313_v63, %v7094_v14 }
 0x3aa   : > { %v3188_v60 = vadd.f32 %v3187_v32, %v3139_v54  ;;  %v3896_v22 = vmul.f32 %v7318_v11, %v3858_v53  ;;  %v3425_v0 = vmul.f32 %v5868_v51, %v3424_v1  ;;  %v3461_v27 = vand.u32 2147483647, %v7316_v16 }
 0x3ab   : > { %v2955_v23 = vadd.f32 %v7156_v5, %v2906_v2  ;;  %v3463_v35 = vand.u32 2147483648, %v7316_v16  ;;  %vm3457_vm7 = vweird.f32 %v7316_v16 }
 0x3ac   : > { %v5872_v36 = vpop.eup %5871  ;;  %v5391_v6 = vmul.f32 -1.442695, %v3188_v60  ;;  %v3927_v3 = vadd.f32 %v3896_v22, %v3895_v49  ;;  %v3426_v34 = vadd.f32 %v5868_v51, %v3425_v0  ;;  %v7897_v49 = vld [vmem:[#allocation37_spill] sm:$0xff]  ;;  %vm3462_vm9 = vcmp.eq.f32.partialorder %v3461_v27, 8.507059e+37 }
 0x3ad   : > { %v5874_v45 = vpop.eup %5873  ;;  %v7339_v13 = vadd.f32 1.0, %v5872_v36  ;;  %v3464_v25 = vor.u32 1.1754944e-38, %v3463_v35 }
 0x3ae   : > { %v5876_v47 = vpop.eup %5875  ;;  %v3453_v58 = vmul.f32 %v5874_v45, %v7316_v16  ;;  %5879 = vpow2.f32 %v5391_v6  ;;  %3928 = vadd.xlane.f32.xlu0 %v3927_v3  ;;  %v3430_v39 = vsel %vm3429_vm4, %v5868_v51, %v3426_v34  ;;  %v3046_v51 = vadd.f32 %v7292_v9, %v7227_v40  ;;  %v7361_v6 = vpop.f32.mrf.mxu1 }
 0x3af   : > { %5881 = vrcp.f32 %v7339_v13  ;;  %v3140_v37 = vpop.f32.mrf.mxu2  ;;  %v3189_v31 = vpop.f32.mrf.mxu3  ;;  %v3435_v43 = vsel %vm3432_vm5, %v3434_v57, %v3430_v39  ;;  %vm3458_vm6 = vweird.f32 %v5874_v45  ;;  %v3004_v9 = vadd.f32 %v7158_v41, %v2955_v23 }
 0x3b0   : > { %v3141_v44 = vadd.f32 %v3140_v37, %v3092_v33  ;;  %v3860_v56 = vmul.f32 %v5876_v47, %v3435_v43  ;;  %v3454_v32 = vsub.f32 1.0, %v3453_v58  ;;  %v5878_v38 = vpop.eup %5877  ;;  %5883 = vtanh.f32 %v7897_v49  ;;  %vm3459_vm8 = vmor %vm3457_vm7, %vm3458_vm6  ;;  %v7370_v37 = vpop.f32.mrf.mxu0 }
 0x3b1   : > { %v3095_v22 = vadd.f32 %v7309_v29, %v3046_v51  ;;  %v3899_v57 = vmul.f32 %v7313_v63, %v7109_v12  ;;  %v5400_v58 = vmul.f32 -1.442695, %v3004_v9  ;;  %v3048_v39 = vadd.f32 %v7321_v26, %v7227_v40 }
 0x3b2   : > { %v3190_v1 = vadd.f32 %v3189_v31, %v3141_v44  ;;  %v3898_v54 = vmul.f32 %v7318_v11, %v3860_v56  ;;  %v3455_v53 = vmul.f32 %v5874_v45, %v3454_v32  ;;  %v3491_v2 = vand.u32 2147483647, %v7339_v13 }
 0x3b3   : > { %vm3487_vm11 = vweird.f32 %v7339_v13  ;;  %v3097_v26 = vadd.f32 %v7334_v17, %v3048_v39 }
 0x3b4   : > { %v5880_v7 = vpop.eup %5879  ;;  %v5393_v14 = vmul.f32 -1.442695, %v3190_v1  ;;  %v3930_v55 = vadd.f32 %v3898_v54, %v3897_v50  ;;  %v3456_v60 = vadd.f32 %v5874_v45, %v3455_v53  ;;  %vm3492_vm13 = vcmp.eq.f32.partialorder %v3491_v2, 8.507059e+37 }
 0x3b5   : > { %v5882_v5 = vpop.eup %5881  ;;  %v7358_v0 = vadd.f32 1.0, %v5880_v7 }
 0x3b6   : > { %v3483_v36 = vmul.f32 %v5882_v5, %v7339_v13  ;;  %5885 = vpow2.f32 %v5393_v14  ;;  %3931 = vadd.xlane.f32.xlu0 %v3930_v55  ;;  %v3460_v3 = vsel %vm3459_vm8, %v5874_v45, %v3456_v60  ;;  %v5884_v47 = vpop.eup %5883  ;;  %v3493_v45 = vand.u32 2147483648, %v7339_v13  ;;  %v7898_v13 = vld [vmem:[#allocation38_spill] sm:$0xff]  ;;  %v3101_v49 = vpop.f32.mrf.mxu1 }
 0x3b7   : > { %5887 = vrcp.f32 %v7358_v0  ;;  %v3143_v16 = vpop.f32.mrf.mxu2  ;;  %v3192_v34 = vpop.f32.mrf.mxu3  ;;  %v3465_v42 = vsel %vm3462_vm9, %v3464_v25, %v3460_v3  ;;  %vm3488_vm10 = vweird.f32 %v5882_v5  ;;  %v3051_v55 = vadd.f32 %v7344_v19, %v7227_v40 }
 0x3b8   : > { %v3484_v41 = vsub.f32 1.0, %v3483_v36  ;;  %v3144_v33 = vadd.f32 %v3143_v16, %v3095_v22  ;;  %v3862_v29 = vmul.f32 %v5878_v38, %v3465_v42  ;;  %5889 = vpow2.f32 %v5400_v58  ;;  %vm3489_vm12 = vmor %vm3487_vm11, %vm3488_vm10 }
 0x3b9   : > { %v3494_v27 = vor.u32 1.1754944e-38, %v3493_v45  ;;  %v3901_v60 = vmul.f32 %v7313_v63, %v7125_v21  ;;  %v3523_v9 = vand.u32 2147483648, %v7358_v0  ;;  %vm3517_vm15 = vweird.f32 %v7358_v0 }
 0x3ba   : > { %v3193_v31 = vadd.f32 %v3192_v34, %v3144_v33  ;;  %v3900_v43 = vmul.f32 %v7318_v11, %v3862_v29  ;;  %v3485_v44 = vmul.f32 %v5882_v5, %v3484_v41  ;;  %v3055_v34 = vpop.f32.mrf.mxu0  ;;  %v3100_v21 = vadd.f32 %v7361_v6, %v3051_v55 }
 0x3bc   : > { %v5886_v56 = vpop.eup %5885  ;;  %v5395_v50 = vmul.f32 -1.442695, %v3193_v31  ;;  %v3933_v32 = vadd.f32 %v3900_v43, %v3899_v57  ;;  %v3486_v12 = vadd.f32 %v5882_v5, %v3485_v44  ;;  %v3524_v57 = vor.u32 1.1754944e-38, %v3523_v9  ;;  %v7899_v43 = vld [vmem:[#allocation39_spill] sm:$0xff] }
 0x3bd   : > { %v5888_v23 = vpop.eup %5887  ;;  %v7375_v51 = vadd.f32 1.0, %v5886_v56 }
 0x3be   : > { %v3513_v35 = vmul.f32 %v5888_v23, %v7358_v0  ;;  %5891 = vpow2.f32 %v5395_v50  ;;  %3934 = vadd.xlane.f32.xlu1 %v3933_v32  ;;  %v3490_v1 = vsel %vm3489_vm12, %v5882_v5, %v3486_v12  ;;  %v3521_v5 = vand.u32 2147483647, %v7358_v0  ;;  %v5890_v3 = vpop.eup %5889 }
 0x3bf   : > { %5893 = vrcp.f32 %v7375_v51  ;;  %v3145_v54 = vpop.f32.mrf.mxu2  ;;  %v3194_v53 = vpop.f32.mrf.mxu3  ;;  %v3495_v38 = vsel %vm3492_vm13, %v3494_v27, %v3490_v1  ;;  %vm3518_vm14 = vweird.f32 %v5888_v23  ;;  %v7392_v2 = vadd.f32 1.0, %v5890_v3 }
 0x3c0   : > { %5895 = vtanh.f32 %v7898_v13  ;;  %v3146_v7 = vadd.f32 %v3145_v54, %v3097_v26  ;;  %v3864_v17 = vmul.f32 %v5884_v47, %v3495_v38  ;;  %v3514_v14 = vsub.f32 1.0, %v3513_v35  ;;  %vm3519_vm0 = vmor %vm3517_vm15, %vm3518_vm14  ;;  %v3104_v26 = vpop.f32.mrf.mxu1 }
 0x3c1   : > { %vm3522_vm1 = vcmp.eq.f32.partialorder %v3521_v5, 8.507059e+37  ;;  %v3053_v50 = vadd.f32 %v7370_v37, %v7227_v40  ;;  %v3903_v32 = vmul.f32 %v7313_v63, %v7141_v20  ;;  %v3551_v12 = vand.u32 2147483647, %v7375_v51  ;;  %v7900_v20 = vld [vmem:[#allocation34_spill] sm:$0xff] }
 0x3c2   : > { %v3195_v22 = vadd.f32 %v3194_v53, %v3146_v7  ;;  %v3902_v25 = vmul.f32 %v7318_v11, %v3864_v17  ;;  %v3515_v36 = vmul.f32 %v5888_v23, %v3514_v14  ;;  %vm3547_vm3 = vweird.f32 %v7375_v51  ;;  %v3057_v5 = vpop.f32.mrf.mxu0 }
 0x3c3   : > { %v3102_v7 = vadd.f32 %v3101_v49, %v3053_v50  ;;  %vm3552_vm5 = vcmp.eq.f32.partialorder %v3551_v12, 8.507059e+37 }
 0x3c4   : > { %v5892_v16 = vpop.eup %5891  ;;  %v5397_v42 = vmul.f32 -1.442695, %v3195_v22  ;;  %v3936_v41 = vadd.f32 %v3902_v25, %v3901_v60  ;;  %v3516_v33 = vadd.f32 %v5888_v23, %v3515_v36  ;;  %v7901_v36 = vld [vmem:[#allocation40_spill] sm:$0xff] }
 0x3c5   : > { %v5894_v19 = vpop.eup %5893  ;;  %v7389_v29 = vadd.f32 1.0, %v5892_v16 }
 0x3c6   : > { %v5896_v47 = vpop.eup %5895  ;;  %v3543_v58 = vmul.f32 %v5894_v19, %v7375_v51  ;;  %5897 = vpow2.f32 %v5397_v42  ;;  %3937 = vadd.xlane.f32.xlu1 %v3936_v41  ;;  %v3520_v39 = vsel %vm3519_vm0, %v5888_v23, %v3516_v33  ;;  %v3553_v23 = vand.u32 2147483648, %v7375_v51 }
 0x3c7   : > { %5899 = vrcp.f32 %v7389_v29  ;;  %v3148_v45 = vpop.f32.mrf.mxu2  ;;  %v3197_v0 = vpop.f32.mrf.mxu3  ;;  %v3525_v31 = vsel %vm3522_vm1, %v3524_v57, %v3520_v39  ;;  %vm3548_vm2 = vweird.f32 %v5894_v19  ;;  %v3056_v41 = vadd.f32 %v3055_v34, %v7227_v40 }
 0x3c8   : > { %5901 = vtanh.f32 %v7899_v43  ;;  %v3544_v6 = vsub.f32 1.0, %v3543_v58  ;;  %v3149_v44 = vadd.f32 %v3148_v45, %v3100_v21  ;;  %v3866_v56 = vmul.f32 %v5896_v47, %v3525_v31  ;;  %vm3549_vm4 = vmor %vm3547_vm3, %vm3548_vm2  ;;  %v7902_v45 = vld [vmem:[#allocation41_spill] sm:$0xff]  ;;  %v3106_v31 = vpop.f32.mrf.mxu1 }
 0x3c9   : > { %5903 = vrcp.f32 %v7392_v2  ;;  %v3554_v14 = vor.u32 1.1754944e-38, %v3553_v23  ;;  %v3905_v33 = vmul.f32 %v7313_v63, %v7160_v18  ;;  %v3583_v21 = vand.u32 2147483648, %v7389_v29 }
 0x3ca   : > { %v3198_v27 = vadd.f32 %v3197_v0, %v3149_v44  ;;  %v3904_v35 = vmul.f32 %v7318_v11, %v3866_v56  ;;  %v3545_v1 = vmul.f32 %v5894_v19, %v3544_v6  ;;  %5905 = vtanh.f32 %v7900_v20 }
 0x3cb   : > { %vm3577_vm7 = vweird.f32 %v7389_v29  ;;  %v3105_v56 = vadd.f32 %v3104_v26, %v3056_v41  ;;  %vm3652_vm0 = vweird.f32 %v7392_v2 }
 0x3cc   : > { %v5898_v54 = vpop.eup %5897  ;;  %v5399_v53 = vmul.f32 -1.442695, %v3198_v27  ;;  %v3939_v38 = vadd.f32 %v3904_v35, %v3903_v32  ;;  %v3546_v13 = vadd.f32 %v5894_v19, %v3545_v1  ;;  %v3584_v32 = vor.u32 1.1754944e-38, %v3583_v21 }
 0x3cd   : > { %v5900_v37 = vpop.eup %5899  ;;  %v7406_v17 = vadd.f32 1.0, %v5898_v54 }
 0x3ce   : > { %v5902_v55 = vpop.eup %5901  ;;  %v3573_v60 = vmul.f32 %v5900_v37, %v7389_v29  ;;  %5907 = vpow2.f32 %v5399_v53  ;;  %3940 = vadd.xlane.f32.xlu2 %v3939_v38  ;;  %v3550_v9 = vsel %vm3549_vm4, %v5894_v19, %v3546_v13  ;;  %v3581_v19 = vand.u32 2147483647, %v7389_v29  ;;  %v3060_v53 = vpop.f32.mrf.mxu0 }
 0x3cf   : > { %5909 = vrcp.f32 %v7406_v17  ;;  %v3150_v22 = vpop.f32.mrf.mxu2  ;;  %v3199_v51 = vpop.f32.mrf.mxu3  ;;  %v3555_v25 = vsel %vm3552_vm5, %v3554_v14, %v3550_v9  ;;  %vm3578_vm6 = vweird.f32 %v5900_v37  ;;  %v3907_v13 = vmul.f32 %v7313_v63, %v7176_v30 }
 0x3d0   : > { %5911 = vtanh.f32 %v7901_v36  ;;  %v3574_v49 = vsub.f32 1.0, %v3573_v60  ;;  %v3151_v3 = vadd.f32 %v3150_v22, %v3102_v7  ;;  %v3868_v16 = vmul.f32 %v5902_v55, %v3555_v25  ;;  %v7411_v42 = vpop.eup %5903  ;;  %vm3579_vm8 = vmor %vm3577_vm7, %vm3578_vm6  ;;  %v3109_v21 = vpop.f32.mrf.mxu1 }
 0x3d1   : > { %v7419_v39 = vpop.eup %5905  ;;  %5913 = vtanh.f32 %v7902_v45  ;;  %v3648_v44 = vmul.f32 %v7411_v42, %v7392_v2  ;;  %vm3582_vm9 = vcmp.eq.f32.partialorder %v3581_v19, 8.507059e+37  ;;  %v3058_v7 = vadd.f32 %v3057_v5, %v7227_v40 }
 0x3d2   : > { %v3200_v57 = vadd.f32 %v3199_v51, %v3151_v3  ;;  %v3906_v47 = vmul.f32 %v7318_v11, %v3868_v16  ;;  %v3575_v58 = vmul.f32 %v5900_v37, %v3574_v49  ;;  %v3611_v14 = vand.u32 2147483647, %v7406_v17  ;;  %v7903_v51 = vld [vmem:[#allocation42_spill] sm:$0xff] }
 0x3d3   : > { %v3649_v55 = vsub.f32 1.0, %v3648_v44  ;;  %vm3607_vm11 = vweird.f32 %v7406_v17  ;;  %v3107_v5 = vadd.f32 %v3106_v31, %v3058_v7  ;;  %v3909_v45 = vmul.f32 %v7313_v63, %v7189_v62  ;;  %v7904_v62 = vld [vmem:[#allocation43_spill] sm:$0xff] }
 0x3d4   : > { %v5908_v0 = vpop.eup %5907  ;;  %v5401_v43 = vmul.f32 -1.442695, %v3200_v57  ;;  %v3942_v34 = vadd.f32 %v3906_v47, %v3905_v33  ;;  %v3576_v6 = vadd.f32 %v5900_v37, %v3575_v58  ;;  %vm3612_vm13 = vcmp.eq.f32.partialorder %v3611_v14, 8.507059e+37 }
 0x3d5   : > { %v5910_v18 = vpop.eup %5909  ;;  %v7425_v50 = vadd.f32 1.0, %v5908_v0  ;;  %v3650_v33 = vmul.f32 %v7411_v42, %v3649_v55  ;;  %vm3653_vm14 = vweird.f32 %v7411_v42 }
 0x3d6   : > { %v5912_v12 = vpop.eup %5911  ;;  %v3603_v23 = vmul.f32 %v5910_v18, %v7406_v17  ;;  %5915 = vpow2.f32 %v5401_v43  ;;  %3943 = vadd.xlane.f32.xlu2 %v3942_v34  ;;  %v3580_v27 = vsel %vm3579_vm8, %v5900_v37, %v3576_v6  ;;  %v3613_v37 = vand.u32 2147483648, %v7406_v17  ;;  %vm7457_vm2 = vmor %vm3652_vm0, %vm3653_vm14 }
 0x3d7   : > { %5917 = vrcp.f32 %v7425_v50  ;;  %v3153_v35 = vpop.f32.mrf.mxu2  ;;  %v3202_v29 = vpop.f32.mrf.mxu3  ;;  %v3585_v1 = vsel %vm3582_vm9, %v3584_v32, %v3580_v27  ;;  %vm3608_vm10 = vweird.f32 %v5910_v18  ;;  %v3061_v6 = vadd.f32 %v3060_v53, %v7227_v40 }
 0x3d8   : > { %v3604_v54 = vsub.f32 1.0, %v3603_v23  ;;  %v3154_v38 = vadd.f32 %v3153_v35, %v3105_v56  ;;  %v3870_v26 = vmul.f32 %v5912_v12, %v3585_v1  ;;  %v5914_v20 = vpop.eup %5913  ;;  %5919 = vtanh.f32 %v7903_v51  ;;  %vm3609_vm12 = vmor %vm3607_vm11, %vm3608_vm10  ;;  %v3062_v32 = vpop.f32.mrf.mxu0 }
 0x3d9   : > { %v3614_v41 = vor.u32 1.1754944e-38, %v3613_v37  ;;  %v3641_v44 = vand.u32 2147483647, %v7425_v50  ;;  %v3651_v56 = vadd.f32 %v7411_v42, %v3650_v33  ;;  %v3656_v35 = vand.u32 2147483647, %v7392_v2 }
 0x3da   : > { %v3203_v60 = vadd.f32 %v3202_v29, %v3154_v38  ;;  %v3908_v9 = vmul.f32 %v7318_v11, %v3870_v26  ;;  %v3605_v22 = vmul.f32 %v5910_v18, %v3604_v54  ;;  %v3658_v29 = vand.u32 2147483648, %v7392_v2 }
 0x3db   : > { %vm3637_vm1 = vweird.f32 %v7425_v50  ;;  %v3655_v2 = vsel %vm7457_vm2, %v7411_v42, %v3651_v56  ;;  %vm3642_vm4 = vcmp.eq.f32.partialorder %v3641_v44, 8.507059e+37  ;;  %vm3657_vm5 = vcmp.eq.f32.partialorder %v3656_v35, 8.507059e+37 }
 0x3dc   : > { %v5916_v25 = vpop.eup %5915  ;;  %v5403_v36 = vmul.f32 -1.442695, %v3203_v60  ;;  %v3945_v49 = vadd.f32 %v3908_v9, %v3907_v13  ;;  %v3606_v3 = vadd.f32 %v5910_v18, %v3605_v22  ;;  %v3659_v22 = vor.u32 1.1754944e-38, %v3658_v29 }
 0x3dd   : > { %v5918_v30 = vpop.eup %5917  ;;  %v7437_v16 = vadd.f32 1.0, %v5916_v25  ;;  %v3111_v25 = vpop.f32.mrf.mxu1  ;;  %v3911_v42 = vmul.f32 %v7313_v63, %v7203_v46 }
 0x3de   : > { %v3633_v19 = vmul.f32 %v5918_v30, %v7425_v50  ;;  %5921 = vpow2.f32 %v5403_v36  ;;  %3946 = vadd.xlane.f32.xlu0 %v3945_v49  ;;  %v3610_v57 = vsel %vm3609_vm12, %v5910_v18, %v3606_v3  ;;  %v5920_v34 = vpop.eup %5919  ;;  %v3643_v18 = vand.u32 2147483648, %v7425_v50 }
 0x3df   : > { %5923 = vrcp.f32 %v7437_v16  ;;  %v3155_v47 = vpop.f32.mrf.mxu2  ;;  %v3204_v58 = vpop.f32.mrf.mxu3  ;;  %v3615_v17 = vsel %vm3612_vm13, %v3614_v41, %v3610_v57  ;;  %vm3638_vm15 = vweird.f32 %v5918_v30  ;;  %v3660_v41 = vsel %vm3657_vm5, %v3659_v22, %v3655_v2 }
 0x3e0   : > { %v3634_v0 = vsub.f32 1.0, %v3633_v19  ;;  %v3156_v31 = vadd.f32 %v3155_v47, %v3107_v5  ;;  %v3872_v43 = vmul.f32 %v5914_v20, %v3615_v17  ;;  %5925 = vtanh.f32 %v7904_v62  ;;  %vm3639_vm3 = vmor %vm3637_vm1, %vm3638_vm15 }
 0x3e1   : > { %v3110_v20 = vadd.f32 %v3109_v21, %v3061_v6  ;;  %v3644_v14 = vor.u32 1.1754944e-38, %v3643_v18  ;;  %v3063_v5 = vadd.f32 %v3062_v32, %v7227_v40  ;;  %v3673_v33 = vand.u32 2147483648, %v7437_v16 }
 0x3e2   : > { %v3205_v12 = vadd.f32 %v3204_v58, %v3156_v31  ;;  %v3910_v23 = vmul.f32 %v7318_v11, %v3872_v43  ;;  %v3635_v27 = vmul.f32 %v5918_v30, %v3634_v0  ;;  %v3065_v58 = vpop.f32.mrf.mxu0  ;;  %vm3667_vm7 = vweird.f32 %v7437_v16 }
 0x3e3   : > { %v3112_v31 = vadd.f32 %v3111_v25, %v3063_v5  ;;  %v3875_v6 = vmul.f32 %v7419_v39, %v3660_v41  ;;  %v3066_v35 = vadd.f32 %v3065_v58, %v7227_v40 }
 0x3e4   : > { %v5922_v1 = vpop.eup %5921  ;;  %v5405_v54 = vmul.f32 -1.442695, %v3205_v12  ;;  %v3948_v53 = vadd.f32 %v3910_v23, %v3909_v45  ;;  %v3636_v38 = vadd.f32 %v5918_v30, %v3635_v27 }
 0x3e5   : > { %v5924_v13 = vpop.eup %5923  ;;  %v7461_v7 = vadd.f32 1.0, %v5922_v1  ;;  %v3913_v39 = vmul.f32 %v7313_v63, %v3875_v6 }
 0x3e6   : > { %v3663_v37 = vmul.f32 %v5924_v13, %v7437_v16  ;;  %5927 = vpow2.f32 %v5405_v54  ;;  %3949 = vadd.xlane.f32.xlu1 %v3948_v53  ;;  %v3640_v50 = vsel %vm3639_vm3, %v5918_v30, %v3636_v38  ;;  %v5926_v3 = vpop.eup %5925  ;;  %v3671_v30 = vand.u32 2147483647, %v7437_v16  ;;  %v7907_v16 = vld [vmem:[#allocation44_spill] sm:$0xff]  ;;  %v3114_v54 = vpop.f32.mrf.mxu1 }
 0x3e7   : > { %5929 = vrcp.f32 %v7461_v7  ;;  %v3158_v55 = vpop.f32.mrf.mxu2  ;;  %v3207_v60 = vpop.f32.mrf.mxu3  ;;  %v3645_v9 = vsel %vm3642_vm4, %v3644_v14, %v3640_v50  ;;  %vm3668_vm6 = vweird.f32 %v5924_v13  ;;  %v3701_v29 = vand.u32 2147483647, %v7461_v7 }
 0x3e8   : > { %v3664_v51 = vsub.f32 1.0, %v3663_v37  ;;  %v3159_v36 = vadd.f32 %v3158_v55, %v3110_v20  ;;  %v3874_v49 = vmul.f32 %v5920_v34, %v3645_v9  ;;  %vm3669_vm8 = vmor %vm3667_vm7, %vm3668_vm6  ;;  %v3674_v34 = vor.u32 1.1754944e-38, %v3673_v33 }
 0x3e9   : > { %vm3672_vm9 = vcmp.eq.f32.partialorder %v3671_v30, 8.507059e+37  ;;  %v3703_v1 = vand.u32 2147483648, %v7461_v7  ;;  %vm3697_vm11 = vweird.f32 %v7461_v7  ;;  %v3115_v50 = vadd.f32 %v3114_v54, %v3066_v35 }
 0x3ea   : > { %v3208_v19 = vadd.f32 %v3207_v60, %v3159_v36  ;;  %v3912_v21 = vmul.f32 %v7318_v11, %v3874_v49  ;;  %v3665_v57 = vmul.f32 %v5924_v13, %v3664_v51  ;;  %v3067_v51 = vpop.f32.mrf.mxu0  ;;  %vm3702_vm13 = vcmp.eq.f32.partialorder %v3701_v29, 8.507059e+37 }
 0x3eb   : > { %v3704_v60 = vor.u32 1.1754944e-38, %v3703_v1  ;;  %v3068_v30 = vadd.f32 %v3067_v51, %v7227_v40  ;;  %v3915_v33 = vmul.f32 %v7313_v63, %v7221_v59 }
 0x3ec   : > { %v5928_v47 = vpop.eup %5927  ;;  %v5407_v17 = vmul.f32 -1.442695, %v3208_v19  ;;  %v3951_v45 = vadd.f32 %v3912_v21, %v3911_v42  ;;  %v3666_v0 = vadd.f32 %v5924_v13, %v3665_v57 }
 0x3ed   : > { %v5930_v46 = vpop.eup %5929  ;;  %v7475_v43 = vadd.f32 1.0, %v5928_v47 }
 0x3ee   : > { %v3693_v44 = vmul.f32 %v5930_v46, %v7461_v7  ;;  %5931 = vpow2.f32 %v5407_v17  ;;  %3952 = vadd.xlane.f32.xlu2 %v3951_v45  ;;  %v3670_v18 = vsel %vm3669_vm8, %v5924_v13, %v3666_v0  ;;  %vm3698_vm10 = vweird.f32 %v5930_v46  ;;  %v7908_v7 = vld [vmem:[#allocation45_spill] sm:$0xff]  ;;  %v3116_v45 = vpop.f32.mrf.mxu1 }
 0x3ef   : > { %5933 = vrcp.f32 %v7475_v43  ;;  %v3160_v56 = vpop.f32.mrf.mxu2  ;;  %v3209_v32 = vpop.f32.mrf.mxu3  ;;  %v3675_v12 = vsel %vm3672_vm9, %v3674_v34, %v3670_v18  ;;  %vm3699_vm12 = vmor %vm3697_vm11, %vm3698_vm10  ;;  %v3731_v19 = vand.u32 2147483647, %v7475_v43  ;;  %v3733_v21 = vand.u32 2147483648, %v7475_v43 }
 0x3f0   : > { %5935 = vtanh.f32 %v7907_v16  ;;  %v3694_v23 = vsub.f32 1.0, %v3693_v44  ;;  %v3161_v27 = vadd.f32 %v3160_v56, %v3112_v31  ;;  %v3876_v62 = vmul.f32 %v5926_v3, %v3675_v12 }
 0x3f1   : > { %vm3727_vm15 = vweird.f32 %v7475_v43  ;;  %v3117_v34 = vadd.f32 %v3116_v45, %v3068_v30  ;;  %v3734_v59 = vor.u32 1.1754944e-38, %v3733_v21  ;;  %vm3732_vm1 = vcmp.eq.f32.partialorder %v3731_v19, 8.507059e+37 }
 0x3f2   : > { %v3210_v53 = vadd.f32 %v3209_v32, %v3161_v27  ;;  %v3914_v38 = vmul.f32 %v7318_v11, %v3876_v62  ;;  %v3695_v26 = vmul.f32 %v5930_v46, %v3694_v23  ;;  %v3917_v62 = vmul.f32 %v7313_v63, %v7236_v61 }
 0x3f4   : > { %v5932_v13 = vpop.eup %5931  ;;  %v5409_v20 = vmul.f32 -1.442695, %v3210_v53  ;;  %v3954_v14 = vadd.f32 %v3914_v38, %v3913_v39  ;;  %v3696_v2 = vadd.f32 %v5930_v46, %v3695_v26 }
 0x3f5   : > { %v5934_v37 = vpop.eup %5933  ;;  %v7487_v55 = vadd.f32 1.0, %v5932_v13 }
 0x3f6   : > { %v5936_v9 = vpop.eup %5935  ;;  %v3723_v22 = vmul.f32 %v5934_v37, %v7475_v43  ;;  %5937 = vpow2.f32 %v5409_v20  ;;  %3955 = vadd.xlane.f32.xlu0 %v3954_v14  ;;  %v3700_v25 = vsel %vm3699_vm12, %v5930_v46, %v3696_v2  ;;  %vm3728_vm14 = vweird.f32 %v5934_v37 }
 0x3f7   : > { %5939 = vrcp.f32 %v7487_v55  ;;  %v3163_v36 = vpop.f32.mrf.mxu2  ;;  %v3212_v49 = vpop.f32.mrf.mxu3  ;;  %v3705_v42 = vsel %vm3702_vm13, %v3704_v60, %v3700_v25  ;;  %vm3729_vm0 = vmor %vm3727_vm15, %vm3728_vm14  ;;  %v3761_v35 = vand.u32 2147483647, %v7487_v55  ;;  %v3763_v39 = vand.u32 2147483648, %v7487_v55 }
 0x3f8   : > { %5941 = vtanh.f32 %v7908_v7  ;;  %v3724_v3 = vsub.f32 1.0, %v3723_v22  ;;  %v3164_v5 = vadd.f32 %v3163_v36, %v3115_v50  ;;  %v3878_v41 = vmul.f32 %v5936_v9, %v3705_v42 }
 0x3f9   : > { %vm3757_vm3 = vweird.f32 %v7487_v55  ;;  %v3764_v14 = vor.u32 1.1754944e-38, %v3763_v39  ;;  %vm3762_vm5 = vcmp.eq.f32.partialorder %v3761_v35, 8.507059e+37  ;;  %v3919_v22 = vmul.f32 %v7313_v63, %v7253_v48 }
 0x3fa   : > { %v3213_v57 = vadd.f32 %v3212_v49, %v3164_v5  ;;  %v3916_v47 = vmul.f32 %v7318_v11, %v3878_v41  ;;  %v3725_v58 = vmul.f32 %v5934_v37, %v3724_v3 }
 0x3fc   : > { %v5938_v17 = vpop.eup %5937  ;;  %v5411_v0 = vmul.f32 -1.442695, %v3213_v57  ;;  %v3957_v46 = vadd.f32 %v3916_v47, %v3915_v33  ;;  %v3726_v31 = vadd.f32 %v5934_v37, %v3725_v58  ;;  %v3921_v57 = vmul.f32 %v7313_v63, %v7268_v28 }
 0x3fd   : > { %v5940_v40 = vpop.eup %5939  ;;  %v3372_v6 = vadd.f32 1.0, %v5938_v17 }
 0x3fe   : > { %v5942_v44 = vpop.eup %5941  ;;  %v3753_v18 = vmul.f32 %v5940_v40, %v7487_v55  ;;  %5943 = vpow2.f32 %v5411_v0  ;;  %3958 = vadd.xlane.f32.xlu1 %v3957_v46  ;;  %v3730_v56 = vsel %vm3729_vm0, %v5934_v37, %v3726_v31  ;;  %vm3758_vm2 = vweird.f32 %v5940_v40 }
 0x3ff   : > { %5945 = vrcp.f32 %v3372_v6  ;;  %v3165_v32 = vpop.f32.mrf.mxu2  ;;  %v3735_v12 = vsel %vm3732_vm1, %v3734_v59, %v3730_v56  ;;  %v3214_v43 = vpop.f32.mrf.mxu3  ;;  %vm3759_vm4 = vmor %vm3757_vm3, %vm3758_vm2  ;;  %v3793_v55 = vand.u32 2147483648, %v3372_v6  ;;  %v3791_v36 = vand.u32 2147483647, %v3372_v6 }
 0x400   : > { %v3754_v16 = vsub.f32 1.0, %v3753_v18  ;;  %v3166_v23 = vadd.f32 %v3165_v32, %v3117_v34  ;;  %v3880_v27 = vmul.f32 %v5942_v44, %v3735_v12  ;;  %5947 = vtanh.f32 %v7028_v15 }
 0x401   : > { %vm3787_vm7 = vweird.f32 %v3372_v6  ;;  %v3794_v41 = vor.u32 1.1754944e-38, %v3793_v55  ;;  %vm3792_vm9 = vcmp.eq.f32.partialorder %v3791_v36, 8.507059e+37  ;;  %v3923_v18 = vmul.f32 %v7313_v63, %v7288_v10 }
 0x402   : > { %v3215_v29 = vadd.f32 %v3214_v43, %v3166_v23  ;;  %v3918_v1 = vmul.f32 %v7318_v11, %v3880_v27  ;;  %v3755_v54 = vmul.f32 %v5940_v40, %v3754_v16  ;;  %v3925_v10 = vmul.f32 %v7313_v63, %v7307_v4 }
 0x403   : > { %vm4029_vm2 = vcmask 1040384   ;;  %vm4052_vm3 = vcmask 0  }
 0x404   : > { %v5944_v53 = vpop.eup %5943  ;;  %v5413_v38 = vmul.f32 -1.442695, %v3215_v29  ;;  %v3960_v26 = vadd.f32 %v3918_v1, %v3917_v62  ;;  %v3756_v13 = vadd.f32 %v5940_v40, %v3755_v54 }
 0x405   : > { %v5946_v15 = vpop.eup %5945  ;;  %v3374_v20 = vadd.f32 1.0, %v5944_v53  ;;  %v5768_v53 = vld [vmem:[#allocation5] ss:$0 sm:$0xff] }
 0x406   : > { %v3783_v61 = vmul.f32 %v5946_v15, %v3372_v6  ;;  %5949 = vpow2.f32 %v5413_v38  ;;  %3961 = vadd.xlane.f32.xlu2 %v3960_v26  ;;  %v3760_v2 = vsel %vm3759_vm4, %v5940_v40, %v3756_v13  ;;  %v5948_v37 = vpop.eup %5947  ;;  %vm3788_vm6 = vweird.f32 %v5946_v15 }
 0x407   : > { %5951 = vrcp.f32 %v3374_v20  ;;  %v3765_v50 = vsel %vm3762_vm5, %v3764_v14, %v3760_v2  ;;  %vm3789_vm8 = vmor %vm3787_vm7, %vm3788_vm6  ;;  %v3823_v47 = vand.u32 2147483648, %v3374_v20  ;;  %v3821_v45 = vand.u32 2147483647, %v3374_v20 }
 0x408   : > { %v3784_v60 = vsub.f32 1.0, %v3783_v61  ;;  %v3882_v9 = vmul.f32 %v5948_v37, %v3765_v50  ;;  %5953 = vtanh.f32 %v7033_v8  ;;  %vm3817_vm11 = vweird.f32 %v3374_v20 }
 0x409   : > { %v3824_v40 = vor.u32 1.1754944e-38, %v3823_v47  ;;  %vm3822_vm13 = vcmp.eq.f32.partialorder %v3821_v45, 8.507059e+37  ;;  %v6223_v47 = vmov 0   ;;  %vm4123_vm4 = vcmask 1042434  }
 0x40a   : > { %v3920_v51 = vmul.f32 %v7318_v11, %v3882_v9  ;;  %v3785_v25 = vmul.f32 %v5946_v15, %v3784_v60  ;;  %5766 = vset.pattern.permute.xlu0 %v6223_v47  ;;  %5767 = vset.pattern.permute.xlu2 %v6223_v47  ;;  %vm4125_vm5 = vcmask 1041408  }
 0x40c   : > { %v5950_v49 = vpop.eup %5949  ;;  %v3963_v42 = vadd.f32 %v3920_v51, %v3919_v22  ;;  %v3786_v7 = vadd.f32 %v5946_v15, %v3785_v25 }
 0x40d   : > { %v5952_v3 = vpop.eup %5951  ;;  %v3376_v5 = vadd.f32 1.0, %v5950_v49 }
 0x40e   : > { %v3813_v30 = vmul.f32 %v5952_v3, %v3374_v20  ;;  %3964 = vadd.xlane.f32.xlu0 %v3963_v42  ;;  %v3790_v8 = vsel %vm3789_vm8, %v5946_v15, %v3786_v7  ;;  %v5954_v33 = vpop.eup %5953  ;;  %vm3818_vm10 = vweird.f32 %v5952_v3 }
 0x40f   : > { %5955 = vrcp.f32 %v3376_v5  ;;  %v3795_v48 = vsel %vm3792_vm9, %v3794_v41, %v3790_v8  ;;  %vm3819_vm12 = vmor %vm3817_vm11, %vm3818_vm10  ;;  %v3853_v56 = vand.u32 2147483648, %v3376_v5  ;;  %v3851_v16 = vand.u32 2147483647, %v3376_v5 }
 0x410   : > { %v3814_v19 = vsub.f32 1.0, %v3813_v30  ;;  %v3884_v21 = vmul.f32 %v5954_v33, %v3795_v48  ;;  %5957 = vtanh.f32 %v7038_v52  ;;  %vm3847_vm15 = vweird.f32 %v3376_v5 }
 0x411   : > { %5959 = vtanh.f32 %v7043_v24  ;;  %v3854_v43 = vor.u32 1.1754944e-38, %v3853_v56  ;;  %vm3852_vm1 = vcmp.eq.f32.partialorder %v3851_v16, 8.507059e+37  ;;  %v4046_v56 = vld [vmem:[#allocation3] sm:$0x1] }
 0x412   : > { %v3922_v58 = vmul.f32 %v7318_v11, %v3884_v21  ;;  %v3815_v17 = vmul.f32 %v5952_v3, %v3814_v19 }
 0x414   : > { %v3966_v0 = vadd.f32 %v3922_v58, %v3921_v57  ;;  %v3816_v46 = vadd.f32 %v5952_v3, %v3815_v17  ;;  %v4028_v58 = vld [vmem:[#allocation2] sm:$0x1] }
 0x415   : > { %v5956_v31 = vpop.eup %5955 }
 0x416   : > { %v3843_v34 = vmul.f32 %v5956_v31, %v3376_v5  ;;  %3967 = vadd.xlane.f32.xlu1 %v3966_v0  ;;  %v3820_v6 = vsel %vm3819_vm12, %v5952_v3, %v3816_v46  ;;  %v5958_v52 = vpop.eup %5957  ;;  %vm3848_vm14 = vweird.f32 %v5956_v31 }
 0x417   : > { %v3825_v59 = vsel %vm3822_vm13, %v3824_v40, %v3820_v6  ;;  %vm3849_vm0 = vmor %vm3847_vm15, %vm3848_vm14  ;;  %v5960_v35 = vpop.eup %5959 }
 0x418   : > { %v3844_v44 = vsub.f32 1.0, %v3843_v34  ;;  %v3886_v28 = vmul.f32 %v5958_v52, %v3825_v59 }
 0x41a   : > { %v3924_v32 = vmul.f32 %v7318_v11, %v3886_v28  ;;  %v3845_v12 = vmul.f32 %v5956_v31, %v3844_v44 }
 0x41c   : > { %v3969_v23 = vadd.f32 %v3924_v32, %v3923_v18  ;;  %v3846_v27 = vadd.f32 %v5956_v31, %v3845_v12 }
 0x41e   : > { %3970 = vadd.xlane.f32.xlu2 %v3969_v23  ;;  %v3850_v62 = vsel %vm3849_vm0, %v5956_v31, %v3846_v27 }
 0x41f   : > { %v3855_v39 = vsel %vm3852_vm1, %v3854_v43, %v3850_v62 }
 0x420   : > { %v3888_v24 = vmul.f32 %v5960_v35, %v3855_v39  ;;  %v4054_v35 = vld [vmem:[#allocation4] sm:$0xf] }
 0x421   : > { %v3929_v54 = vpop.xlane.xlu0 %3928 }
 0x422   : > { %v3926_v29 = vmul.f32 %v7318_v11, %v3888_v24  ;;  %v3979_v38 = vadd.f32 %v5768_v53, %v3929_v54 }
 0x424   : > { %v3972_v1 = vadd.f32 %v3926_v29, %v3925_v10  ;;  %v4129_v10 = vlaneseq }
 0x426   : > { %3973 = vadd.xlane.f32.xlu0 %v3972_v1  ;;  %vm4131_vm6 = vcmp.lt.s32.totalorder %v4129_v10, 512 }
 0x429   : > { %v3932_v26 = vpop.xlane.xlu0 %3931 }
 0x42a   : > { %v3980_v13 = vadd.f32 %v5768_v53, %v3932_v26 }
 0x431   : > { %v3935_v15 = vpop.xlane.xlu1 %3934 }
 0x432   : > { %v3981_v20 = vadd.f32 %v5768_v53, %v3935_v15 }
 0x439   : > { %v3938_v14 = vpop.xlane.xlu1 %3937 }
 0x43a   : > { %v3982_v61 = vadd.f32 %v5768_v53, %v3938_v14 }
 0x441   : > { %v3941_v2 = vpop.xlane.xlu2 %3940 }
 0x442   : > { %v3983_v37 = vadd.f32 %v5768_v53, %v3941_v2 }
 0x449   : > { %v3944_v4 = vpop.xlane.xlu2 %3943 }
 0x44a   : > { %v3984_v63 = vadd.f32 %v5768_v53, %v3944_v4 }
 0x450   : > { %3995 = vxpose.xlu1.b32.start [1/16] (narrow) %v3979_v38, 8 }
 0x451   : > { %v3947_v11 = vpop.xlane.xlu0 %3946 }
 0x452   : > { %v3985_v50 = vadd.f32 %v5768_v53, %v3947_v11 }
 0x458   : > { %3996 = vxpose.xlu1.b32.cont [2/16] (narrow) %v3980_v13, 8 }
 0x459   : > { %v3950_v60 = vpop.xlane.xlu1 %3949 }
 0x45a   : > { %v3986_v9 = vadd.f32 %v5768_v53, %v3950_v60 }
 0x460   : > { %3997 = vxpose.xlu1.b32.cont [3/16] (narrow) %v3981_v20, 8 }
 0x461   : > { %v3953_v22 = vpop.xlane.xlu2 %3952 }
 0x462   : > { %v3987_v55 = vadd.f32 %v5768_v53, %v3953_v22 }
 0x468   : > { %3998 = vxpose.xlu1.b32.cont [4/16] (narrow) %v3982_v61, 8 }
 0x469   : > { %v3956_v51 = vpop.xlane.xlu0 %3955 }
 0x46a   : > { %v3988_v25 = vadd.f32 %v5768_v53, %v3956_v51 }
 0x470   : > { %3999 = vxpose.xlu1.b32.cont [5/16] (narrow) %v3983_v37, 8 }
 0x471   : > { %v3959_v36 = vpop.xlane.xlu1 %3958 }
 0x472   : > { %v3989_v49 = vadd.f32 %v5768_v53, %v3959_v36 }
 0x478   : > { %4000 = vxpose.xlu1.b32.cont [6/16] (narrow) %v3984_v63, 8 }
 0x479   : > { %v3962_v42 = vpop.xlane.xlu2 %3961 }
 0x47a   : > { %v3990_v7 = vadd.f32 %v5768_v53, %v3962_v42 }
 0x480   : > { %4001 = vxpose.xlu1.b32.cont [7/16] (narrow) %v3985_v50, 8 }
 0x481   : > { %v3965_v3 = vpop.xlane.xlu0 %3964 }
 0x482   : > { %v3991_v5 = vadd.f32 %v5768_v53, %v3965_v3 }
 0x488   : > { %4002 = vxpose.xlu1.b32.cont [8/16] (narrow) %v3986_v9, 8 }
 0x489   : > { %v3968_v41 = vpop.xlane.xlu1 %3967 }
 0x48a   : > { %v3992_v30 = vadd.f32 %v5768_v53, %v3968_v41 }
 0x490   : > { %4003 = vxpose.xlu1.b32.cont [9/16] (narrow) %v3987_v55, 8 }
 0x491   : > { %v3971_v8 = vpop.xlane.xlu2 %3970 }
 0x492   : > { %v3993_v33 = vadd.f32 %v5768_v53, %v3971_v8 }
 0x498   : > { %4004 = vxpose.xlu1.b32.cont [10/16] (narrow) %v3988_v25, 8 }
 0x499   : > { %v3974_v48 = vpop.xlane.xlu0 %3973 }
 0x49a   : > { %v3994_v19 = vadd.f32 %v5768_v53, %v3974_v48 }
 0x4a0   : > { %4005 = vxpose.xlu1.b32.cont [11/16] (narrow) %v3989_v49, 8 }
 0x4a8   : > { %4006 = vxpose.xlu1.b32.cont [12/16] (narrow) %v3990_v7, 8 }
 0x4b0   : > { %4007 = vxpose.xlu1.b32.cont [13/16] (narrow) %v3991_v5, 8 }
 0x4b8   : > { %4008 = vxpose.xlu1.b32.cont [14/16] (narrow) %v3992_v30, 8 }
 0x4c0   : > { %4009 = vxpose.xlu1.b32.cont [15/16] (narrow) %v3993_v33, 8 }
 0x4c8   : > { %4010 = vxpose.xlu1.b32.end [16/16] (narrow) %v3994_v19, 8 }
 0x4f4   : > { %v4011_v21 = vpop.trf.xlu1 }
 0x4f5   : > { %4027 = vst [vmem:[%s6448_s9] sm:$0x1] %v4011_v21  ;;  %v4030_v57 = vsel %vm4029_vm2, %v4011_v21, -inf }
 0x4f6   : > { %4031 = vmax.xlane.f32.xlu2 %v4030_v57 }
 0x569   : > { %v4032_v17 = vpop.xlane.xlu2 %4031 }
 0x56a   : > { %v4033_v45 = vmax.f32 %v4028_v58, %v4032_v17 }
 0x56c   : > { %v4034_v0 = vsub.f32 %v4028_v58, %v4033_v45  ;;  %4134 = vst.msk [vmem:[#allocation2] sm:$0x1] %vm4052_vm3, %v4033_v45  ;;  %4039 = vperm.xlu0 %5766, %v4033_v45  }
 0x56e   : > { %v4035_v46 = vmul.f32 1.442695, %v4034_v0 }
 0x570   : > { %5961 = vpow2.f32 %v4035_v46 }
 0x576   : > { %v5962_v31 = vpop.eup %5961 }
 0x577   : > { %4057 = vperm.xlu2 %5767, %v5962_v31   ;;  %v4047_v32 = vmul.f32 %v5962_v31, %v4046_v56 }
 0x5d1   : > { %v4058_v18 = vpop.permute.xlu2 %4057 }
 0x5d2   : > { %v4060_v43 = vperm.slane %v4058_v18, 0 }
 0x5d4   : > { %v4061_v38 = vmul.f32 %v4060_v43, %v4054_v35 }
 0x5de   : > { %v4040_v40 = vpop.permute.xlu0 %4039 }
 0x5df   : > { %v4042_v34 = vperm.slane %v4040_v40, 0 }
 0x5e1   : > { %v4043_v6 = vsub.f32 %v4011_v21, %v4042_v34 }
 0x5e3   : > { %v4044_v52 = vmul.f32 1.442695, %v4043_v6 }
 0x5e5   : > { %5963 = vpow2.f32 %v4044_v52 }
 0x5eb   : > { %v5964_v59 = vpop.eup %5963 }
 0x5ec   : > { %v4062_v44 = vpack.c.bf16 %v5964_v59, %v5964_v59  ;;  %v4048_v28 = vsel %vm4029_vm2, %v5964_v59, 0.0 }
 0x5ed   : > { %4049 = vadd.xlane.f32.xlu2 %v4048_v28 }
 0x5ee   : > { %4071 = vmatmul.bf16.vlgmr.msra.gmra.mxu0 %v4062_v44  ;;  %4084 = vmatmul.bf16.vlgmr.msra.gmra.mxu1 %v4062_v44 }
 0x5ef   : > { %4097 = vmatmul.bf16.vlgmr.msra.gmra.mxu2 %v4062_v44  ;;  %4110 = vmatmul.bf16.vlgmr.msra.gmra.mxu3 %v4062_v44 }
 0x660   : > { %v4050_v12 = vpop.xlane.xlu2 %4049 }
 0x661   : > { %v4051_v16 = vadd.f32 %v4050_v12, %v4047_v32 }
 0x663   : > { %4053 = vst.msk [vmem:[#allocation3] sm:$0x1] %vm4052_vm3, %v4051_v16 }
 0x66b   : > { %v4072_v23 = vpop.f32.mrf.mxu0  ;;  %v4085_v27 = vpop.f32.mrf.mxu1 }
 0x66c   : > { %v4119_v62 = vrot.slane %v4085_v27, 7 }
 0x66e   : > { %v4122_v26 = vsel %vm4029_vm2, %v4072_v23, %v4119_v62 }
 0x672   : > { %v4098_v39 = vpop.f32.mrf.mxu2  ;;  %v4111_v24 = vpop.f32.mrf.mxu3 }
 0x673   : > { %v4120_v29 = vrot.slane %v4098_v39, 6  ;;  %v4121_v1 = vrot.slane %v4111_v24, 5  ;;  %v4074_v54 = vpop.f32.mrf.mxu0  ;;  %v4087_v53 = vpop.f32.mrf.mxu1 }
 0x675   : > { %v4124_v13 = vsel %vm4123_vm4, %v4120_v29, %v4121_v1 }
 0x676   : > { %v4126_v15 = vsel %vm4125_vm5, %v4122_v26, %v4124_v13  ;;  %4138 = sbr.rel (%p5414_p11) target bundleno = 1937 (0x791), region = 72 }
 0x677   : > { %v4128_v20 = vadd.f32 %v4126_v15, %v4061_v38 }
 0x679   : > { %4133 = vst.msk [vmem:[#allocation4] sm:$0xf] %vm4131_vm6, %v4128_v20 }
 0x67a   : > { %v4100_v14 = vpop.f32.mrf.mxu2  ;;  %v4113_v61 = vpop.f32.mrf.mxu3 }
 0x67b   : > { %v4140_v2 = vld [vmem:[#allocation3] sm:$0x1]  ;;  %v4177_v37 = vld [vmem:[%s7827_s7 + $0x78] sm:$0xff]  ;;  %v6224_v63 = vmov 0   ;;  %v4176_v60 = vld [vmem:[%s7827_s7 + $0x70] sm:$0xff]  ;;  %vm4316_vm11 = vcmask 8192  }
 0x67c   : > { %v4193_v4 = vld [vmem:[%s7827_s7 + $0xf8] sm:$0xff]  ;;  %5966 = vset.pattern.permute.xlu0 %v6224_v63  ;;  %4236 = vmatpush.msra.mxu0 %v4177_v37  ;;  %v4192_v9 = vld [vmem:[%s7827_s7 + $0xf0] sm:$0xff]  ;;  %v4175_v51 = vld [vmem:[%s7827_s7 + $0x68] sm:$0xff] }
 0x67d   : > { %v4209_v11 = vld [vmem:[%s7827_s7 + $0x178] sm:$0xff]  ;;  %4143 = vperm.xlu0 %5966, %v4140_v2   ;;  %4256 = vmatpush.msra.mxu1 %v4193_v4  ;;  %v4208_v22 = vld [vmem:[%s7827_s7 + $0x170] sm:$0xff]  ;;  %v4191_v25 = vld [vmem:[%s7827_s7 + $0xe8] sm:$0xff] }
 0x67e   : > { %v4225_v50 = vld [vmem:[%s7827_s7 + $0x1f8] sm:$0xff]  ;;  %v4224_v55 = vld [vmem:[%s7827_s7 + $0x1f0] sm:$0xff]  ;;  %4276 = vmatpush.msra.mxu2 %v4209_v11  ;;  %4237 = vmatpush.msra.mxu0 %v4176_v60  ;;  %v4207_v36 = vld [vmem:[%s7827_s7 + $0x168] sm:$0xff] }
 0x67f   : > { %4296 = vmatpush.msra.mxu3 %v4225_v50  ;;  %4257 = vmatpush.msra.mxu1 %v4192_v9  ;;  %v4223_v49 = vld [vmem:[%s7827_s7 + $0x1e8] sm:$0xff]  ;;  %v4174_v42 = vld [vmem:[%s7827_s7 + $0x60] sm:$0xff]  ;;  %v4173_v41 = vld [vmem:[%s7827_s7 + $0x58] sm:$0xff] }
 0x680   : > { %4277 = vmatpush.msra.mxu2 %v4208_v22  ;;  %v4190_v7 = vld [vmem:[%s7827_s7 + $0xe0] sm:$0xff]  ;;  %4238 = vmatpush.msra.mxu0 %v4175_v51  ;;  %v4189_v30 = vld [vmem:[%s7827_s7 + $0xd8] sm:$0xff]  ;;  %v4172_v48 = vld [vmem:[%s7827_s7 + $0x50] sm:$0xff] }
 0x681   : > { %4297 = vmatpush.msra.mxu3 %v4224_v55  ;;  %4258 = vmatpush.msra.mxu1 %v4191_v25  ;;  %v4206_v3 = vld [vmem:[%s7827_s7 + $0x160] sm:$0xff]  ;;  %v4205_v8 = vld [vmem:[%s7827_s7 + $0x158] sm:$0xff]  ;;  %v4188_v19 = vld [vmem:[%s7827_s7 + $0xd0] sm:$0xff] }
 0x682   : > { %v4222_v5 = vld [vmem:[%s7827_s7 + $0x1e0] sm:$0xff]  ;;  %4278 = vmatpush.msra.mxu2 %v4207_v36  ;;  %4239 = vmatpush.msra.mxu0 %v4174_v42  ;;  %v4221_v33 = vld [vmem:[%s7827_s7 + $0x1d8] sm:$0xff]  ;;  %v4204_v21 = vld [vmem:[%s7827_s7 + $0x150] sm:$0xff] }
 0x683   : > { %4298 = vmatpush.msra.mxu3 %v4223_v49  ;;  %4259 = vmatpush.msra.mxu1 %v4190_v7  ;;  %v4220_v57 = vld [vmem:[%s7827_s7 + $0x1d0] sm:$0xff]  ;;  %v4171_v47 = vld [vmem:[%s7827_s7 + $0x48] sm:$0xff]  ;;  %v4170_v0 = vld [vmem:[%s7827_s7 + $0x40] sm:$0xff] }
 0x684   : > { %4279 = vmatpush.msra.mxu2 %v4206_v3  ;;  %4240 = vmatpush.msra.mxu0 %v4173_v41  ;;  %v4187_v58 = vld [vmem:[%s7827_s7 + $0xc8] sm:$0xff]  ;;  %v4186_v46 = vld [vmem:[%s7827_s7 + $0xc0] sm:$0xff]  ;;  %v4169_v34 = vld [vmem:[%s7827_s7 + $0x38] sm:$0xff] }
 0x685   : > { %4299 = vmatpush.msra.mxu3 %v4222_v5  ;;  %4260 = vmatpush.msra.mxu1 %v4189_v30  ;;  %v4203_v17 = vld [vmem:[%s7827_s7 + $0x148] sm:$0xff]  ;;  %v4202_v31 = vld [vmem:[%s7827_s7 + $0x140] sm:$0xff]  ;;  %v4185_v6 = vld [vmem:[%s7827_s7 + $0xb8] sm:$0xff] }
 0x686   : > { %4280 = vmatpush.msra.mxu2 %v4205_v8  ;;  %4241 = vmatpush.msra.mxu0 %v4172_v48  ;;  %v4219_v45 = vld [vmem:[%s7827_s7 + $0x1c8] sm:$0xff]  ;;  %v4218_v40 = vld [vmem:[%s7827_s7 + $0x1c0] sm:$0xff]  ;;  %v4201_v52 = vld [vmem:[%s7827_s7 + $0x138] sm:$0xff] }
 0x687   : > { %4300 = vmatpush.msra.mxu3 %v4221_v33  ;;  %4261 = vmatpush.msra.mxu1 %v4188_v19  ;;  %v4217_v59 = vld [vmem:[%s7827_s7 + $0x1b8] sm:$0xff]  ;;  %v4168_v44 = vld [vmem:[%s7827_s7 + $0x30] sm:$0xff]  ;;  %v4167_v32 = vld [vmem:[%s7827_s7 + $0x28] sm:$0xff] }
 0x688   : > { %4281 = vmatpush.msra.mxu2 %v4204_v21  ;;  %4242 = vmatpush.msra.mxu0 %v4171_v47  ;;  %v4184_v28 = vld [vmem:[%s7827_s7 + $0xb0] sm:$0xff]  ;;  %v4183_v12 = vld [vmem:[%s7827_s7 + $0xa8] sm:$0xff]  ;;  %v4166_v27 = vld [vmem:[%s7827_s7 + $0x20] sm:$0xff] }
 0x689   : > { %4301 = vmatpush.msra.mxu3 %v4220_v57  ;;  %4262 = vmatpush.msra.mxu1 %v4187_v58  ;;  %v4200_v18 = vld [vmem:[%s7827_s7 + $0x130] sm:$0xff]  ;;  %v4199_v16 = vld [vmem:[%s7827_s7 + $0x128] sm:$0xff]  ;;  %v4182_v43 = vld [vmem:[%s7827_s7 + $0xa0] sm:$0xff] }
 0x68a   : > { %4282 = vmatpush.msra.mxu2 %v4203_v17  ;;  %4243 = vmatpush.msra.mxu0 %v4170_v0  ;;  %v4216_v56 = vld [vmem:[%s7827_s7 + $0x1b0] sm:$0xff]  ;;  %v4215_v23 = vld [vmem:[%s7827_s7 + $0x1a8] sm:$0xff]  ;;  %v4198_v62 = vld [vmem:[%s7827_s7 + $0x120] sm:$0xff] }
 0x68b   : > { %4302 = vmatpush.msra.mxu3 %v4219_v45  ;;  %4263 = vmatpush.msra.mxu1 %v4186_v46  ;;  %v4214_v35 = vld [vmem:[%s7827_s7 + $0x1a0] sm:$0xff]  ;;  %v4165_v39 = vld [vmem:[%s7827_s7 + $0x18] sm:$0xff]  ;;  %v4164_v1 = vld [vmem:[%s7827_s7 + $0x10] sm:$0xff] }
 0x68c   : > { %4283 = vmatpush.msra.mxu2 %v4202_v31  ;;  %4244 = vmatpush.msra.mxu0 %v4169_v34  ;;  %v4181_v24 = vld [vmem:[%s7827_s7 + $0x98] sm:$0xff]  ;;  %v4180_v54 = vld [vmem:[%s7827_s7 + $0x90] sm:$0xff]  ;;  %v4163_v26 = vld [vmem:[%s7827_s7 + $0x8] sm:$0xff] }
 0x68d   : > { %4303 = vmatpush.msra.mxu3 %v4218_v40  ;;  %4264 = vmatpush.msra.mxu1 %v4185_v6  ;;  %v4197_v10 = vld [vmem:[%s7827_s7 + $0x118] sm:$0xff]  ;;  %v4196_v53 = vld [vmem:[%s7827_s7 + $0x110] sm:$0xff]  ;;  %v4179_v13 = vld [vmem:[%s7827_s7 + $0x88] sm:$0xff] }
 0x68e   : > { %4284 = vmatpush.msra.mxu2 %v4201_v52  ;;  %4245 = vmatpush.msra.mxu0 %v4168_v44  ;;  %v4213_v29 = vld [vmem:[%s7827_s7 + $0x198] sm:$0xff]  ;;  %v4212_v38 = vld [vmem:[%s7827_s7 + $0x190] sm:$0xff]  ;;  %v4195_v15 = vld [vmem:[%s7827_s7 + $0x108] sm:$0xff] }
 0x68f   : > { %4304 = vmatpush.msra.mxu3 %v4217_v59  ;;  %4265 = vmatpush.msra.mxu1 %v4184_v28  ;;  %v4211_v20 = vld [vmem:[%s7827_s7 + $0x188] sm:$0xff]  ;;  %v4162_v14 = vld [vmem:[%s7827_s7] sm:$0xff] }
 0x690   : > { %4285 = vmatpush.msra.mxu2 %v4200_v18  ;;  %4246 = vmatpush.msra.mxu0 %v4167_v32  ;;  %v4178_v61 = vld [vmem:[%s7827_s7 + $0x80] sm:$0xff] }
 0x691   : > { %4305 = vmatpush.msra.mxu3 %v4216_v56  ;;  %4266 = vmatpush.msra.mxu1 %v4183_v12  ;;  %v4194_v2 = vld [vmem:[%s7827_s7 + $0x100] sm:$0xff] }
 0x692   : > { %4286 = vmatpush.msra.mxu2 %v4199_v16  ;;  %4247 = vmatpush.msra.mxu0 %v4166_v27  ;;  %v4210_v37 = vld [vmem:[%s7827_s7 + $0x180] sm:$0xff] }
 0x693   : > { %4306 = vmatpush.msra.mxu3 %v4215_v23  ;;  %4267 = vmatpush.msra.mxu1 %v4182_v43  ;;  %v4139_v36 = vld [vmem:[#allocation4] sm:$0xf]  ;;  %v4226_v8 = vld [vmem:[%s7828_s8] sm:$0x1] }
 0x694   : > { %4287 = vmatpush.msra.mxu2 %v4198_v62  ;;  %4248 = vmatpush.msra.mxu0 %v4165_v39 }
 0x695   : > { %4307 = vmatpush.msra.mxu3 %v4214_v35  ;;  %4268 = vmatpush.msra.mxu1 %v4181_v24 }
 0x696   : > { %4288 = vmatpush.msra.mxu2 %v4197_v10  ;;  %4249 = vmatpush.msra.mxu0 %v4164_v1 }
 0x697   : > { %4308 = vmatpush.msra.mxu3 %v4213_v29  ;;  %4269 = vmatpush.msra.mxu1 %v4180_v54 }
 0x698   : > { %4289 = vmatpush.msra.mxu2 %v4196_v53  ;;  %4250 = vmatpush.msra.mxu0 %v4163_v26 }
 0x699   : > { %4309 = vmatpush.msra.mxu3 %v4212_v38  ;;  %4270 = vmatpush.msra.mxu1 %v4179_v13 }
 0x69a   : > { %4290 = vmatpush.msra.mxu2 %v4195_v15  ;;  %4251 = vmatpush.msra.mxu0 %v4162_v14 }
 0x69b   : > { %4310 = vmatpush.msra.mxu3 %v4211_v20  ;;  %4271 = vmatpush.msra.mxu1 %v4178_v61 }
 0x69c   : > { %4291 = vmatpush.msra.mxu2 %v4194_v2 }
 0x69d   : > { %4311 = vmatpush.msra.mxu3 %v4210_v37 }
 0x6ef   : > { %v4144_v4 = vpop.permute.xlu0 %4143 }
 0x6f0   : > { %v4146_v63 = vperm.slane %v4144_v4, 0 }
 0x6f2   : > { %5967 = vrcp.f32 %v4146_v63  ;;  %v4158_v9 = vand.u32 2147483648, %v4146_v63  ;;  %v4156_v55 = vand.u32 2147483647, %v4146_v63  ;;  %vm4152_vm8 = vweird.f32 %v4146_v63 }
 0x6f4   : > { %v4159_v25 = vor.u32 1.1754944e-38, %v4158_v9  ;;  %vm4157_vm10 = vcmp.eq.f32.partialorder %v4156_v55, 8.507059e+37 }
 0x6f8   : > { %v5968_v11 = vpop.eup %5967 }
 0x6f9   : > { %v4148_v50 = vmul.f32 %v5968_v11, %v4146_v63  ;;  %vm4153_vm7 = vweird.f32 %v5968_v11 }
 0x6fa   : > { %vm4154_vm9 = vmor %vm4152_vm8, %vm4153_vm7 }
 0x6fb   : > { %v4149_v60 = vsub.f32 1.0, %v4148_v50 }
 0x6fd   : > { %v4150_v22 = vmul.f32 %v5968_v11, %v4149_v60 }
 0x6ff   : > { %v4151_v51 = vadd.f32 %v5968_v11, %v4150_v22 }
 0x701   : > { %v4155_v49 = vsel %vm4154_vm9, %v5968_v11, %v4151_v51 }
 0x702   : > { %v4160_v42 = vsel %vm4157_vm10, %v4159_v25, %v4155_v49 }
 0x703   : > { %v4161_v7 = vmul.f32 %v4160_v42, %v4139_v36 }
 0x705   : > { %v4228_v3 = vperm.slane %v4161_v7, 0  ;;  %v4229_v5 = vperm.slane %v4161_v7, 1  ;;  %v4230_v41 = vperm.slane %v4161_v7, 2  ;;  %v4231_v30 = vperm.slane %v4161_v7, 3 }
 0x707   : > { %4252 = vmatmul.f32.vlgmr.msra.gmra.mxu0 %v4228_v3  ;;  %4272 = vmatmul.f32.vlgmr.msra.gmra.mxu1 %v4229_v5 }
 0x708   : > { %4292 = vmatmul.f32.vlgmr.msra.gmra.mxu2 %v4230_v41  ;;  %4312 = vmatmul.f32.vlgmr.msra.gmra.mxu3 %v4231_v30 }
 0x784   : > { %v4253_v33 = vpop.f32.mrf.mxu0  ;;  %v4273_v19 = vpop.f32.mrf.mxu1 }
 0x785   : > { %v4254_v48 = vadd.f32 %v4253_v33, %v4226_v8 }
 0x787   : > { %v4274_v21 = vadd.f32 %v4273_v19, %v4254_v48 }
 0x78b   : > { %v4293_v57 = vpop.f32.mrf.mxu2  ;;  %v4313_v58 = vpop.f32.mrf.mxu3 }
 0x78c   : > { %v4294_v47 = vadd.f32 %v4293_v57, %v4274_v21 }
 0x78e   : > { %v4314_v17 = vadd.f32 %v4313_v58, %v4294_v47 }
 0x790   : > { %4317 = vst.msk [vmem:[%s6446_s24] sm:$0x1] %vm4316_vm11, %v4314_v17 }
 0x791 PF: > { %s4322_s14 = sand.u32 1, %s6346_s29   ;;  %s5416_s16 = sshll.u32 %s6203_s25, 1 }
 0x792   : > { %s4350_s18 = sadd.s32 %s6199_s6, %s5416_s16  ;;  %s4353_s27 = sshll.u32 %s6448_s9, 4  ;;  %s4354_s27 = int_to_ptr.vmem [resolvable:$true] %s4353_s27 }
 0x793   : > { %s4351_s26 = scalar_lea.hbm %s7830_s10, %s4350_s18  ;;  %s7732_s13 = scalar_lea.sflag [#allocation13], %s4322_s14 }
 0x794   : > { %s4355_s3 = sshll.u32 %s4351_s26, 4  ;;  %s6049_s16 = scalar_lea.hbm %s7830_s10, 4  ;;  %s4356_s3 = int_to_ptr.hbm [resolvable:$true] %s4355_s3 }
 0x795   : > { %s6043_s30 = sshra.s32 %s4356_s3, 4  ;;  %s6044_s30 = int_to_ptr.hbm [resolvable:$true] %s6043_s30 }
 0x796   : > { %s6045_s17 = scalar_lea.hbm %s6044_s30, 1  ;;  %p6050_p2 = scmp.lt.s32.totalorder %s6044_s30, %s7830_s10 }
 0x797   : > { %p6046_p0 = scmp.ne.s32.totalorder %s6044_s30, %s6045_s17  ;;  %p6051_p5 = scmp.lt.s32.totalorder %s6049_s16, %s6045_s17 }
 0x799   : > { %p6047_p1 = pnand %p6046_p0, %p6391_p12  ;;  %p6052_p6 = por %p6051_p5, %p6050_p2 }
 0x79b   : > { %p6048_p4 = pneg %p6047_p1 }
 0x79d   : > { %p6053_p8 = pnand %p6052_p6, %p6048_p4 }
 0x79f   : > { %6056 = shalt.err (!%p6053_p8)
}
 0x7a0   : > { %5641 = dma.vmem_to_hbm [thread:$0]  (%p6391_p12), %s4354_s27, 16, %s4356_s3, %s7732_s13  }
 0x7a1   : > { %s7910_s18 = sld [smem:[#allocation51_spill]]  ;;  %s4338_s26 = sshll.u32 %s6446_s24, 4  ;;  %s4339_s26 = int_to_ptr.vmem [resolvable:$true] %s4338_s26 }
 0x7a2   : > { %s5631_s30 = sshll.u32 %s6199_s6, 6  ;;  %s7911_s17 = sand.u32 1, %s6191_s23  }
 0x7a3   : > { %s4319_s29 = scalar_lea.sflag [#allocation8], %s7911_s17 }
 0x7a7   : > { %s4336_s22 = scalar_lea.hbm %s7910_s18, %s6203_s25  ;;  %s6077_s3 = scalar_lea.hbm %s7910_s18, 2 }
 0x7a8   : > { %s4340_s0 = sshll.u32 %s4336_s22, 4  ;;  %s4341_s0 = int_to_ptr.hbm [resolvable:$true] %s4340_s0 }
 0x7a9   : > { %s6071_s16 = sshra.s32 %s4341_s0, 4  ;;  %s6072_s16 = int_to_ptr.hbm [resolvable:$true] %s6071_s16 }
 0x7aa   : > { %s6073_s19 = scalar_lea.hbm %s6072_s16, 1  ;;  %p6078_p0 = scmp.lt.s32.totalorder %s6072_s16, %s7910_s18 }
 0x7ab   : > { %p6074_p9 = scmp.ne.s32.totalorder %s6072_s16, %s6073_s19  ;;  %p6079_p1 = scmp.lt.s32.totalorder %s6077_s3, %s6073_s19 }
 0x7ad   : > { %p6075_p10 = pnand %p6074_p9, %p6360_p3  ;;  %p6080_p4 = por %p6079_p1, %p6078_p0 }
 0x7af   : > { %p6076_p11 = pneg %p6075_p10 }
 0x7b1   : > { %p6081_p2 = pnand %p6080_p4, %p6076_p11 }
 0x7b3   : > { %6084 = shalt.err (!%p6081_p2)
}
 0x7b4   : > { %5640 = dma.vmem_to_hbm [thread:$0]  (%p6360_p3), %s4339_s26, 16, %s4341_s0, %s4319_s29  }
 0x7b5   : > { %s5419_s24 = sshll.u32 %s6203_s25, 7  ;;  %s4370_s6 = sshll.u32 %s6450_s21, 4  ;;  %s4371_s6 = int_to_ptr.vmem [resolvable:$true] %s4370_s6 }
 0x7b6   : > { %s4367_s22 = sadd.s32 %s5631_s30, %s5419_s24  ;;  %s7912_s4 = sld [smem:[#allocation52_spill]] }
 0x7b7   : > { %s5420_s2 = sshll.u32 %s4367_s22, 2 }
 0x7bc   : > { %s4369_s14 = scalar_lea.hbm %s7912_s4, %s5420_s2  ;;  %s6105_s21 = scalar_lea.hbm %s7912_s4, 1024 }
 0x7bd   : > { %s4372_s16 = sshll.u32 %s4369_s14, 4  ;;  %s4373_s16 = int_to_ptr.hbm [resolvable:$true] %s4372_s16 }
 0x7be   : > { %s6099_s19 = sshra.s32 %s4373_s16, 4  ;;  %s6100_s19 = int_to_ptr.hbm [resolvable:$true] %s6099_s19 }
 0x7bf   : > { %s6101_s3 = scalar_lea.hbm %s6100_s19, 256  ;;  %p6106_p3 = scmp.lt.s32.totalorder %s6100_s19, %s7912_s4 }
 0x7c0   : > { %p6102_p5 = scmp.ne.s32.totalorder %s6100_s19, %s6101_s3  ;;  %p6107_p9 = scmp.lt.s32.totalorder %s6105_s21, %s6101_s3 }
 0x7c2   : > { %p6103_p6 = pnand %p6102_p5, %p6391_p12  ;;  %p6108_p10 = por %p6107_p9, %p6106_p3 }
 0x7c4   : > { %p6104_p8 = pneg %p6103_p6 }
 0x7c6   : > { %p6109_p11 = pnand %p6108_p10, %p6104_p8 }
 0x7c8   : > { %6112 = shalt.err (!%p6109_p11)
}
 0x7c9   : > { %s6225_s30 = smov 256   ;;  %s6226_s29 = smov 16  }
 0x7ca   : > { %5642 = dma.vmem_to_hbm [thread:$0]  (%p6391_p12), %s4371_s6, 4096, %s4373_s16, %s7732_s13, %s6225_s30, %s6225_s30, %s6226_s29  }
 0x7cb PF: > { %s7913_s1 = sld [smem:[#allocation20_spill]]  ;;  %p5667_p0 = scmp.ge.s32.totalorder %s6215_s28, 2 }
 0x7cd   : > { %p5654_p1 = pnand %p5667_p0, %p6379_p7 }
 0x7cf   : > { %p5655_p4 = pneg %p5654_p1 }
 0x7d1   : > { %s4387_s24 = sand.u32 1, %s7913_s1  }
 0x7d2   : > { %s4388_s22 = scalar_lea.sflag [#allocation8], %s4387_s24 }
 0x7d3   : > { %6166 = dma.done.wait (%p5655_p4), %s4388_s22, 16  }
 0x7d4   : > { %6168 = vsyncadd (%p5655_p4), %s4388_s22, 4294967280  ;;  %s7914_s2 = sadd.s32 4294967294, %s6215_s28   ;;  %p5657_p2 = pnand %p5667_p0, %p6403_p13 }
 0x7d5   : > { %s4396_s17 = sand.u32 1, %s7914_s2  }
 0x7d6   : > { %p5658_p5 = pneg %p5657_p2  ;;  %s4397_s12 = scalar_lea.sflag [#allocation13], %s4396_s17 }
 0x7d8   : > { %6170 = dma.done.wait (%p5658_p5), %s4397_s12, 4112  }
 0x7d9   : > { %6172 = vsyncadd (%p5658_p5), %s4397_s12, 4294963184  ;;  %s32_s28 = sadd.s32 1, %s6215_s28   ;;  %s7915_s11 = sld [smem:[#allocation19_spill]] }
 0x7da   : > { %p29_p12 = scmp.ge.s32.totalorder %s32_s28, 6   ;;  %s7916_s21 = sld [smem:[#allocation28_spill]] }
 0x7db   : > { %s7917_s13 = sld [smem:[#allocation21_spill]]  ;;  %s7923_s19 = smov %s6179_s20 }
 0x7dc   : > { %s7918_s24 = sld [smem:[#allocation27_spill]]  ;;  %s7925_s22 = smov %s6191_s23 }
 0x7dd   : > { %s7919_s6 = sld [smem:[#allocation22_spill]]  ;;  %31 = sbr.rel (!%p29_p12) target bundleno = 19 (0x13), region = 140 }
 0x7de   : > { %s7920_s25 = sld [smem:[#allocation23_spill]] }
 0x7df   : > { %s7921_s26 = sld [smem:[#allocation24_spill]]  ;;  %s7924_s20 = smov %s7915_s11 }
 0x7e0   : > { %s7922_s27 = sld [smem:[#allocation26_spill]] }
 0x7e1   : > { %s7926_s23 = smov %s7917_s13 }
 0x7e2   :  { %4412 = vsyncpa [#allocation7], 1 }
 0x7e3   :  { %4414 = vsyncpa [#allocation7 + $0x1], 1 }
 0x7e4   :  { %4415 = vsyncpa [#allocation10], 1 }
 0x7e5   :  { %4416 = vsyncpa [#allocation8], 1 }
 0x7e6   :  { %4418 = vsyncpa [#allocation8 + $0x1], 1 }
 0x7e7   :  { %4419 = vsyncpa [#allocation13], 1 }
 0x7e8   :  { %4421 = vsyncpa [#allocation13 + $0x1], 1 }

</bundles_post_ra>
